<compile_context>
chip_gen: v7x
topology: tpu7x:2x2x1
jax: 0.10.0
libtpu: 0.0.40
codegen_flags: <defaults>
</compile_context>

<pallas_src>
from functools import partial

import jax
import jax.numpy as jnp
from jax.experimental import pallas as pl
from jax.experimental.pallas import tpu as pltpu

# Module-consistent (scaled-down) shapes.
B, T, J, C = 256, 8, 68, 2    # audio chunks ("batch"), frames/chunk, landmarks, coords
N = 1024                      # audio samples per chunk (lane axis)
H = 128                       # hidden width (lane aligned)
CJ = C * J                    # 136 raw landmark features
CJP = 256                     # lane-aligned (zero-padded) landmark feature width
TB = 128                      # chunk-tile rows per grid step (MXU M-dim, sublane-full)


def _use_bf16_transcendentals() -> bool:
    """bf16 EUP path exists on v6e/v7x; keep f32 transcendentals on v5e and older."""
    try:
        kind = jax.devices()[0].device_kind.lower()
    except Exception:
        return True
    return not any(t in kind for t in ("v2", "v3", "v4", "v5"))


# --------------------------------------------------------------------------- #
# Fused forward over one chunk tile.
# --------------------------------------------------------------------------- #
def _vovit_forward_kernel(scale_ref, mix_ref, ld_ref, wv_ref, wa_ref, wo_ref,
                          wav_ref, mask_ref, *, bf16_eup):
    inv = scale_ref[0, 0]                               # global 1 / |mixture|.max()
    mix = mix_ref[...]                                  # (TB, N) f32, unnormalized

    # ---- stand-in VoViT core: bf16 MXU matmuls, f32 accumulation ----
    v = jnp.dot(ld_ref[...], wv_ref[...],
                preferred_element_type=jnp.float32)     # (TB, H) visual embedding
    # Audio projection is linear -> fold the global normalization into a scalar
    # rescale of the dot result instead of materializing a normalized f32 mixture.
    a = jnp.dot(mix.astype(jnp.bfloat16), wa_ref[...],
                preferred_element_type=jnp.float32) * inv   # (TB, H) audio embedding

    pre = v + a
    if bf16_eup:
        fused = jnp.tanh(pre.astype(jnp.bfloat16))      # bf16 EUP (v6e/v7x)
    else:
        fused = jnp.tanh(pre).astype(jnp.bfloat16)      # f32 EUP (v5e)

    logits = jnp.dot(fused, wo_ref[...],
                     preferred_element_type=jnp.float32)    # (TB, N)
    if bf16_eup:
        mask = jax.nn.sigmoid(logits.astype(jnp.bfloat16))  # bf16 sigmoid on the EUP
    else:
        mask = jax.nn.sigmoid(logits)

    mask_ref[...] = mask.astype(mask_ref.dtype)
    # estimated wav = normalized mixture * mask; normalization applied only here.
    wav_ref[...] = mix * (mask.astype(jnp.float32) * inv)


def singing_voice_vovit_forward(mixture, visuals, params):
    """mixture: (B, N) float; visuals: (B, T, J, C) landmarks."""
    wv, wa, wo = params
    Bc, Nn = mixture.shape
    assert Bc % TB == 0, "number of chunks must be a multiple of the tile size"
    n_tiles = Bc // TB

    # Wrapper rearrange 'b t j c -> b c t j' (+ .float()), flattened lane-dense to
    # (b, t, c*j) with a single transpose (same feature ordering).
    ld = jnp.transpose(visuals, (0, 1, 3, 2)).astype(jnp.float32).reshape(Bc, T, CJ)
    # Temporal mean of the stand-in core hoisted out of the kernel (8x less DMA);
    # cast bf16 BEFORE the 136 -> 256 lane-alignment pad (half the landmark bytes).
    ld_mean = jnp.mean(ld, axis=1).astype(jnp.bfloat16)            # (B, CJ) bf16
    ld_mean = jnp.pad(ld_mean, ((0, 0), (0, CJP - CJ)))            # (B, CJP) bf16

    # Global abs-max normalization scale (reference: mixture /= mixture.abs().max()).
    # Plain XLA reduction: avoids a second Pallas launch / second HBM read of mixture.
    mixture = mixture.astype(jnp.float32)
    inv = (1.0 / jnp.max(jnp.abs(mixture))).reshape(1, 1).astype(jnp.float32)

    kernel = partial(_vovit_forward_kernel, bf16_eup=_use_bf16_transcendentals())

    wav, mask = pl.pallas_call(
        kernel,
        out_shape=(jax.ShapeDtypeStruct((Bc, Nn), jnp.float32),
                   jax.ShapeDtypeStruct((Bc, Nn), jnp.bfloat16)),
        grid=(n_tiles,),
        in_specs=[
            pl.BlockSpec(memory_space=pltpu.MemorySpace.SMEM),   # global 1/absmax scalar
            pl.BlockSpec((TB, Nn), lambda i: (i, 0)),            # mixture tile
            pl.BlockSpec((TB, CJP), lambda i: (i, 0)),           # pooled landmarks tile
            pl.BlockSpec((CJP, H), lambda i: (0, 0)),            # visual proj (resident)
            pl.BlockSpec((Nn, H), lambda i: (0, 0)),             # audio proj  (resident)
            pl.BlockSpec((H, Nn), lambda i: (0, 0)),             # output proj (resident)
        ],
        out_specs=(
            pl.BlockSpec((TB, Nn), lambda i: (i, 0)),            # estimated wav (f32)
            pl.BlockSpec((TB, Nn), lambda i: (i, 0)),            # mask (bf16)
        ),
        compiler_params=pltpu.CompilerParams(
            dimension_semantics=("parallel",)),
    )(inv, mixture, ld_mean,
      wv.astype(jnp.bfloat16), wa.astype(jnp.bfloat16), wo.astype(jnp.bfloat16))

    return {"estimated_wav": wav, "mask": mask}


def _init_params(key):
    k1, k2, k3 = jax.random.split(key, 3)
    wv = jax.random.normal(k1, (CJP, H), jnp.float32) * (1.0 / jnp.sqrt(CJ))
    wa = jax.random.normal(k2, (N, H), jnp.float32) * (1.0 / jnp.sqrt(N))
    wo = jax.random.normal(k3, (H, N), jnp.float32) * (1.0 / jnp.sqrt(H))
    return wv, wa, wo


if __name__ == "__main__":
    key = jax.random.PRNGKey(0)
    k_mix, k_vis, k_par = jax.random.split(key, 3)

    mixture = jax.random.normal(k_mix, (B, N), jnp.float32)
    # Landmarks are integer pixel coordinates in the original module (uint16);
    # use small deterministic integer-valued floats.
    visuals = jnp.round(
        jax.random.uniform(k_vis, (B, T, J, C), jnp.float32, 0.0, 224.0)
    )

    params = _init_params(k_par)

    out = singing_voice_vovit_forward(mixture, visuals, params)
    jax.block_until_ready(out)

    assert out["estimated_wav"].shape == (B, N)
    assert out["estimated_wav"].dtype == jnp.float32
    assert out["mask"].shape == (B, N)
    assert bool(jnp.all(jnp.isfinite(out["estimated_wav"])))
    print("KERNEL_OK")
</pallas_src>

<mosaic_0001>
module attributes {stable_mosaic.version = 11 : i64} {
  func.func @_vovit_forward_kernel(%arg0: i32, %arg1: memref<1x1xf32, #tpu.memory_space<smem>>, %arg2: memref<128x1024xf32, #tpu.memory_space<vmem>>, %arg3: memref<128x256xbf16, #tpu.memory_space<vmem>>, %arg4: memref<256x128xbf16, #tpu.memory_space<vmem>>, %arg5: memref<1024x128xbf16, #tpu.memory_space<vmem>>, %arg6: memref<128x1024xbf16, #tpu.memory_space<vmem>>, %arg7: memref<128x1024xf32, #tpu.memory_space<vmem>>, %arg8: memref<128x1024xbf16, #tpu.memory_space<vmem>>) attributes {dimension_semantics = [#tpu.dimension_semantics<parallel>], iteration_bounds = array<i64: 2>, scalar_prefetch = 0 : i64, scratch_operands = 0 : i64, tpu.core_type = #tpu.core_type<tc>, window_params = [{transform_indices = @transform_0, window_bounds = array<i64: 1, 1>}, {transform_indices = @transform_1, window_bounds = array<i64: 128, 1024>}, {transform_indices = @transform_2, window_bounds = array<i64: 128, 256>}, {pipeline_mode = #tpu.pipeline_mode<synchronous>, transform_indices = @transform_3, window_bounds = array<i64: 256, 128>}, {pipeline_mode = #tpu.pipeline_mode<synchronous>, transform_indices = @transform_4, window_bounds = array<i64: 1024, 128>}, {pipeline_mode = #tpu.pipeline_mode<synchronous>, transform_indices = @transform_5, window_bounds = array<i64: 128, 1024>}, {transform_indices = @transform_6, window_bounds = array<i64: 128, 1024>}, {transform_indices = @transform_7, window_bounds = array<i64: 128, 1024>}]} {
    %c0 = arith.constant 0 : index
    %c0_0 = arith.constant 0 : index
    %0 = memref.load %arg1[%c0, %c0_0] : memref<1x1xf32, #tpu.memory_space<smem>>
    %c0_1 = arith.constant 0 : index
    %c0_2 = arith.constant 0 : index
    %1 = vector.load %arg2[%c0_1, %c0_2] : memref<128x1024xf32, #tpu.memory_space<vmem>>, vector<128x1024xf32>
    %c0_3 = arith.constant 0 : index
    %c0_4 = arith.constant 0 : index
    %2 = vector.load %arg3[%c0_3, %c0_4] : memref<128x256xbf16, #tpu.memory_space<vmem>>, vector<128x256xbf16>
    %c0_5 = arith.constant 0 : index
    %c0_6 = arith.constant 0 : index
    %3 = vector.load %arg4[%c0_5, %c0_6] : memref<256x128xbf16, #tpu.memory_space<vmem>>, vector<256x128xbf16>
    %cst = arith.constant dense<0.000000e+00> : vector<128x128xf32>
    %4 = tpu.matmul %2, %3, %cst {dimension_numbers = #tpu.dot_dimension_numbers<[1], [0], [0], [1], [0, 0, 1, 1], [], []>} : vector<128x256xbf16>, vector<256x128xbf16>, vector<128x128xf32> -> vector<128x128xf32>
    %5 = arith.truncf %1 : vector<128x1024xf32> to vector<128x1024xbf16>
    %c0_7 = arith.constant 0 : index
    %c0_8 = arith.constant 0 : index
    %6 = vector.load %arg5[%c0_7, %c0_8] : memref<1024x128xbf16, #tpu.memory_space<vmem>>, vector<1024x128xbf16>
    %cst_9 = arith.constant dense<0.000000e+00> : vector<128x128xf32>
    %7 = tpu.matmul %5, %6, %cst_9 {dimension_numbers = #tpu.dot_dimension_numbers<[1], [0], [0], [1], [0, 0, 1, 1], [], []>} : vector<128x1024xbf16>, vector<1024x128xbf16>, vector<128x128xf32> -> vector<128x128xf32>
    %8 = vector.broadcast %0 : f32 to vector<128x128xf32>
    %9 = arith.mulf %7, %8 : vector<128x128xf32>
    %10 = arith.addf %4, %9 : vector<128x128xf32>
    %11 = arith.truncf %10 : vector<128x128xf32> to vector<128x128xbf16>
    %12 = math.tanh %11 : vector<128x128xbf16>
    %c0_10 = arith.constant 0 : index
    %c0_11 = arith.constant 0 : index
    %13 = vector.load %arg6[%c0_10, %c0_11] : memref<128x1024xbf16, #tpu.memory_space<vmem>>, vector<128x1024xbf16>
    %cst_12 = arith.constant dense<0.000000e+00> : vector<128x1024xf32>
    %14 = tpu.matmul %12, %13, %cst_12 {dimension_numbers = #tpu.dot_dimension_numbers<[1], [0], [0], [1], [0, 0, 1, 1], [], []>} : vector<128x128xbf16>, vector<128x1024xbf16>, vector<128x1024xf32> -> vector<128x1024xf32>
    %15 = arith.truncf %14 : vector<128x1024xf32> to vector<128x1024xbf16>
    %16 = arith.negf %15 : vector<128x1024xbf16>
    %17 = math.exp %16 : vector<128x1024xbf16>
    %cst_13 = arith.constant 1.000000e+00 : bf16
    %18 = vector.broadcast %cst_13 : bf16 to vector<128x1024xbf16>
    %19 = arith.addf %18, %17 : vector<128x1024xbf16>
    %20 = arith.divf %18, %19 : vector<128x1024xbf16>
    %c0_14 = arith.constant 0 : index
    %c0_15 = arith.constant 0 : index
    %21 = vector.load %arg8[%c0_14, %c0_15] : memref<128x1024xbf16, #tpu.memory_space<vmem>>, vector<128x1024xbf16>
    tpu.vector_store %arg8[%c0_14, %c0_15], %20 {strides = array<i32>} : memref<128x1024xbf16, #tpu.memory_space<vmem>>, vector<128x1024xbf16>,
    %22 = arith.extf %20 : vector<128x1024xbf16> to vector<128x1024xf32>
    %23 = vector.broadcast %0 : f32 to vector<128x1024xf32>
    %24 = arith.mulf %22, %23 : vector<128x1024xf32>
    %25 = arith.mulf %1, %24 : vector<128x1024xf32>
    %c0_16 = arith.constant 0 : index
    %c0_17 = arith.constant 0 : index
    %26 = vector.load %arg7[%c0_16, %c0_17] : memref<128x1024xf32, #tpu.memory_space<vmem>>, vector<128x1024xf32>
    tpu.vector_store %arg7[%c0_16, %c0_17], %25 {strides = array<i32>} : memref<128x1024xf32, #tpu.memory_space<vmem>>, vector<128x1024xf32>,
    return
  }
  func.func @transform_0(%arg0: i32) -> (i32, i32) {
    %c0_i32 = arith.constant 0 : i32
    %c0_i32_0 = arith.constant 0 : i32
    %c0_i32_1 = arith.constant 0 : i32
    return %c0_i32, %c0_i32_0 : i32, i32
  }
  func.func @transform_1(%arg0: i32) -> (i32, i32) {
    %c0_i32 = arith.constant 0 : i32
    %c0_i32_0 = arith.constant 0 : i32
    return %arg0, %c0_i32 : i32, i32
  }
  func.func @transform_2(%arg0: i32) -> (i32, i32) {
    %c0_i32 = arith.constant 0 : i32
    %c0_i32_0 = arith.constant 0 : i32
    return %arg0, %c0_i32 : i32, i32
  }
  func.func @transform_3(%arg0: i32) -> (i32, i32) {
    %c0_i32 = arith.constant 0 : i32
    %c0_i32_0 = arith.constant 0 : i32
    %c0_i32_1 = arith.constant 0 : i32
    return %c0_i32, %c0_i32_0 : i32, i32
  }
  func.func @transform_4(%arg0: i32) -> (i32, i32) {
    %c0_i32 = arith.constant 0 : i32
    %c0_i32_0 = arith.constant 0 : i32
    %c0_i32_1 = arith.constant 0 : i32
    return %c0_i32, %c0_i32_0 : i32, i32
  }
  func.func @transform_5(%arg0: i32) -> (i32, i32) {
    %c0_i32 = arith.constant 0 : i32
    %c0_i32_0 = arith.constant 0 : i32
    %c0_i32_1 = arith.constant 0 : i32
    return %c0_i32, %c0_i32_0 : i32, i32
  }
  func.func @transform_6(%arg0: i32) -> (i32, i32) {
    %c0_i32 = arith.constant 0 : i32
    %c0_i32_0 = arith.constant 0 : i32
    return %arg0, %c0_i32 : i32, i32
  }
  func.func @transform_7(%arg0: i32) -> (i32, i32) {
    %c0_i32 = arith.constant 0 : i32
    %c0_i32_0 = arith.constant 0 : i32
    return %arg0, %c0_i32 : i32, i32
  }
}

</mosaic_0001>

<bundles_post_ra>
// kernel: tpu_custom_call.1
= control target key start
LH: loop header
LB: loop body
LE: loop exit
PB: predicated region body
PF: predicated region fallthrough
CT: control target
= control target key end

     0   :  { %s7605_s0 = inlined_call_operand.<no memory space> [shape: f32[1,1], index: 0, kind: input, shape index: {}]   ;;  %s7606_s1 = inlined_call_operand.hbm [shape: f32[256,1024], index: 1, kind: input, shape index: {}]   ;;  %s7607_s2 = inlined_call_operand.hbm [shape: bf16[256,256], index: 2, kind: input, shape index: {}]   ;;  %s7608_s3 = inlined_call_operand.hbm [shape: bf16[256,128], index: 3, kind: input, shape index: {}]   ;;  %s7609_s4 = inlined_call_operand.hbm [shape: bf16[1024,128], index: 4, kind: input, shape index: {}]   ;;  %s7610_s5 = inlined_call_operand.hbm [shape: bf16[128,1024], index: 5, kind: input, shape index: {}]   ;;  %s7611_s6 = inlined_call_operand.hbm [shape: f32[256,1024], index: 6, kind: output, shape index: {0}]   ;;  %s7612_s7 = inlined_call_operand.hbm [shape: bf16[256,1024], index: 7, kind: output, shape index: {1}]  }
   0x1   :  { %7630 = sst [smem:[#allocation34_spill]] %s7606_s1 }
   0x2   :  { %7631 = sst [smem:[#allocation35_spill]] %s7608_s3 }
   0x3   :  { %7632 = sst [smem:[#allocation36_spill]] %s7609_s4 }
   0x4   :  { %7633 = sst [smem:[#allocation37_spill]] %s7610_s5 }
   0x5   :  { %13 = sst [smem:[#allocation2]] %s7605_s0 }
   0x6   :  { %14 = vsyncpa [#allocation4], 0 }
   0x7   :  { %16 = vsyncpa [#allocation4 + $0x1], 0 }
   0x8   :  { %17 = vsyncpa [#allocation7], 0 }
   0x9   :  { %19 = vsyncpa [#allocation7 + $0x1], 0 }
   0xa   :  { %20 = vsyncpa [#allocation10], 0 }
   0xb   :  { %21 = vsyncpa [#allocation5], 0 }
   0xc   :  { %23 = vsyncpa [#allocation5 + $0x1], 0 }
   0xd   :  { %24 = vsyncpa [#allocation14], 0 }
   0xe   :  { %26 = vsyncpa [#allocation14 + $0x1], 0  ;;  %s5869_s26 = smov 0   ;;  %s5871_s27 = smov 0  }
   0xf   :  { %s5873_s28 = smov 0   ;;  %s5875_s29 = smov 0  }
  0x10 LB: > { %s5890_s0 = sadd.s32 4294967295, %s5805_s29   ;;  %s4284_s30 = sadd.s32 4294967294, %s5805_s29   ;;  %s5805_s29 = sphi %s5875_s29, %s7722_s29   ;;  %s5801_s28 = sphi %s5873_s28, %s7721_s28   ;;  %s5797_s27 = sphi %s5871_s27, %s7720_s27   ;;  %s5793_s26 = sphi %s5869_s26, %s7719_s26  }
  0x11   : > { %p73_p0 = scmp.ne.s32.totalorder %s5797_s27, %s5793_s26  ;;  %p7613_p1 = scmp.eq.s32.totalorder %s5890_s0, 0 }
  0x12   : > { %p192_p3 = scmp.eq.s32.totalorder %s4284_s30, 1  ;;  %p4285_p5 = scmp.ge.s32.totalorder %s5805_s29, 1 }
  0x13   : > { %p5899_p4 = por %p7613_p1, %p73_p0  ;;  %p225_p7 = scmp.lt.s32.totalorder %s5805_s29, 3 }
  0x14   : > { %p5904_p6 = por %p192_p3, %p73_p0  ;;  %s5807_s11 = smov [#allocation8]  }
  0x15   : > { %s7634_s8 = scalar_select %p5899_p4, 1, 0 }
  0x16   : > { %s7635_s9 = scalar_select %p5904_p6, 1, 0 }
  0x17   : > { %p5909_p8 = pnand %p4285_p5, %p225_p7  ;;  %s240_s12 = sshll.u32 %s5807_s11, 4  ;;  %s5913_s12 = int_to_ptr.vmem [resolvable:$true] %s240_s12 }
  0x18   : > { %s5808_s14 = smov [#allocation9]   ;;  %s5809_s16 = smov [#allocation11]  }
  0x19   : > { %s7636_s10 = scalar_select %p5909_p8, 1, 0 }
  0x1a   : > { %p4968_p9 = pneg %p5909_p8  ;;  %s253_s15 = sshll.u32 %s5808_s14, 4  ;;  %s5924_s15 = int_to_ptr.vmem [resolvable:$true] %s253_s15 }
  0x1b   : > { %s5926_s17 = sshll.u32 %s5809_s16, 4  ;;  %s7638_s3 = sld [smem:[#allocation35_spill]]  ;;  %s267_s17 = int_to_ptr.vmem [resolvable:$true] %s5926_s17 }
  0x1c   : > { %p5920_p11 = pnand %p4968_p9, %p7613_p1 }
  0x1e   : > { %p5936_p13 = pneg %p5920_p11 }
  0x21   : > { %s5551_s20 = scalar_lea.hbm %s7638_s3, 2048 }
  0x22   : > { %p5552_p12 = scmp.ne.s32.totalorder %s7638_s3, %s5551_s20  ;;  %p5558_p5 = scmp.lt.u32.totalorder %s5551_s20, %s7638_s3 }
  0x24   : > { %p5554_p0 = pnand %p5936_p13, %p5552_p12 }
  0x26   : > { %p5555_p3 = pneg %p5554_p0 }
  0x28   : > { %p5560_p7 = pnand %p5558_p5, %p5555_p3 }
  0x2a   : > { %5563 = shalt.err (!%p5560_p7)
}
  0x2b   : > { %s5564_s30 = scalar_lea.vmem %s5913_s12, 2048  ;;  %p5572_p2 = scmp.lt.s32.totalorder %s5913_s12, %s5913_s12 }
  0x2c   : > { %p5565_p9 = scmp.ne.s32.totalorder %s5913_s12, %s5564_s30  ;;  %p5573_p6 = scmp.lt.s32.totalorder %s5564_s30, %s5564_s30 }
  0x2e   : > { %p5567_p10 = pnand %p5565_p9, %p5936_p13  ;;  %p5574_p12 = por %p5573_p6, %p5572_p2 }
  0x30   : > { %p5568_p1 = pneg %p5567_p10 }
  0x32   : > { %p5575_p0 = pnand %p5574_p12, %p5568_p1 }
  0x34   : > { %5578 = shalt.err (!%p5575_p0)
}
  0x35   : > { %s5810_s11 = smov 64   ;;  %s5811_s14 = smov 4  }
  0x36   : > { %4971 = dma.hbm_to_vmem [thread:$0]  (!%p5920_p11), %s7638_s3, 2048, %s5913_s12, [#allocation7], %s5810_s11, %s5810_s11, %s5811_s14  }
  0x37   : > { %s7640_s4 = sld [smem:[#allocation36_spill]] }
  0x3d   : > { %s5579_s21 = scalar_lea.hbm %s7640_s4, 8192 }
  0x3e   : > { %p5580_p1 = scmp.ne.s32.totalorder %s7640_s4, %s5579_s21  ;;  %p5586_p10 = scmp.lt.u32.totalorder %s5579_s21, %s7640_s4 }
  0x40   : > { %p5582_p2 = pnand %p5580_p1, %p5936_p13 }
  0x42   : > { %p5583_p6 = pneg %p5582_p2 }
  0x44   : > { %p5588_p3 = pnand %p5586_p10, %p5583_p6 }
  0x46   : > { %5591 = shalt.err (!%p5588_p3)
}
  0x47   : > { %s5592_s12 = scalar_lea.vmem %s5924_s15, 8192  ;;  %p5600_p12 = scmp.lt.s32.totalorder %s5924_s15, %s5924_s15 }
  0x48   : > { %p5593_p5 = scmp.ne.s32.totalorder %s5924_s15, %s5592_s12  ;;  %p5601_p0 = scmp.lt.s32.totalorder %s5592_s12, %s5592_s12 }
  0x4a   : > { %p5595_p7 = pnand %p5593_p5, %p5936_p13  ;;  %p5602_p1 = por %p5601_p0, %p5600_p12 }
  0x4c   : > { %p5596_p9 = pneg %p5595_p7 }
  0x4e   : > { %p5603_p2 = pnand %p5602_p1, %p5596_p9 }
  0x50   : > { %5606 = shalt.err (!%p5603_p2)
}
  0x51   : > { %4974 = dma.hbm_to_vmem [thread:$0]  (!%p5920_p11), %s7640_s4, 8192, %s5924_s15, [#allocation10], %s5810_s11, %s5810_s11, %s5811_s14  }
  0x52   : > { %s7641_s5 = sld [smem:[#allocation37_spill]] }
  0x58   : > { %s5607_s21 = scalar_lea.hbm %s7641_s5, 8192 }
  0x59   : > { %p5608_p6 = scmp.ne.s32.totalorder %s7641_s5, %s5607_s21  ;;  %p5614_p5 = scmp.lt.u32.totalorder %s5607_s21, %s7641_s5 }
  0x5b   : > { %p5610_p10 = pnand %p5608_p6, %p5936_p13 }
  0x5d   : > { %p5611_p3 = pneg %p5610_p10 }
  0x5f   : > { %p5616_p7 = pnand %p5614_p5, %p5611_p3 }
  0x61   : > { %5619 = shalt.err (!%p5616_p7)
}
  0x62   : > { %s5620_s12 = scalar_lea.vmem %s267_s17, 8192  ;;  %p5628_p1 = scmp.lt.s32.totalorder %s267_s17, %s267_s17 }
  0x63   : > { %p5621_p9 = scmp.ne.s32.totalorder %s267_s17, %s5620_s12  ;;  %p5629_p2 = scmp.lt.s32.totalorder %s5620_s12, %s5620_s12 }
  0x65   : > { %p5623_p12 = pnand %p5621_p9, %p5936_p13  ;;  %p5630_p4 = por %p5629_p2, %p5628_p1 }
  0x67   : > { %p5624_p0 = pneg %p5623_p12 }
  0x69   : > { %p5631_p8 = pnand %p5630_p4, %p5624_p0 }
  0x6b   : > { %5634 = shalt.err (!%p5631_p8)
}
  0x6c   : > { %s5812_s15 = smov 512   ;;  %s5813_s23 = smov 32  }
  0x6d   : > { %4977 = dma.hbm_to_vmem [thread:$0]  (!%p5920_p11), %s7641_s5, 8192, %s267_s17, [#allocation10], %s5812_s15, %s5812_s15, %s5813_s23  }
  0x6e   : > { %s6004_s18 = sadd.s32 1, %s5805_s29   ;;  %s60_s20 = sadd.s32 1, %s5801_s28 }
  0x6f   : > { %s57_s19 = ssub.s32 %s5805_s29, %s6004_s18  ;;  %p67_p8 = scmp.ne.s32.totalorder %s5801_s28, %s5797_s27 }
  0x70   : > { %p58_p4 = scmp.eq.s32.totalorder %s57_s19, 0  ;;  %p68_p13 = scmp.eq.s32.totalorder %s5805_s29, 0 }
  0x71   : > { %p4995_p6 = scmp.lt.s32.totalorder %s5805_s29, 2  ;;  %p7642_p3 = scmp.eq.s32.totalorder %s5890_s0, 1 }
  0x72   : > { %s6014_s21 = scalar_select %p58_p4, %s5801_s28, %s60_s20  }
  0x73   : > { %p69_p10 = por %p68_p13, %p67_p8  ;;  %p6018_p5 = por %p7642_p3, %p67_p8 }
  0x74   : > { %s6023_s22 = sand.u32 1, %s5801_s28   ;;  %s4605_s17 = sshll.u32 %s5805_s29, 14 }
  0x75   : > { %s4290_s24 = sshll.u32 %s6023_s22, 10  ;;  %s7644_s1 = sld [smem:[#allocation34_spill]] }
  0x76   : > { %s284_s15 = scalar_lea.vmem [#allocation3], %s4290_s24  ;;  %p6032_p11 = pnand %p4995_p6, %p69_p10 }
  0x77   : > { %s292_s23 = sshll.u32 %s284_s15, 4  ;;  %s281_s19 = scalar_lea.sflag [#allocation4], %s6023_s22  ;;  %s6036_s23 = int_to_ptr.vmem [resolvable:$true] %s292_s23 }
  0x78   : > { %p5637_p9 = pneg %p6032_p11 }
  0x7b   : > { %s6030_s12 = scalar_lea.hbm %s7644_s1, %s4605_s17  ;;  %s5640_s25 = scalar_lea.hbm %s7644_s1, 32768 }
  0x7c   : > { %s5635_s20 = scalar_lea.hbm %s6030_s12, 16384  ;;  %p5641_p1 = scmp.lt.u32.totalorder %s6030_s12, %s7644_s1 }
  0x7d   : > { %p5636_p7 = scmp.ne.s32.totalorder %s6030_s12, %s5635_s20  ;;  %p5642_p2 = scmp.lt.u32.totalorder %s5640_s25, %s5635_s20 }
  0x7e   : > { %p5644_p8 = scmp.lt.u32.totalorder %s5635_s20, %s6030_s12 }
  0x7f   : > { %p5638_p12 = pnand %p5637_p9, %p5636_p7  ;;  %p5643_p4 = por %p5642_p2, %p5641_p1 }
  0x81   : > { %p5639_p0 = pneg %p5638_p12  ;;  %p5645_p13 = por %p5644_p8, %p5643_p4 }
  0x83   : > { %p5646_p6 = pnand %p5645_p13, %p5639_p0 }
  0x85   : > { %5649 = shalt.err (!%p5646_p6)
}
  0x86   : > { %s5650_s16 = scalar_lea.vmem %s6036_s23, 16384  ;;  %s5814_s17 = smov [#allocation3]  }
  0x87   : > { %p5651_p10 = scmp.ne.s32.totalorder %s6036_s23, %s5650_s16  ;;  %s5655_s24 = sshll.u32 %s5814_s17, 4  ;;  %s5656_s24 = int_to_ptr.vmem [resolvable:$false] %s5655_s24 }
  0x88   : > { %s5657_s30 = scalar_lea.vmem %s5656_s24, 32768  ;;  %p5658_p12 = scmp.lt.s32.totalorder %s6036_s23, %s5656_s24 }
  0x89   : > { %p5653_p3 = pnand %p5651_p10, %p5637_p9  ;;  %p5659_p1 = scmp.lt.s32.totalorder %s5657_s30, %s5650_s16 }
  0x8b   : > { %p5654_p7 = pneg %p5653_p3  ;;  %p5660_p2 = por %p5659_p1, %p5658_p12 }
  0x8d   : > { %p5661_p4 = pnand %p5660_p2, %p5654_p7 }
  0x8f   : > { %5664 = shalt.err (!%p5661_p4)
}
  0x90   : > { %s5815_s20 = smov 1024   ;;  %s4294_s25 = sshll.u32 %s6023_s22, 7 }
  0x91   : > { %4981 = dma.hbm_to_vmem [thread:$0]  (!%p6032_p11), %s6030_s12, 16384, %s6036_s23, %s281_s19, %s5815_s20, %s5815_s20, %s5810_s11  }
  0x92   : > { %s4607_s15 = sshll.u32 %s5805_s29, 11  ;;  %s306_s30 = scalar_lea.vmem [#allocation6], %s4294_s25 }
  0x93   : > { %s6073_s24 = scalar_lea.hbm %s7607_s2, %s4607_s15  ;;  %s314_s1 = sshll.u32 %s306_s30, 4  ;;  %s6075_s1 = int_to_ptr.vmem [resolvable:$true] %s314_s1 }
  0x94   : > { %s7646_s3 = sand.u32 1, %s5805_s29   ;;  %s5665_s5 = scalar_lea.hbm %s6073_s24, 2048 }
  0x95   : > { %s6079_s4 = scalar_lea.sflag [#allocation7], %s7646_s3  ;;  %p5666_p0 = scmp.ne.s32.totalorder %s6073_s24, %s5665_s5 }
  0x96   : > { %s5670_s12 = scalar_lea.hbm %s7607_s2, 4096  ;;  %p5671_p6 = scmp.lt.u32.totalorder %s6073_s24, %s7607_s2 }
  0x97   : > { %p5668_p8 = pnand %p5666_p0, %p5637_p9  ;;  %p5672_p10 = scmp.lt.u32.totalorder %s5670_s12, %s5665_s5 }
  0x98   : > { %p5674_p7 = scmp.lt.u32.totalorder %s5665_s5, %s6073_s24 }
  0x99   : > { %p5669_p13 = pneg %p5668_p8  ;;  %p5673_p3 = por %p5672_p10, %p5671_p6 }
  0x9b   : > { %p5675_p12 = por %p5674_p7, %p5673_p3 }
  0x9d   : > { %p5676_p1 = pnand %p5675_p12, %p5669_p13 }
  0x9f   : > { %5679 = shalt.err (!%p5676_p1)
}
  0xa0   : > { %s5680_s3 = scalar_lea.vmem %s6075_s1, 2048  ;;  %s5816_s20 = smov [#allocation6]  }
  0xa1   : > { %p5681_p2 = scmp.ne.s32.totalorder %s6075_s1, %s5680_s3  ;;  %s5685_s25 = sshll.u32 %s5816_s20, 4  ;;  %s5686_s25 = int_to_ptr.vmem [resolvable:$false] %s5685_s25 }
  0xa2   : > { %s5687_s15 = scalar_lea.vmem %s5686_s25, 4096  ;;  %p5688_p8 = scmp.lt.s32.totalorder %s6075_s1, %s5686_s25 }
  0xa3   : > { %p5683_p4 = pnand %p5681_p2, %p5637_p9  ;;  %p5689_p6 = scmp.lt.s32.totalorder %s5687_s15, %s5680_s3 }
  0xa5   : > { %p5684_p0 = pneg %p5683_p4  ;;  %p5690_p10 = por %p5689_p6, %p5688_p8 }
  0xa7   : > { %p5691_p3 = pnand %p5690_p10, %p5684_p0 }
  0xa9   : > { %5694 = shalt.err (!%p5691_p3)
}
  0xaa   : > { %s5817_s5 = smov 128   ;;  %s5818_s17 = smov 8  }
  0xab   : > { %4984 = dma.hbm_to_vmem [thread:$0]  (!%p6032_p11), %s6073_s24, 2048, %s6075_s1, %s6079_s4, %s5817_s5, %s5817_s5, %s5818_s17  }
  0xac   : > { %p7647_p9 = scmp.ne.s32.totalorder %s7636_s10, 0 }
  0xae   : > { %326 = sbr.rel (%p7647_p9) target bundleno = 1071 (0x42f), region = 44 }
  0xb5   : > { %s6108_s16 = sand.u32 1, %s5797_s27   ;;  %p7648_p13 = scmp.ne.s32.totalorder %s7634_s8, 0 }
  0xb6   : > { %s4299_s30 = sshll.u32 %s6108_s16, 10  ;;  %s329_s11 = scalar_lea.sflag [#allocation4], %s6108_s16 }
  0xb7   : > { %s6114_s22 = scalar_lea.vmem [#allocation3], %s4299_s30 }
  0xb8   : > { %5768 = dma.done.wait (%p7648_p13), %s329_s11, 16384  }
  0xb9   : > { %5770 = vsyncadd (%p7648_p13), %s329_s11, 4294950912  ;;  %s337_s1 = sand.u32 1, %s5890_s0   ;;  %s4300_s4 = sshll.u32 %s6108_s16, 7 }
  0xba   : > { %s338_s10 = scalar_lea.sflag [#allocation7], %s337_s1  ;;  %s6122_s14 = scalar_lea.vmem [#allocation6], %s4300_s4 }
  0xbb   : > { %5772 = dma.done.wait (%p7648_p13), %s338_s10, 2048  }
  0xbc   : > { %5774 = vsyncadd (%p7648_p13), %s338_s10, 4294965248  ;;  %p7649_p11 = scmp.eq.s32.totalorder %s5890_s0, 0 }
  0xbe   : > { %5776 = dma.done.wait (%p7649_p11), [#allocation7], 2048   ;;  %p7650_p7 = pmov %p7649_p11 }
  0xc0   : > { %5778 = vsyncadd (%p7650_p7), [#allocation7], 4294965248  ;;  %p7651_p12 = pmov %p7650_p7 }
  0xc1   : > { %p7652_p1 = pmov %p7650_p7 }
  0xc2   : > { %5780 = dma.done.wait (%p7651_p12), [#allocation10], 16384  }
  0xc3   : > { %5782 = vsyncadd (%p7652_p1), [#allocation10], 4294950912  ;;  %v5047_v0 = vld [vmem:[#allocation9 + $0x40] sm:$0xff]   ;;  %v5049_v2 = vld [vmem:[#allocation9 + $0x48] sm:$0xff]   ;;  %s400_s8 = sld [smem:[#allocation2]]  ;;  %s4305_s24 = sshll.u32 %s6108_s16, 9 }
  0xc4   : > { %v5048_v1 = vld [vmem:[#allocation9] sm:$0xff]   ;;  %4932 = vmatprep.subr.bf16.mxu1 %v5047_v0  ;;  %4612 = vmatprep.subr.bf16.mxu0 %v5047_v0  ;;  %v5050_v3 = vld [vmem:[#allocation9 + $0x8] sm:$0xff]   ;;  %v5051_v4 = vld [vmem:[#allocation9 + $0x50] sm:$0xff]   ;;  %s6504_s12 = scalar_lea.vmem [#allocation13], %s4305_s24  ;;  %s6518_s23 = scalar_lea.vmem [#allocation12], %s4299_s30 }
  0xc5   : > { %4940 = vmatpush3.bf16.msra.mxu1 %v5048_v1  ;;  %4613 = vmatpush3.bf16.msra.mxu0 %v5048_v1  ;;  %v5052_v5 = vld [vmem:[#allocation9 + $0x10] sm:$0xff]   ;;  %v5053_v6 = vld [vmem:[#allocation9 + $0x58] sm:$0xff]   ;;  %v5055_v8 = vld [vmem:[#allocation9 + $0x60] sm:$0xff]   ;;  %s4611_s19 = sshll.u32 %s5890_s0, 13  ;;  %s4128_s3 = sshll.u32 %s6504_s12, 4  ;;  %s7496_s3 = int_to_ptr.vmem [resolvable:$true] %s4128_s3 }
  0xc6   : > { %4933 = vmatprep.subr.bf16.mxu1 %v5049_v2  ;;  %4614 = vmatprep.subr.bf16.mxu0 %v5049_v2  ;;  %v5054_v7 = vld [vmem:[#allocation9 + $0x18] sm:$0xff]   ;;  %v5056_v9 = vld [vmem:[#allocation9 + $0x20] sm:$0xff]   ;;  %v5057_v10 = vld [vmem:[#allocation9 + $0x68] sm:$0xff]   ;;  %s7494_s15 = scalar_lea.hbm %s7612_s7, %s4611_s19  ;;  %s4609_s5 = sshll.u32 %s5890_s0, 14 }
  0xc7   : > { %v466_v11 = vld [vmem:[%s6114_s22 + $0x208] sm:$0xff]  ;;  %v5059_v18 = vld [vmem:[#allocation9 + $0x70] sm:$0xff]   ;;  %v5061_v20 = vld [vmem:[#allocation9 + $0x78] sm:$0xff]   ;;  %s4111_s17 = sshll.u32 %s6518_s23, 4  ;;  %s4097_s30 = scalar_lea.sflag [#allocation14], %s6108_s16  ;;  %s7557_s17 = int_to_ptr.vmem [resolvable:$true] %s4111_s17 }
  0xc8   : > { %v474_v12 = vld [vmem:[%s6114_s22 + $0x248] sm:$0xff]  ;;  %v5060_v19 = vld [vmem:[#allocation9 + $0x30] sm:$0xff]   ;;  %v5062_v21 = vld [vmem:[#allocation9 + $0x38] sm:$0xff]   ;;  %s5695_s11 = scalar_lea.vmem %s7496_s3, 8192  ;;  %s5820_s1 = smov [#allocation13]  }
  0xc9   : > { %4941 = vmatpush3.bf16.msra.mxu1 %v5050_v3  ;;  %4615 = vmatpush3.bf16.msra.mxu0 %v5050_v3  ;;  %v610_v13 = vpack.c.bf16 %v474_v12, %v466_v11  ;;  %v402_v14 = vld [vmem:[%s6114_s22 + $0x8] sm:$0xff]  ;;  %v465_v22 = vld [vmem:[%s6114_s22 + $0x200] sm:$0xff]  ;;  %v5071_v46 = vld [vmem:[#allocation9 + $0xd0] sm:$0xff]   ;;  %p5696_p2 = scmp.ne.s32.totalorder %s7496_s3, %s5695_s11  ;;  %s5699_s4 = sshll.u32 %s5820_s1, 4  ;;  %s5700_s4 = int_to_ptr.vmem [resolvable:$false] %s5699_s4 }
  0xca   : > { %4934 = vmatprep.subr.bf16.mxu1 %v5051_v4  ;;  %4616 = vmatprep.subr.bf16.mxu0 %v5051_v4  ;;  %v410_v15 = vld [vmem:[%s6114_s22 + $0x48] sm:$0xff]  ;;  %v473_v23 = vld [vmem:[%s6114_s22 + $0x240] sm:$0xff]  ;;  %v5073_v47 = vld [vmem:[#allocation9 + $0x150] sm:$0xff]   ;;  %s5701_s10 = scalar_lea.vmem %s5700_s4, 16384  ;;  %p5702_p8 = scmp.lt.s32.totalorder %s7496_s3, %s5700_s4 }
  0xcb   : > { %v5058_v16 = vld [vmem:[#allocation9 + $0x28] sm:$0xff]   ;;  %v578_v17 = vpack.c.bf16 %v410_v15, %v402_v14  ;;  %1217 = vmatprep.mubr.bf16.mxu1 %v610_v13  ;;  %v5063_v24 = vld [vmem:[#allocation9 + $0xc0] sm:$0xff]   ;;  %v609_v32 = vpack.c.bf16 %v473_v23, %v465_v22  ;;  %v5072_v48 = vld [vmem:[#allocation9 + $0x90] sm:$0xff]   ;;  %p5697_p4 = pnand %p5696_p2, %p6018_p5  ;;  %p5703_p6 = scmp.lt.s32.totalorder %s5701_s10, %s5695_s11 }
  0xcc   : > { %v401_v25 = vld [vmem:[%s6114_s22] sm:$0xff]  ;;  %v482_v30 = vld [vmem:[%s6114_s22 + $0x288] sm:$0xff]  ;;  %v5074_v49 = vld [vmem:[#allocation9 + $0x110] sm:$0xff]  }
  0xcd   : > { %4942 = vmatpush3.bf16.msra.mxu1 %v5052_v5  ;;  %4617 = vmatpush3.bf16.msra.mxu0 %v5052_v5  ;;  %v409_v26 = vld [vmem:[%s6114_s22 + $0x40] sm:$0xff]  ;;  %v490_v31 = vld [vmem:[%s6114_s22 + $0x2c8] sm:$0xff]  ;;  %v5075_v52 = vld [vmem:[#allocation9 + $0xd8] sm:$0xff]   ;;  %p5698_p0 = pneg %p5697_p4  ;;  %p5704_p10 = por %p5703_p6, %p5702_p8 }
  0xce   : > { %4935 = vmatprep.subr.bf16.mxu1 %v5053_v6  ;;  %4618 = vmatprep.subr.bf16.mxu0 %v5053_v6  ;;  %v5065_v27 = vld [vmem:[#allocation9 + $0x140] sm:$0xff]   ;;  %v577_v33 = vpack.c.bf16 %v409_v26, %v401_v25  ;;  %v418_v34 = vld [vmem:[%s6114_s22 + $0x88] sm:$0xff]  ;;  %v618_v39 = vpack.c.bf16 %v490_v31, %v482_v30  ;;  %v5077_v55 = vld [vmem:[#allocation9 + $0x158] sm:$0xff]  }
  0xcf   : > { %1185 = vmatprep.mubr.bf16.mxu0 %v578_v17  ;;  %v5064_v28 = vld [vmem:[#allocation9 + $0x80] sm:$0xff]   ;;  %v426_v35 = vld [vmem:[%s6114_s22 + $0xc8] sm:$0xff]  ;;  %v5076_v58 = vld [vmem:[#allocation9 + $0x98] sm:$0xff]   ;;  %p5705_p3 = pnand %p5704_p10, %p5698_p0 }
  0xd0   : > { %v5066_v29 = vld [vmem:[#allocation9 + $0x100] sm:$0xff]   ;;  %v5067_v36 = vld [vmem:[#allocation9 + $0xc8] sm:$0xff]   ;;  %v586_v43 = vpack.c.bf16 %v426_v35, %v418_v34  ;;  %v5078_v60 = vld [vmem:[#allocation9 + $0x118] sm:$0xff]  }
  0xd1   : > { %4943 = vmatpush3.bf16.msra.mxu1 %v5054_v7  ;;  %4619 = vmatpush3.bf16.msra.mxu0 %v5054_v7  ;;  %v5069_v37 = vld [vmem:[#allocation9 + $0x148] sm:$0xff]   ;;  %v481_v41 = vld [vmem:[%s6114_s22 + $0x280] sm:$0xff]  ;;  %v5089_v23 = vld [vmem:[#allocation9 + $0x170] sm:$0xff]  }
  0xd2   : > { %4936 = vmatprep.subr.bf16.mxu1 %v5055_v8  ;;  %4620 = vmatprep.subr.bf16.mxu0 %v5055_v8  ;;  %v5068_v38 = vld [vmem:[#allocation9 + $0x88] sm:$0xff]   ;;  %v489_v42 = vld [vmem:[%s6114_s22 + $0x2c0] sm:$0xff]  ;;  %v5088_v25 = vld [vmem:[#allocation9 + $0xb0] sm:$0xff]  }
  0xd3   : > { %v5070_v40 = vld [vmem:[#allocation9 + $0x108] sm:$0xff]   ;;  %v417_v44 = vld [vmem:[%s6114_s22 + $0x80] sm:$0xff]  ;;  %v617_v50 = vpack.c.bf16 %v489_v42, %v481_v41  ;;  %v5093_v30 = vld [vmem:[#allocation9 + $0x178] sm:$0xff]  }
  0xd4   : > { %v425_v45 = vld [vmem:[%s6114_s22 + $0xc0] sm:$0xff]  ;;  %v498_v53 = vld [vmem:[%s6114_s22 + $0x308] sm:$0xff]  ;;  %v404_v31 = vld [vmem:[%s6114_s22 + $0x18] sm:$0xff] }
  0xd5   : > { %4944 = vmatpush3.bf16.msra.mxu1 %v5056_v9  ;;  %4621 = vmatpush3.bf16.msra.mxu0 %v5056_v9  ;;  %v585_v51 = vpack.c.bf16 %v425_v45, %v417_v44  ;;  %v506_v54 = vld [vmem:[%s6114_s22 + $0x348] sm:$0xff]  ;;  %v497_v61 = vld [vmem:[%s6114_s22 + $0x300] sm:$0xff]  ;;  %v5094_v34 = vld [vmem:[#allocation9 + $0x138] sm:$0xff]  }
  0xd6   : > { %4937 = vmatprep.subr.bf16.mxu1 %v5057_v10  ;;  %4622 = vmatprep.subr.bf16.mxu0 %v5057_v10  ;;  %v434_v56 = vld [vmem:[%s6114_s22 + $0x108] sm:$0xff]  ;;  %v626_v59 = vpack.c.bf16 %v506_v54, %v498_v53  ;;  %v505_v62 = vld [vmem:[%s6114_s22 + $0x340] sm:$0xff]  ;;  %v403_v35 = vld [vmem:[%s6114_s22 + $0x10] sm:$0xff] }
  0xd7   : > { %v442_v57 = vld [vmem:[%s6114_s22 + $0x148] sm:$0xff]  ;;  %v5079_v0 = vld [vmem:[#allocation9 + $0xe0] sm:$0xff]   ;;  %v625_v5 = vpack.c.bf16 %v505_v62, %v497_v61 }
  0xd8   : > { %v594_v63 = vpack.c.bf16 %v442_v57, %v434_v56  ;;  %v433_v1 = vld [vmem:[%s6114_s22 + $0x100] sm:$0xff]  ;;  %v514_v8 = vld [vmem:[%s6114_s22 + $0x388] sm:$0xff] }
  0xd9   : > { %4945 = vmatpush3.bf16.msra.mxu1 %v5058_v16  ;;  %4623 = vmatpush3.bf16.msra.mxu0 %v5058_v16  ;;  %v441_v2 = vld [vmem:[%s6114_s22 + $0x140] sm:$0xff]  ;;  %v522_v9 = vld [vmem:[%s6114_s22 + $0x3c8] sm:$0xff] }
  0xda   : > { %4938 = vmatprep.subr.bf16.mxu1 %v5059_v18  ;;  %4624 = vmatprep.subr.bf16.mxu0 %v5059_v18  ;;  %v5081_v3 = vld [vmem:[#allocation9 + $0x160] sm:$0xff]   ;;  %v593_v6 = vpack.c.bf16 %v441_v2, %v433_v1  ;;  %v5083_v10 = vld [vmem:[#allocation9 + $0xe8] sm:$0xff]   ;;  %v634_v13 = vpack.c.bf16 %v522_v9, %v514_v8  ;;  %v444_v1 = vld [vmem:[%s6114_s22 + $0x158] sm:$0xff] }
  0xdb   : > { %v5080_v4 = vld [vmem:[#allocation9 + $0xa0] sm:$0xff]   ;;  %v5085_v11 = vld [vmem:[#allocation9 + $0x168] sm:$0xff]   ;;  %v5104_v9 = vld [vmem:[#allocation9 + $0x190] sm:$0xff]  }
  0xdc   : > { %v5082_v7 = vld [vmem:[#allocation9 + $0x120] sm:$0xff]   ;;  %v5084_v12 = vld [vmem:[#allocation9 + $0xa8] sm:$0xff]  }
  0xdd   : > { %4946 = vmatpush3.bf16.msra.mxu1 %v5060_v19  ;;  %4625 = vmatpush3.bf16.msra.mxu0 %v5060_v19  ;;  %v5086_v14 = vld [vmem:[#allocation9 + $0x128] sm:$0xff]   ;;  %v513_v15 = vld [vmem:[%s6114_s22 + $0x380] sm:$0xff]  ;;  %v5087_v19 = vld [vmem:[#allocation9 + $0xf0] sm:$0xff]  }
  0xde   : > { %4939 = vmatprep.subr.bf16.mxu1 %v5061_v20  ;;  %4626 = vmatprep.subr.bf16.mxu0 %v5061_v20  ;;  %v521_v16 = vld [vmem:[%s6114_s22 + $0x3c0] sm:$0xff]  ;;  %v450_v17 = vld [vmem:[%s6114_s22 + $0x188] sm:$0xff] }
  0xdf   : > { %v458_v18 = vld [vmem:[%s6114_s22 + $0x1c8] sm:$0xff]  ;;  %v457_v22 = vld [vmem:[%s6114_s22 + $0x1c0] sm:$0xff] }
  0xe0   : > { %v602_v20 = vpack.c.bf16 %v458_v18, %v450_v17  ;;  %v5096_v42 = vld [vmem:[#allocation9 + $0x180] sm:$0xff]   ;;  %v5099_v53 = vld [vmem:[#allocation9 + $0x1c8] sm:$0xff]   ;;  %v460_v17 = vld [vmem:[%s6114_s22 + $0x1d8] sm:$0xff] }
  0xe1   : > { %4947 = vmatpush3.bf16.msra.mxu1 %v5062_v21  ;;  %4627 = vmatpush3.bf16.msra.mxu0 %v5062_v21  ;;  %v449_v21 = vld [vmem:[%s6114_s22 + $0x180] sm:$0xff]  ;;  %v422_v54 = vld [vmem:[%s6114_s22 + $0xa8] sm:$0xff] }
  0xe2   : > { %4676 = vmatprep.subr.bf16.mxu1 %v5063_v24  ;;  %4740 = vmatprep.subr.bf16.mxu0 %v5065_v27  ;;  %v633_v24 = vpack.c.bf16 %v521_v16, %v513_v15  ;;  %v601_v26 = vpack.c.bf16 %v457_v22, %v449_v21  ;;  %v5090_v27 = vld [vmem:[#allocation9 + $0x130] sm:$0xff]   ;;  %v413_v44 = vld [vmem:[%s6114_s22 + $0x60] sm:$0xff]  ;;  %v5100_v57 = vld [vmem:[#allocation9 + $0x188] sm:$0xff]  }
  0xe3   : > { %v5101_v62 = vld [vmem:[#allocation8 + $0x48] sm:$0xff]   ;;  %v5106_v15 = vld [vmem:[#allocation8 + $0x10] sm:$0xff]   ;;  %v452_v16 = vld [vmem:[%s6114_s22 + $0x198] sm:$0xff] }
  0xe4   : > { %1218 = vmatmul.mubr.bf16.vlgmr.msra.gmra.mrb[0].mxu1 %v609_v32  ;;  %1186 = vmatmul.mubr.bf16.vlgmr.msra.gmra.mrb[0].mxu0 %v577_v33  ;;  %v412_v32 = vld [vmem:[%s6114_s22 + $0x58] sm:$0xff]  ;;  %v604_v18 = vpack.c.bf16 %v460_v17, %v452_v16  ;;  %v459_v21 = vld [vmem:[%s6114_s22 + $0x1d0] sm:$0xff]  ;;  %v454_v22 = vld [vmem:[%s6114_s22 + $0x1a8] sm:$0xff] }
  0xe5   : > { %4677 = vmatpush3.bf16.msra.mxu1 %v5064_v28  ;;  %4741 = vmatpush3.bf16.msra.mxu0 %v5066_v29  ;;  %v5091_v28 = vld [vmem:[#allocation9 + $0xf8] sm:$0xff]   ;;  %v580_v33 = vpack.c.bf16 %v412_v32, %v404_v31  ;;  %v518_v17 = vld [vmem:[%s6114_s22 + $0x3a8] sm:$0xff] }
  0xe6   : > { %4678 = vmatprep.subr.bf16.mxu1 %v5067_v36  ;;  %4742 = vmatprep.subr.bf16.mxu0 %v5069_v37  ;;  %v5092_v29 = vld [vmem:[#allocation9 + $0xb8] sm:$0xff]   ;;  %v411_v36 = vld [vmem:[%s6114_s22 + $0x50] sm:$0xff]  ;;  %v5095_v37 = vld [vmem:[#allocation9 + $0x1c0] sm:$0xff]  }
  0xe7   : > { %1225 = vmatprep.mubr.bf16.mxu1 %v618_v39  ;;  %1193 = vmatprep.mubr.bf16.mxu0 %v586_v43  ;;  %v414_v39 = vld [vmem:[%s6114_s22 + $0x68] sm:$0xff]  ;;  %v405_v43 = vld [vmem:[%s6114_s22 + $0x20] sm:$0xff]  ;;  %v476_v31 = vld [vmem:[%s6114_s22 + $0x258] sm:$0xff] }
  0xe8   : > { %v581_v45 = vpack.c.bf16 %v413_v44, %v405_v43  ;;  %v477_v43 = vld [vmem:[%s6114_s22 + $0x260] sm:$0xff]  ;;  %v5123_v16 = vld [vmem:[#allocation9 + $0x1f8] sm:$0xff]  }
  0xe9   : > { %4679 = vmatpush3.bf16.msra.mxu1 %v5068_v38  ;;  %4743 = vmatpush3.bf16.msra.mxu0 %v5070_v40  ;;  %v406_v38 = vld [vmem:[%s6114_s22 + $0x28] sm:$0xff]  ;;  %v579_v40 = vpack.c.bf16 %v411_v36, %v403_v35  ;;  %v5111_v35 = vld [vmem:[#allocation9 + $0x1e0] sm:$0xff]  }
  0xea   : > { %4680 = vmatprep.subr.bf16.mxu1 %v5071_v46  ;;  %4744 = vmatprep.subr.bf16.mxu0 %v5073_v47  ;;  %v582_v41 = vpack.c.bf16 %v414_v39, %v406_v38  ;;  %v5097_v46 = vld [vmem:[#allocation8 + $0x40] sm:$0xff]   ;;  %v470_v36 = vld [vmem:[%s6114_s22 + $0x228] sm:$0xff]  ;;  %v467_v38 = vld [vmem:[%s6114_s22 + $0x210] sm:$0xff] }
  0xeb   : > { %v5098_v47 = vld [vmem:[#allocation8] sm:$0xff]   ;;  %v475_v39 = vld [vmem:[%s6114_s22 + $0x250] sm:$0xff] }
  0xec   : > { %1226 = vmatmul.mubr.bf16.gmra.mrb[4].mxu1 %v617_v50  ;;  %1194 = vmatmul.mubr.bf16.gmra.mrb[4].mxu0 %v585_v51  ;;  %v419_v51 = vld [vmem:[%s6114_s22 + $0x90] sm:$0xff]  ;;  %v5113_v44 = vld [vmem:[#allocation8 + $0x60] sm:$0xff]  }
  0xed   : > { %4681 = vmatpush3.bf16.msra.mxu1 %v5072_v48  ;;  %4745 = vmatpush3.bf16.msra.mxu0 %v5074_v49  ;;  %v420_v48 = vld [vmem:[%s6114_s22 + $0x98] sm:$0xff] }
  0xee   : > { %4682 = vmatprep.subr.bf16.mxu1 %v5075_v52  ;;  %4746 = vmatprep.subr.bf16.mxu0 %v5077_v55  ;;  %v428_v49 = vld [vmem:[%s6114_s22 + $0xd8] sm:$0xff]  ;;  %v427_v52 = vld [vmem:[%s6114_s22 + $0xd0] sm:$0xff]  ;;  %v430_v55 = vld [vmem:[%s6114_s22 + $0xe8] sm:$0xff] }
  0xef   : > { %1233 = vmatprep.mubr.bf16.mxu1 %v626_v59  ;;  %1201 = vmatprep.mubr.bf16.mxu0 %v594_v63  ;;  %v588_v50 = vpack.c.bf16 %v428_v49, %v420_v48  ;;  %v590_v56 = vpack.c.bf16 %v430_v55, %v422_v54  ;;  %v429_v59 = vld [vmem:[%s6114_s22 + $0xe0] sm:$0xff]  ;;  %v5102_v63 = vld [vmem:[#allocation8 + $0x8] sm:$0xff]   ;;  %v611_v48 = vpack.c.bf16 %v475_v39, %v467_v38  ;;  %v424_v38 = vld [vmem:[%s6114_s22 + $0xb8] sm:$0xff] }
  0xf0   : > { %v5116_v55 = vld [vmem:[#allocation9 + $0x1a8] sm:$0xff]   ;;  %v432_v39 = vld [vmem:[%s6114_s22 + $0xf8] sm:$0xff] }
  0xf1   : > { %4683 = vmatpush3.bf16.msra.mxu1 %v5076_v58  ;;  %4747 = vmatpush3.bf16.msra.mxu0 %v5078_v60  ;;  %v421_v58 = vld [vmem:[%s6114_s22 + $0xa0] sm:$0xff]  ;;  %v587_v60 = vpack.c.bf16 %v427_v52, %v419_v51  ;;  %v486_v51 = vld [vmem:[%s6114_s22 + $0x2a8] sm:$0xff] }
  0xf2   : > { %4684 = vmatprep.subr.bf16.mxu1 %v5079_v0  ;;  %4748 = vmatprep.subr.bf16.mxu0 %v5081_v3  ;;  %v589_v61 = vpack.c.bf16 %v429_v59, %v421_v58  ;;  %v436_v0 = vld [vmem:[%s6114_s22 + $0x118] sm:$0xff]  ;;  %v435_v3 = vld [vmem:[%s6114_s22 + $0x110] sm:$0xff]  ;;  %v494_v52 = vld [vmem:[%s6114_s22 + $0x2e8] sm:$0xff] }
  0xf3   : > { %v596_v2 = vpack.c.bf16 %v444_v1, %v436_v0  ;;  %v622_v54 = vpack.c.bf16 %v494_v52, %v486_v51  ;;  %v5117_v58 = vld [vmem:[#allocation8 + $0x68] sm:$0xff]   ;;  %v485_v59 = vld [vmem:[%s6114_s22 + $0x2a0] sm:$0xff]  ;;  %v5119_v0 = vld [vmem:[#allocation9 + $0x1f0] sm:$0xff]  }
  0xf4   : > { %1234 = vmatmul.mubr.bf16.gmra.mrb[8].mxu1 %v625_v5  ;;  %1202 = vmatmul.mubr.bf16.gmra.mrb[8].mxu0 %v593_v6  ;;  %v5103_v5 = vld [vmem:[#allocation9 + $0x1d0] sm:$0xff]   ;;  %v438_v6 = vld [vmem:[%s6114_s22 + $0x128] sm:$0xff] }
  0xf5   : > { %4685 = vmatpush3.bf16.msra.mxu1 %v5080_v4  ;;  %4749 = vmatpush3.bf16.msra.mxu0 %v5082_v7  ;;  %v443_v4 = vld [vmem:[%s6114_s22 + $0x150] sm:$0xff]  ;;  %v446_v7 = vld [vmem:[%s6114_s22 + $0x168] sm:$0xff] }
  0xf6   : > { %4686 = vmatprep.subr.bf16.mxu1 %v5083_v10  ;;  %4750 = vmatprep.subr.bf16.mxu0 %v5085_v11  ;;  %v598_v8 = vpack.c.bf16 %v446_v7, %v438_v6  ;;  %v437_v10 = vld [vmem:[%s6114_s22 + $0x120] sm:$0xff]  ;;  %v502_v1 = vld [vmem:[%s6114_s22 + $0x328] sm:$0xff]  ;;  %v439_v52 = vld [vmem:[%s6114_s22 + $0x130] sm:$0xff] }
  0xf7   : > { %1241 = vmatprep.mubr.bf16.mxu1 %v634_v13  ;;  %1209 = vmatprep.mubr.bf16.mxu0 %v602_v20  ;;  %v445_v11 = vld [vmem:[%s6114_s22 + $0x160] sm:$0xff]  ;;  %v595_v13 = vpack.c.bf16 %v443_v4, %v435_v3  ;;  %v451_v20 = vld [vmem:[%s6114_s22 + $0x190] sm:$0xff] }
  0xf8   : > { %v603_v32 = vpack.c.bf16 %v459_v21, %v451_v20  ;;  %v5133_v51 = vld [vmem:[%s6122_s14 + $0x24] ss:$8 sps:$4 sm:$0xff]  }
  0xf9   : > { %4687 = vmatpush3.bf16.msra.mxu1 %v5084_v12  ;;  %4751 = vmatpush3.bf16.msra.mxu0 %v5086_v14  ;;  %v5105_v12 = vld [vmem:[#allocation8 + $0x50] sm:$0xff]   ;;  %v597_v14 = vpack.c.bf16 %v445_v11, %v437_v10  ;;  %v501_v11 = vld [vmem:[%s6114_s22 + $0x320] sm:$0xff] }
  0xfa   : > { %4688 = vmatprep.subr.bf16.mxu1 %v5087_v19  ;;  %4752 = vmatprep.subr.bf16.mxu0 %v5089_v23  ;;  %v5107_v19 = vld [vmem:[#allocation9 + $0x1d8] sm:$0xff]   ;;  %v462_v23 = vld [vmem:[%s6114_s22 + $0x1e8] sm:$0xff]  ;;  %v507_v10 = vld [vmem:[%s6114_s22 + $0x350] sm:$0xff] }
  0xfc   : > { %1242 = vmatmul.mubr.bf16.gmra.mrb[12].mxu1 %v633_v24  ;;  %1210 = vmatmul.mubr.bf16.gmra.mrb[12].mxu0 %v601_v26  ;;  %v606_v24 = vpack.c.bf16 %v462_v23, %v454_v22  ;;  %v453_v26 = vld [vmem:[%s6114_s22 + $0x1a0] sm:$0xff]  ;;  %v5125_v22 = vld [vmem:[#allocation8 + $0x78] sm:$0xff]  }
  0xfd   : > { %4689 = vmatpush3.bf16.msra.mxu1 %v5088_v25  ;;  %4753 = vmatpush3.bf16.msra.mxu0 %v5090_v27  ;;  %v5108_v25 = vld [vmem:[#allocation9 + $0x198] sm:$0xff]   ;;  %v461_v27 = vld [vmem:[%s6114_s22 + $0x1e0] sm:$0xff] }
  0xfe   : > { %4690 = vmatprep.subr.bf16.mxu1 %v5091_v28  ;;  %4754 = vmatprep.subr.bf16.mxu0 %v5093_v30  ;;  %v5109_v28 = vld [vmem:[#allocation8 + $0x58] sm:$0xff]  }
  0xff   : > { %1282 = vmatprep.mubr.bf16.mxu1 %v580_v33  ;;  %1379 = vmatprep.mubr.bf16.mxu0 %v582_v41  ;;  %v468_v30 = vld [vmem:[%s6114_s22 + $0x218] sm:$0xff]  ;;  %v605_v33 = vpack.c.bf16 %v461_v27, %v453_v26  ;;  %v5112_v41 = vld [vmem:[#allocation9 + $0x1a0] sm:$0xff]   ;;  %v515_v26 = vld [vmem:[%s6114_s22 + $0x390] sm:$0xff] }
 0x100   : > { %v523_v27 = vld [vmem:[%s6114_s22 + $0x3d0] sm:$0xff] }
 0x101   : > { %4691 = vmatpush3.bf16.msra.mxu1 %v5092_v29  ;;  %4755 = vmatpush3.bf16.msra.mxu0 %v5094_v34  ;;  %v5110_v29 = vld [vmem:[#allocation8 + $0x18] sm:$0xff]   ;;  %v612_v34 = vpack.c.bf16 %v476_v31, %v468_v30 }
 0x102   : > { %4804 = vmatprep.subr.bf16.mxu1 %v5095_v37  ;;  %4868 = vmatprep.subr.bf16.mxu0 %v5097_v46  ;;  %v478_v37 = vld [vmem:[%s6114_s22 + $0x268] sm:$0xff]  ;;  %v484_v46 = vld [vmem:[%s6114_s22 + $0x298] sm:$0xff] }
 0x103   : > { %v408_v30 = vld [vmem:[%s6114_s22 + $0x38] sm:$0xff] }
 0x104   : > { %1283 = vmatmul.mubr.bf16.vlgmr.msra.gmra.mrb[16].mxu1 %v579_v40  ;;  %1380 = vmatmul.mubr.bf16.vlgmr.msra.gmra.mrb[16].mxu0 %v581_v45  ;;  %v614_v40 = vpack.c.bf16 %v478_v37, %v470_v36  ;;  %v5114_v45 = vld [vmem:[#allocation8 + $0x20] sm:$0xff]   ;;  %v416_v31 = vld [vmem:[%s6114_s22 + $0x78] sm:$0xff]  ;;  %v407_v36 = vld [vmem:[%s6114_s22 + $0x30] sm:$0xff] }
 0x105   : > { %4805 = vmatpush3.bf16.msra.mxu1 %v5096_v42  ;;  %4869 = vmatpush3.bf16.msra.mxu0 %v5098_v47  ;;  %v469_v42 = vld [vmem:[%s6114_s22 + $0x220] sm:$0xff]  ;;  %v492_v47 = vld [vmem:[%s6114_s22 + $0x2d8] sm:$0xff]  ;;  %v415_v37 = vld [vmem:[%s6114_s22 + $0x70] sm:$0xff] }
 0x106   : > { %1290 = vmatprep.mubr.bf16.mxu1 %v588_v50  ;;  %4806 = vmatprep.subr.bf16.mxu1 %v5099_v53  ;;  %v613_v49 = vpack.c.bf16 %v477_v43, %v469_v42  ;;  %v5115_v50 = vld [vmem:[#allocation9 + $0x1e8] sm:$0xff]   ;;  %v620_v53 = vpack.c.bf16 %v492_v47, %v484_v46  ;;  %v592_v42 = vpack.c.bf16 %v432_v39, %v424_v38  ;;  %v5130_v43 = vld [vmem:[%s6122_s14 + $0x14] ss:$8 sps:$4 sm:$0xff]   ;;  %v5150_v39 = vld [vmem:[%s6122_s14 + $0x70] ss:$8 sps:$4 sm:$0xff]  }
 0x107   : > { %1387 = vmatprep.mubr.bf16.mxu0 %v590_v56  ;;  %4870 = vmatprep.subr.bf16.mxu0 %v5101_v62  ;;  %v483_v56 = vld [vmem:[%s6114_s22 + $0x290] sm:$0xff]  ;;  %v500_v62 = vld [vmem:[%s6114_s22 + $0x318] sm:$0xff] }
 0x108   : > { %v440_v46 = vld [vmem:[%s6114_s22 + $0x138] sm:$0xff] }
 0x109   : > { %4807 = vmatpush3.bf16.msra.mxu1 %v5100_v57  ;;  %4871 = vmatpush3.bf16.msra.mxu0 %v5102_v63  ;;  %v491_v57 = vld [vmem:[%s6114_s22 + $0x2d0] sm:$0xff]  ;;  %v508_v63 = vld [vmem:[%s6114_s22 + $0x358] sm:$0xff] }
 0x10a   : > { %4808 = vmatprep.subr.bf16.mxu1 %v5103_v5  ;;  %4872 = vmatprep.subr.bf16.mxu0 %v5105_v12  ;;  %v619_v3 = vpack.c.bf16 %v491_v57, %v483_v56  ;;  %v5120_v5 = vld [vmem:[#allocation9 + $0x1b0] sm:$0xff]   ;;  %v628_v6 = vpack.c.bf16 %v508_v63, %v500_v62  ;;  %v509_v12 = vld [vmem:[%s6114_s22 + $0x360] sm:$0xff]  ;;  %v448_v47 = vld [vmem:[%s6114_s22 + $0x178] sm:$0xff] }
 0x10b   : > { %v629_v21 = vpack.c.bf16 %v509_v12, %v501_v11  ;;  %v5135_v57 = vld [vmem:[%s6122_s14 + $0x20] ss:$8 sps:$4 sm:$0xff]   ;;  %v472_v62 = vld [vmem:[%s6114_s22 + $0x238] sm:$0xff]  ;;  %v487_v12 = vld [vmem:[%s6114_s22 + $0x2b0] sm:$0xff] }
 0x10c   : > { %1291 = vmatmul.mubr.bf16.gmra.mrb[20].mxu1 %v587_v60  ;;  %1388 = vmatmul.mubr.bf16.gmra.mrb[20].mxu0 %v589_v61  ;;  %v5118_v60 = vld [vmem:[#allocation8 + $0x28] sm:$0xff]   ;;  %v493_v61 = vld [vmem:[%s6114_s22 + $0x2e0] sm:$0xff]  ;;  %v480_v63 = vld [vmem:[%s6114_s22 + $0x278] sm:$0xff] }
 0x10d   : > { %1298 = vmatprep.mubr.bf16.mxu1 %v596_v2  ;;  %1395 = vmatprep.mubr.bf16.mxu0 %v598_v8  ;;  %v510_v2 = vld [vmem:[%s6114_s22 + $0x368] sm:$0xff]  ;;  %v621_v4 = vpack.c.bf16 %v493_v61, %v485_v59  ;;  %v5121_v8 = vld [vmem:[#allocation8 + $0x70] sm:$0xff]  }
 0x10e   : > { %4809 = vmatpush3.bf16.msra.mxu1 %v5104_v9  ;;  %4873 = vmatpush3.bf16.msra.mxu0 %v5106_v15  ;;  %v630_v7 = vpack.c.bf16 %v510_v2, %v502_v1  ;;  %v499_v9 = vld [vmem:[%s6114_s22 + $0x310] sm:$0xff]  ;;  %v524_v15 = vld [vmem:[%s6114_s22 + $0x3d8] sm:$0xff]  ;;  %v616_v2 = vpack.c.bf16 %v480_v63, %v472_v62 }
 0x10f   : > { %4810 = vmatprep.subr.bf16.mxu1 %v5107_v19  ;;  %4874 = vmatprep.subr.bf16.mxu0 %v5109_v28  ;;  %v5124_v19 = vld [vmem:[#allocation9 + $0x1b8] sm:$0xff]   ;;  %v627_v20 = vpack.c.bf16 %v507_v10, %v499_v9  ;;  %v517_v28 = vld [vmem:[%s6114_s22 + $0x3a0] sm:$0xff]  ;;  %v463_v61 = vld [vmem:[%s6114_s22 + $0x1f0] sm:$0xff] }
 0x110   : > { %v5136_v59 = vld [vmem:[%s6122_s14 + $0x34] ss:$8 sps:$4 sm:$0xff]   ;;  %v5138_v1 = vld [vmem:[%s6122_s14 + $0x30] ss:$8 sps:$4 sm:$0xff]   ;;  %v5141_v9 = vld [vmem:[%s6122_s14 + $0x40] ss:$8 sps:$4 sm:$0xff]  }
 0x111   : > { %v5142_v11 = vld [vmem:[%s6122_s14 + $0x54] ss:$8 sps:$4 sm:$0xff]  }
 0x112   : > { %4811 = vmatpush3.bf16.msra.mxu1 %v5108_v25  ;;  %4875 = vmatpush3.bf16.msra.mxu0 %v5110_v29  ;;  %v5126_v25 = vld [vmem:[#allocation8 + $0x38] sm:$0xff]   ;;  %v525_v29 = vld [vmem:[%s6114_s22 + $0x3e0] sm:$0xff] }
 0x113   : > { %4812 = vmatprep.subr.bf16.mxu1 %v5111_v35  ;;  %4876 = vmatprep.subr.bf16.mxu0 %v5113_v44  ;;  %v5129_v35 = vld [vmem:[%s6122_s14 + $0x4] ss:$8 sps:$4 sm:$0xff]   ;;  %v423_v44 = vld [vmem:[%s6114_s22 + $0xb0] sm:$0xff] }
 0x114   : > { %1299 = vmatmul.mubr.bf16.gmra.mrb[24].mxu1 %v595_v13  ;;  %1396 = vmatmul.mubr.bf16.gmra.mrb[24].mxu0 %v597_v14  ;;  %v5122_v13 = vld [vmem:[#allocation8 + $0x30] sm:$0xff]   ;;  %v516_v14 = vld [vmem:[%s6114_s22 + $0x398] sm:$0xff] }
 0x115   : > { %1306 = vmatprep.mubr.bf16.mxu1 %v604_v18  ;;  %1403 = vmatprep.mubr.bf16.mxu0 %v606_v24  ;;  %v526_v18 = vld [vmem:[%s6114_s22 + $0x3e8] sm:$0xff]  ;;  %v636_v23 = vpack.c.bf16 %v524_v15, %v516_v14  ;;  %v504_v14 = vld [vmem:[%s6114_s22 + $0x338] sm:$0xff] }
 0x116   : > { %4813 = vmatpush3.bf16.msra.mxu1 %v5112_v41  ;;  %4877 = vmatpush3.bf16.msra.mxu0 %v5114_v45  ;;  %v638_v24 = vpack.c.bf16 %v526_v18, %v518_v17  ;;  %v5127_v41 = vld [vmem:[%s6122_s14] ss:$8 sps:$4 sm:$0xff]   ;;  %v431_v45 = vld [vmem:[%s6114_s22 + $0xf0] sm:$0xff]  ;;  %v512_v15 = vld [vmem:[%s6114_s22 + $0x378] sm:$0xff] }
 0x117   : > { %4814 = vmatprep.subr.bf16.mxu1 %v5115_v50  ;;  %4878 = vmatprep.subr.bf16.mxu0 %v5117_v58  ;;  %v600_v50 = vpack.c.bf16 %v448_v47, %v440_v46  ;;  %v5144_v17 = vld [vmem:[%s6122_s14 + $0x50] ss:$8 sps:$4 sm:$0xff]   ;;  %v632_v18 = vpack.c.bf16 %v512_v15, %v504_v14 }
 0x11a   : > { %4815 = vmatpush3.bf16.msra.mxu1 %v5116_v55  ;;  %4879 = vmatpush3.bf16.msra.mxu0 %v5118_v60  ;;  %v464_v55 = vld [vmem:[%s6114_s22 + $0x1f8] sm:$0xff]  ;;  %v455_v60 = vld [vmem:[%s6114_s22 + $0x1b0] sm:$0xff] }
 0x11b   : > { %4816 = vmatprep.subr.bf16.mxu1 %v5119_v0  ;;  %4880 = vmatprep.subr.bf16.mxu0 %v5121_v8  ;;  %v607_v0 = vpack.c.bf16 %v463_v61, %v455_v60  ;;  %v1876_v61 = vld [vmem:[#allocation11 + $0xe8] sm:$0xff] }
 0x11c   : > { %1307 = vmatmul.mubr.bf16.gmra.mrb[28].mxu1 %v603_v32  ;;  %1404 = vmatmul.mubr.bf16.gmra.mrb[28].mxu0 %v605_v33  ;;  %v635_v32 = vpack.c.bf16 %v523_v27, %v515_v26  ;;  %v637_v33 = vpack.c.bf16 %v525_v29, %v517_v28  ;;  %v5148_v27 = vld [vmem:[%s6122_s14 + $0x74] ss:$8 sps:$4 sm:$0xff]   ;;  %v1847_v28 = vld [vmem:[#allocation11] sm:$0xff] }
 0x11d   : > { %1314 = vmatprep.mubr.bf16.mxu1 %v612_v34  ;;  %1411 = vmatprep.mubr.bf16.mxu0 %v614_v40  ;;  %v584_v34 = vpack.c.bf16 %v416_v31, %v408_v30  ;;  %v583_v40 = vpack.c.bf16 %v415_v37, %v407_v36  ;;  %v1851_v29 = vld [vmem:[#allocation11 + $0x20] sm:$0xff]  ;;  %v1848_v30 = vld [vmem:[#allocation11 + $0x8] sm:$0xff] }
 0x11e   : > { %4817 = vmatpush3.bf16.msra.mxu1 %v5120_v5  ;;  %4881 = vmatpush3.bf16.msra.mxu0 %v5122_v13  ;;  %v479_v5 = vld [vmem:[%s6114_s22 + $0x270] sm:$0xff]  ;;  %v4402_v31 = vcombine.low %v1847_v28, %v1851_v29 }
 0x11f   : > { %4818 = vmatprep.subr.bf16.mxu1 %v5123_v16  ;;  %4882 = vmatprep.subr.bf16.mxu0 %v5125_v22  ;;  %v495_v13 = vld [vmem:[%s6114_s22 + $0x2f0] sm:$0xff]  ;;  %v520_v22 = vld [vmem:[%s6114_s22 + $0x3b8] sm:$0xff] }
 0x120   : > { %v623_v16 = vpack.c.bf16 %v495_v13, %v487_v12  ;;  %v1892_v13 = vld [vmem:[#allocation11 + $0x168] sm:$0xff] }
 0x122   : > { %4819 = vmatpush3.bf16.msra.mxu1 %v5124_v19  ;;  %4883 = vmatpush3.bf16.msra.mxu0 %v5126_v25  ;;  %v5145_v19 = vld [vmem:[%s6122_s14 + $0x64] ss:$8 sps:$4 sm:$0xff]   ;;  %v5147_v25 = vld [vmem:[%s6122_s14 + $0x60] ss:$8 sps:$4 sm:$0xff]  }
 0x124   : > { %1315 = vmatmul.mubr.bf16.gmra.mrb[32].mxu1 %v611_v48  ;;  %1412 = vmatmul.mubr.bf16.gmra.mrb[32].mxu0 %v613_v49  ;;  %v591_v48 = vpack.c.bf16 %v431_v45, %v423_v44  ;;  %v5132_v49 = vld [vmem:[%s6122_s14 + $0x10] ss:$8 sps:$4 sm:$0xff]   ;;  %v1860_v45 = vld [vmem:[#allocation11 + $0x68] sm:$0xff] }
 0x125   : > { %1322 = vmatprep.mubr.bf16.mxu1 %v620_v53  ;;  %1419 = vmatprep.mubr.bf16.mxu0 %v622_v54  ;;  %v447_v53 = vld [vmem:[%s6114_s22 + $0x170] sm:$0xff]  ;;  %v456_v54 = vld [vmem:[%s6114_s22 + $0x1b8] sm:$0xff] }
 0x126   : > { %v599_v56 = vpack.c.bf16 %v447_v53, %v439_v52  ;;  %v608_v58 = vpack.c.bf16 %v464_v55, %v456_v54  ;;  %v1868_v53 = vld [vmem:[#allocation11 + $0xa8] sm:$0xff] }
 0x12c   : > { %1323 = vmatmul.mubr.bf16.gmra.mrb[36].mxu1 %v619_v3  ;;  %1420 = vmatmul.mubr.bf16.gmra.mrb[36].mxu0 %v621_v4  ;;  %v5139_v3 = vld [vmem:[%s6122_s14 + $0x44] ss:$8 sps:$4 sm:$0xff]   ;;  %v471_v4 = vld [vmem:[%s6114_s22 + $0x230] sm:$0xff] }
 0x12d   : > { %1330 = vmatprep.mubr.bf16.mxu1 %v628_v6  ;;  %1427 = vmatprep.mubr.bf16.mxu0 %v630_v7  ;;  %v488_v6 = vld [vmem:[%s6114_s22 + $0x2b8] sm:$0xff]  ;;  %v615_v8 = vpack.c.bf16 %v479_v5, %v471_v4  ;;  %v1884_v5 = vld [vmem:[#allocation11 + $0x128] sm:$0xff] }
 0x12e   : > { %v496_v7 = vld [vmem:[%s6114_s22 + $0x2f8] sm:$0xff] }
 0x12f   : > { %v624_v10 = vpack.c.bf16 %v496_v7, %v488_v6 }
 0x134   : > { %1331 = vmatmul.mubr.bf16.gmra.mrb[40].mxu1 %v627_v20  ;;  %1428 = vmatmul.mubr.bf16.gmra.mrb[40].mxu0 %v629_v21  ;;  %v503_v20 = vld [vmem:[%s6114_s22 + $0x330] sm:$0xff] }
 0x135   : > { %1338 = vmatprep.mubr.bf16.mxu1 %v636_v23  ;;  %1435 = vmatprep.mubr.bf16.mxu0 %v638_v24  ;;  %v511_v21 = vld [vmem:[%s6114_s22 + $0x370] sm:$0xff]  ;;  %v528_v23 = vld [vmem:[%s6114_s22 + $0x3f8] sm:$0xff] }
 0x136   : > { %v631_v24 = vpack.c.bf16 %v511_v21, %v503_v20  ;;  %v640_v26 = vpack.c.bf16 %v528_v23, %v520_v22  ;;  %v1900_v21 = vld [vmem:[#allocation11 + $0x1a8] sm:$0xff] }
 0x13c   : > { %1339 = vmatmul.mubr.bf16.gmra.mrb[44].mxu1 %v635_v32  ;;  %1436 = vmatmul.mubr.bf16.gmra.mrb[44].mxu0 %v637_v33  ;;  %v4403_v32 = vcombine.high %v1847_v28, %v1851_v29  ;;  %v1852_v33 = vld [vmem:[#allocation11 + $0x28] sm:$0xff] }
 0x13d   : > { %1476 = vmatprep.mubr.bf16.mxu1 %v584_v34  ;;  %1766 = vmatprep.mubr.bf16.mxu0 %v5129_v35  ;;  %v519_v34 = vld [vmem:[%s6114_s22 + $0x3b0] sm:$0xff]  ;;  %v4404_v36 = vcombine.low %v1848_v30, %v1852_v33  ;;  %v4405_v37 = vcombine.high %v1848_v30, %v1852_v33  ;;  %v1908_v28 = vld [vmem:[#allocation11 + $0x1e8] sm:$0xff] }
 0x13e   : > { %v527_v35 = vld [vmem:[%s6114_s22 + $0x3f0] sm:$0xff]  ;;  %2231 = vmatprep.subr.bf16.mxu1 %v4403_v32  ;;  %v5819_v32 = vmov 0  }
 0x13f   : > { %2344 = vmatprep.subr.bf16.mxu0 %v4405_v37  ;;  %v639_v38 = vpack.c.bf16 %v527_v35, %v519_v34  ;;  %v6282_v33 = vld [vmem:[#allocation11 + $0x10] sm:$0xff]  ;;  %v6286_v35 = vld [vmem:[#allocation11 + $0x18] sm:$0xff] }
 0x140   : > { %v6284_v34 = vld [vmem:[#allocation11 + $0x30] sm:$0xff] }
 0x141   : > { %v4407_v37 = vcombine.high %v6282_v33, %v6284_v34 }
 0x144   : > { %1477 = vmatmul.mubr.bf16.vlgmr.msra.gmra.mrb[48].mxu1 %v583_v40  ;;  %1767 = vmatmul.mubr.bf16.vlgmr.msra.gmra.mrb[48].mxu0 %v5127_v41  ;;  %v1855_v40 = vld [vmem:[#allocation11 + $0x40] sm:$0xff] }
 0x145   : > { %1484 = vmatprep.mubr.bf16.mxu1 %v592_v42  ;;  %1774 = vmatprep.mubr.bf16.mxu0 %v5130_v43  ;;  %v1859_v41 = vld [vmem:[#allocation11 + $0x60] sm:$0xff]  ;;  %v1856_v42 = vld [vmem:[#allocation11 + $0x48] sm:$0xff] }
 0x146   : > { %2232 = vmatpush1.bf16.msra.mxu1 %v4402_v31  ;;  %2345 = vmatpush1.bf16.msra.mxu0 %v4404_v36  ;;  %v4410_v43 = vcombine.low %v1855_v40, %v1859_v41  ;;  %v4411_v44 = vcombine.high %v1855_v40, %v1859_v41  ;;  %v4412_v46 = vcombine.low %v1856_v42, %v1860_v45 }
 0x147   : > { %v4413_v47 = vcombine.high %v1856_v42, %v1860_v45  ;;  %v4406_v36 = vcombine.low %v6282_v33, %v6284_v34  ;;  %v1873_v33 = vld [vmem:[#allocation11 + $0xd0] sm:$0xff] }
 0x148   : > { %2233 = vmatprep.subr.bf16.mxu1 %v4411_v44 }
 0x149   : > { %2346 = vmatprep.subr.bf16.mxu0 %v4413_v47 }
 0x14a   : > { %2234 = vmatpush1.bf16.msra.mxu1 %v4410_v43  ;;  %2347 = vmatpush1.bf16.msra.mxu0 %v4412_v46 }
 0x14c   : > { %1485 = vmatmul.mubr.bf16.gmra.mrb[52].mxu1 %v591_v48  ;;  %1775 = vmatmul.mubr.bf16.gmra.mrb[52].mxu0 %v5132_v49  ;;  %v1863_v48 = vld [vmem:[#allocation11 + $0x80] sm:$0xff] }
 0x14d   : > { %1492 = vmatprep.mubr.bf16.mxu1 %v600_v50  ;;  %1782 = vmatprep.mubr.bf16.mxu0 %v5133_v51  ;;  %v1867_v49 = vld [vmem:[#allocation11 + $0xa0] sm:$0xff]  ;;  %v1864_v50 = vld [vmem:[#allocation11 + $0x88] sm:$0xff] }
 0x14e   : > { %v4418_v51 = vcombine.low %v1863_v48, %v1867_v49  ;;  %v4419_v52 = vcombine.high %v1863_v48, %v1867_v49  ;;  %v4420_v54 = vcombine.low %v1864_v50, %v1868_v53  ;;  %v4421_v55 = vcombine.high %v1864_v50, %v1868_v53 }
 0x150   : > { %2235 = vmatprep.subr.bf16.mxu1 %v4419_v52  ;;  %2348 = vmatprep.subr.bf16.mxu0 %v4421_v55 }
 0x151   : > { %2236 = vmatpush1.bf16.msra.mxu1 %v4418_v51  ;;  %2349 = vmatpush1.bf16.msra.mxu0 %v4420_v54 }
 0x154   : > { %1493 = vmatmul.mubr.bf16.gmra.mrb[56].mxu1 %v599_v56  ;;  %1783 = vmatmul.mubr.bf16.gmra.mrb[56].mxu0 %v5135_v57  ;;  %v1871_v56 = vld [vmem:[#allocation11 + $0xc0] sm:$0xff] }
 0x155   : > { %1500 = vmatprep.mubr.bf16.mxu1 %v608_v58  ;;  %1790 = vmatprep.mubr.bf16.mxu0 %v5136_v59  ;;  %v1875_v57 = vld [vmem:[#allocation11 + $0xe0] sm:$0xff]  ;;  %v1872_v58 = vld [vmem:[#allocation11 + $0xc8] sm:$0xff] }
 0x156   : > { %v4426_v59 = vcombine.low %v1871_v56, %v1875_v57  ;;  %v4427_v60 = vcombine.high %v1871_v56, %v1875_v57  ;;  %v4428_v62 = vcombine.low %v1872_v58, %v1876_v61  ;;  %v4429_v63 = vcombine.high %v1872_v58, %v1876_v61 }
 0x158   : > { %2237 = vmatprep.subr.bf16.mxu1 %v4427_v60  ;;  %2350 = vmatprep.subr.bf16.mxu0 %v4429_v63 }
 0x159   : > { %2238 = vmatpush1.bf16.msra.mxu1 %v4426_v59  ;;  %2351 = vmatpush1.bf16.msra.mxu0 %v4428_v62 }
 0x15c   : > { %1501 = vmatmul.mubr.bf16.gmra.mrb[60].mxu1 %v607_v0  ;;  %1791 = vmatmul.mubr.bf16.gmra.mrb[60].mxu0 %v5138_v1  ;;  %v1879_v0 = vld [vmem:[#allocation11 + $0x100] sm:$0xff] }
 0x15d   : > { %1508 = vmatprep.mubr.bf16.mxu1 %v616_v2  ;;  %1798 = vmatprep.mubr.bf16.mxu0 %v5139_v3  ;;  %v1883_v1 = vld [vmem:[#allocation11 + $0x120] sm:$0xff]  ;;  %v1880_v2 = vld [vmem:[#allocation11 + $0x108] sm:$0xff] }
 0x15e   : > { %v4434_v3 = vcombine.low %v1879_v0, %v1883_v1  ;;  %v4435_v4 = vcombine.high %v1879_v0, %v1883_v1  ;;  %v4436_v6 = vcombine.low %v1880_v2, %v1884_v5  ;;  %v4437_v7 = vcombine.high %v1880_v2, %v1884_v5 }
 0x160   : > { %2239 = vmatprep.subr.bf16.mxu1 %v4435_v4  ;;  %2352 = vmatprep.subr.bf16.mxu0 %v4437_v7 }
 0x161   : > { %2240 = vmatpush1.bf16.msra.mxu1 %v4434_v3  ;;  %2353 = vmatpush1.bf16.msra.mxu0 %v4436_v6 }
 0x164   : > { %1509 = vmatmul.mubr.bf16.gmra.mrb[64].mxu1 %v615_v8  ;;  %1799 = vmatmul.mubr.bf16.gmra.mrb[64].mxu0 %v5141_v9  ;;  %v1887_v8 = vld [vmem:[#allocation11 + $0x140] sm:$0xff] }
 0x165   : > { %1516 = vmatprep.mubr.bf16.mxu1 %v624_v10  ;;  %1806 = vmatprep.mubr.bf16.mxu0 %v5142_v11  ;;  %v1891_v9 = vld [vmem:[#allocation11 + $0x160] sm:$0xff]  ;;  %v1888_v10 = vld [vmem:[#allocation11 + $0x148] sm:$0xff] }
 0x166   : > { %v4442_v11 = vcombine.low %v1887_v8, %v1891_v9  ;;  %v4443_v12 = vcombine.high %v1887_v8, %v1891_v9  ;;  %v4444_v14 = vcombine.low %v1888_v10, %v1892_v13  ;;  %v4445_v15 = vcombine.high %v1888_v10, %v1892_v13 }
 0x168   : > { %2241 = vmatprep.subr.bf16.mxu1 %v4443_v12  ;;  %2354 = vmatprep.subr.bf16.mxu0 %v4445_v15 }
 0x169   : > { %2242 = vmatpush1.bf16.msra.mxu1 %v4442_v11  ;;  %2355 = vmatpush1.bf16.msra.mxu0 %v4444_v14 }
 0x16c   : > { %1517 = vmatmul.mubr.bf16.gmra.mrb[68].mxu1 %v623_v16  ;;  %1807 = vmatmul.mubr.bf16.gmra.mrb[68].mxu0 %v5144_v17  ;;  %v1895_v16 = vld [vmem:[#allocation11 + $0x180] sm:$0xff] }
 0x16d   : > { %1524 = vmatprep.mubr.bf16.mxu1 %v632_v18  ;;  %1814 = vmatprep.mubr.bf16.mxu0 %v5145_v19  ;;  %v1899_v17 = vld [vmem:[#allocation11 + $0x1a0] sm:$0xff]  ;;  %v1896_v18 = vld [vmem:[#allocation11 + $0x188] sm:$0xff] }
 0x16e   : > { %v4450_v19 = vcombine.low %v1895_v16, %v1899_v17  ;;  %v4451_v20 = vcombine.high %v1895_v16, %v1899_v17  ;;  %v4452_v22 = vcombine.low %v1896_v18, %v1900_v21  ;;  %v4453_v23 = vcombine.high %v1896_v18, %v1900_v21 }
 0x170   : > { %2243 = vmatprep.subr.bf16.mxu1 %v4451_v20  ;;  %2356 = vmatprep.subr.bf16.mxu0 %v4453_v23 }
 0x171   : > { %2244 = vmatpush1.bf16.msra.mxu1 %v4450_v19  ;;  %2357 = vmatpush1.bf16.msra.mxu0 %v4452_v22 }
 0x174   : > { %1525 = vmatmul.mubr.bf16.gmra.mrb[72].mxu1 %v631_v24  ;;  %1815 = vmatmul.mubr.bf16.gmra.mrb[72].mxu0 %v5147_v25  ;;  %v1903_v24 = vld [vmem:[#allocation11 + $0x1c0] sm:$0xff] }
 0x175   : > { %1532 = vmatprep.mubr.bf16.mxu1 %v640_v26  ;;  %1822 = vmatprep.mubr.bf16.mxu0 %v5148_v27  ;;  %v1907_v25 = vld [vmem:[#allocation11 + $0x1e0] sm:$0xff]  ;;  %v1904_v26 = vld [vmem:[#allocation11 + $0x1c8] sm:$0xff] }
 0x176   : > { %v4459_v27 = vcombine.high %v1903_v24, %v1907_v25  ;;  %v4458_v29 = vcombine.low %v1903_v24, %v1907_v25  ;;  %v4460_v30 = vcombine.low %v1904_v26, %v1908_v28  ;;  %v4461_v31 = vcombine.high %v1904_v26, %v1908_v28 }
 0x178   : > { %2245 = vmatprep.subr.bf16.mxu1 %v4459_v27  ;;  %2358 = vmatprep.subr.bf16.mxu0 %v4461_v31 }
 0x179   : > { %2246 = vmatpush1.bf16.msra.mxu1 %v4458_v29  ;;  %2359 = vmatpush1.bf16.msra.mxu0 %v4460_v30 }
 0x17a   : > { %2457 = vmatprep.subr.bf16.mxu1 %v4407_v37 }
 0x17c   : > { %1533 = vmatmul.mubr.bf16.gmra.mrb[76].mxu1 %v639_v38  ;;  %1823 = vmatmul.mubr.bf16.gmra.mrb[76].mxu0 %v5150_v39  ;;  %v6292_v38 = vld [vmem:[#allocation11 + $0x38] sm:$0xff] }
 0x17d   : > { %2263 = vmatprep.mubr.bf16.mxu1 %v5819_v32  ;;  %2376 = vmatprep.mubr.bf16.mxu0 %v5819_v32  ;;  %v4408_v41 = vcombine.low %v6286_v35, %v6292_v38  ;;  %v4409_v42 = vcombine.high %v6286_v35, %v6292_v38  ;;  %v1874_v38 = vld [vmem:[#allocation11 + $0xd8] sm:$0xff] }
 0x17f   : > { %2570 = vmatprep.subr.bf16.mxu0 %v4409_v42 }
 0x1b7   : > { %v4652_v39 = vpop.f32.mrb[0].mxu1  ;;  %v4628_v40 = vpop.f32.mrb[0].mxu0 }
 0x1b8   : > { %v4653_v43 = vpop.f32.mrb[1].mxu1  ;;  %v4629_v44 = vpop.f32.mrb[1].mxu0 }
 0x1b9   : > { %v6298_v45 = vadd.f32 %v4653_v43, %v4652_v39  ;;  %v4655_v46 = vpop.f32.mrb[2].mxu1  ;;  %v4630_v47 = vadd.f32 %v4629_v44, %v4628_v40  ;;  %v4631_v48 = vpop.f32.mrb[2].mxu0 }
 0x1ba   : > { %v4656_v49 = vpop.f32.mrb[3].mxu1  ;;  %v4632_v50 = vpop.f32.mrb[3].mxu0 }
 0x1bb   : > { %v6300_v51 = vadd.f32 %v4656_v49, %v4655_v46  ;;  %v4633_v52 = vadd.f32 %v4632_v50, %v4631_v48 }
 0x1bf   : > { %v4658_v53 = vpop.f32.mrb[4].mxu1  ;;  %v4634_v54 = vpop.f32.mrb[4].mxu0 }
 0x1c0   : > { %v4659_v55 = vpop.f32.mrb[5].mxu1  ;;  %v4635_v56 = vpop.f32.mrb[5].mxu0 }
 0x1c1   : > { %v6302_v57 = vadd.f32 %v4659_v55, %v4658_v53  ;;  %v4661_v58 = vpop.f32.mrb[6].mxu1  ;;  %v4636_v59 = vadd.f32 %v4635_v56, %v4634_v54  ;;  %v4637_v60 = vpop.f32.mrb[6].mxu0 }
 0x1c2   : > { %v4662_v61 = vpop.f32.mrb[7].mxu1  ;;  %v4638_v62 = vpop.f32.mrb[7].mxu0 }
 0x1c3   : > { %v6304_v63 = vadd.f32 %v4662_v61, %v4661_v58  ;;  %v4639_v0 = vadd.f32 %v4638_v62, %v4637_v60 }
 0x1c7   : > { %v4664_v1 = vpop.f32.mrb[8].mxu1  ;;  %v4640_v2 = vpop.f32.mrb[8].mxu0 }
 0x1c8   : > { %v4665_v3 = vpop.f32.mrb[9].mxu1  ;;  %v4641_v4 = vpop.f32.mrb[9].mxu0 }
 0x1c9   : > { %v6306_v5 = vadd.f32 %v4665_v3, %v4664_v1  ;;  %v4667_v6 = vpop.f32.mrb[10].mxu1  ;;  %v4642_v7 = vadd.f32 %v4641_v4, %v4640_v2  ;;  %v4643_v8 = vpop.f32.mrb[10].mxu0 }
 0x1ca   : > { %v4668_v9 = vpop.f32.mrb[11].mxu1  ;;  %v4644_v10 = vpop.f32.mrb[11].mxu0 }
 0x1cb   : > { %v6308_v11 = vadd.f32 %v4668_v9, %v4667_v6  ;;  %v4645_v12 = vadd.f32 %v4644_v10, %v4643_v8 }
 0x1cf   : > { %v4670_v13 = vpop.f32.mrb[12].mxu1  ;;  %v4646_v14 = vpop.f32.mrb[12].mxu0 }
 0x1d0   : > { %v4671_v15 = vpop.f32.mrb[13].mxu1  ;;  %v4647_v16 = vpop.f32.mrb[13].mxu0 }
 0x1d1   : > { %v6310_v17 = vadd.f32 %v4671_v15, %v4670_v13  ;;  %v4673_v18 = vpop.f32.mrb[14].mxu1  ;;  %v6312_v19 = vadd.f32 %v4647_v16, %v4646_v14  ;;  %v4649_v20 = vpop.f32.mrb[14].mxu0 }
 0x1d2   : > { %v4674_v21 = vpop.f32.mrb[15].mxu1  ;;  %v4650_v22 = vpop.f32.mrb[15].mxu0 }
 0x1d3   : > { %v6314_v23 = vadd.f32 %v4674_v21, %v4673_v18  ;;  %v4651_v24 = vadd.f32 %v4650_v22, %v4649_v20 }
 0x1d7   : > { %v4692_v25 = vpop.f32.mrb[16].mxu1  ;;  %v4756_v26 = vpop.f32.mrb[16].mxu0 }
 0x1d8   : > { %v4693_v27 = vpop.f32.mrb[17].mxu1  ;;  %v4757_v28 = vpop.f32.mrb[17].mxu0 }
 0x1d9   : > { %v4694_v29 = vadd.f32 %v4693_v27, %v4692_v25  ;;  %v4695_v30 = vpop.f32.mrb[18].mxu1  ;;  %v4758_v31 = vadd.f32 %v4757_v28, %v4756_v26  ;;  %v4759_v37 = vpop.f32.mrb[18].mxu0 }
 0x1da   : > { %v4696_v39 = vpop.f32.mrb[19].mxu1  ;;  %v4760_v40 = vpop.f32.mrb[19].mxu0 }
 0x1db   : > { %v1285_v42 = vadd.f32 %v4694_v29, %v4630_v47  ;;  %v4697_v43 = vadd.f32 %v4696_v39, %v4695_v30  ;;  %v4761_v44 = vadd.f32 %v4760_v40, %v4759_v37 }
 0x1dd   : > { %v1288_v46 = vadd.f32 %v4697_v43, %v4633_v52  ;;  %v6316_v48 = vadd.f32 %v4758_v31, %v1285_v42 }
 0x1df   : > { %v6318_v49 = vadd.f32 %v4761_v44, %v1288_v46  ;;  %v4698_v50 = vpop.f32.mrb[20].mxu1  ;;  %v4762_v53 = vpop.f32.mrb[20].mxu0 }
 0x1e0   : > { %v4699_v54 = vpop.f32.mrb[21].mxu1  ;;  %v4763_v55 = vpop.f32.mrb[21].mxu0 }
 0x1e1   : > { %v4700_v56 = vadd.f32 %v4699_v54, %v4698_v50  ;;  %v4701_v58 = vpop.f32.mrb[22].mxu1  ;;  %v4764_v60 = vadd.f32 %v4763_v55, %v4762_v53  ;;  %v4765_v61 = vpop.f32.mrb[22].mxu0 }
 0x1e2   : > { %v4702_v62 = vpop.f32.mrb[23].mxu1  ;;  %v4766_v1 = vpop.f32.mrb[23].mxu0 }
 0x1e3   : > { %v1293_v2 = vadd.f32 %v4700_v56, %v4636_v59  ;;  %v4703_v3 = vadd.f32 %v4702_v62, %v4701_v58  ;;  %v4767_v47 = vadd.f32 %v4766_v1, %v4765_v61 }
 0x1e5   : > { %v1296_v4 = vadd.f32 %v4703_v3, %v4639_v0  ;;  %v6320_v6 = vadd.f32 %v4764_v60, %v1293_v2 }
 0x1e7   : > { %v6322_v52 = vadd.f32 %v4767_v47, %v1296_v4  ;;  %v4704_v8 = vpop.f32.mrb[24].mxu1  ;;  %v4768_v9 = vpop.f32.mrb[24].mxu0 }
 0x1e8   : > { %v4705_v10 = vpop.f32.mrb[25].mxu1  ;;  %v4769_v13 = vpop.f32.mrb[25].mxu0 }
 0x1e9   : > { %v4706_v14 = vadd.f32 %v4705_v10, %v4704_v8  ;;  %v4707_v15 = vpop.f32.mrb[26].mxu1  ;;  %v4770_v16 = vadd.f32 %v4769_v13, %v4768_v9  ;;  %v4771_v18 = vpop.f32.mrb[26].mxu0 }
 0x1ea   : > { %v4708_v20 = vpop.f32.mrb[27].mxu1  ;;  %v4772_v21 = vpop.f32.mrb[27].mxu0 }
 0x1eb   : > { %v1301_v22 = vadd.f32 %v4706_v14, %v4642_v7  ;;  %v4709_v25 = vadd.f32 %v4708_v20, %v4707_v15  ;;  %v4773_v59 = vadd.f32 %v4772_v21, %v4771_v18 }
 0x1ed   : > { %v1304_v26 = vadd.f32 %v4709_v25, %v4645_v12  ;;  %v6324_v27 = vadd.f32 %v4770_v16, %v1301_v22 }
 0x1ef   : > { %v6326_v0 = vadd.f32 %v4773_v59, %v1304_v26  ;;  %v4710_v28 = vpop.f32.mrb[28].mxu1  ;;  %v4774_v29 = vpop.f32.mrb[28].mxu0 }
 0x1f0   : > { %v4711_v30 = vpop.f32.mrb[29].mxu1  ;;  %v4775_v31 = vpop.f32.mrb[29].mxu0 }
 0x1f1   : > { %v4712_v37 = vadd.f32 %v4711_v30, %v4710_v28  ;;  %v4713_v39 = vpop.f32.mrb[30].mxu1  ;;  %v4776_v40 = vadd.f32 %v4775_v31, %v4774_v29  ;;  %v4777_v42 = vpop.f32.mrb[30].mxu0 }
 0x1f2   : > { %v4714_v43 = vpop.f32.mrb[31].mxu1  ;;  %v4778_v44 = vpop.f32.mrb[31].mxu0 }
 0x1f3   : > { %v1309_v46 = vadd.f32 %v4712_v37, %v6312_v19  ;;  %v4715_v7 = vadd.f32 %v4714_v43, %v4713_v39  ;;  %v4779_v50 = vadd.f32 %v4778_v44, %v4777_v42 }
 0x1f5   : > { %v1312_v53 = vadd.f32 %v4715_v7, %v4651_v24  ;;  %v6329_v12 = vadd.f32 %v4776_v40, %v1309_v46 }
 0x1f7   : > { %v6331_v54 = vadd.f32 %v4779_v50, %v1312_v53  ;;  %v4716_v55 = vpop.f32.mrb[32].mxu1  ;;  %v4780_v56 = vpop.f32.mrb[32].mxu0 }
 0x1f8   : > { %v4717_v58 = vpop.f32.mrb[33].mxu1  ;;  %v4781_v60 = vpop.f32.mrb[33].mxu0 }
 0x1f9   : > { %v4718_v61 = vadd.f32 %v4717_v58, %v4716_v55  ;;  %v4719_v62 = vpop.f32.mrb[34].mxu1  ;;  %v4782_v1 = vadd.f32 %v4781_v60, %v4780_v56  ;;  %v4783_v2 = vpop.f32.mrb[34].mxu0 }
 0x1fa   : > { %v4720_v3 = vpop.f32.mrb[35].mxu1  ;;  %v4784_v47 = vpop.f32.mrb[35].mxu0 }
 0x1fb   : > { %v1317_v4 = vadd.f32 %v4718_v61, %v6298_v45  ;;  %v4721_v19 = vadd.f32 %v4720_v3, %v4719_v62  ;;  %v4785_v8 = vadd.f32 %v4784_v47, %v4783_v2 }
 0x1fd   : > { %v1320_v24 = vadd.f32 %v4721_v19, %v6300_v51  ;;  %v6335_v9 = vadd.f32 %v4782_v1, %v1317_v4 }
 0x1ff   : > { %v6337_v10 = vadd.f32 %v4785_v8, %v1320_v24  ;;  %v4722_v13 = vpop.f32.mrb[36].mxu1  ;;  %v4786_v14 = vpop.f32.mrb[36].mxu0 }
 0x200   : > { %v4723_v15 = vpop.f32.mrb[37].mxu1  ;;  %v4787_v16 = vpop.f32.mrb[37].mxu0 }
 0x201   : > { %v4724_v18 = vadd.f32 %v4723_v15, %v4722_v13  ;;  %v4725_v20 = vpop.f32.mrb[38].mxu1  ;;  %v4788_v21 = vadd.f32 %v4787_v16, %v4786_v14  ;;  %v4789_v22 = vpop.f32.mrb[38].mxu0 }
 0x202   : > { %v4726_v25 = vpop.f32.mrb[39].mxu1  ;;  %v4790_v59 = vpop.f32.mrb[39].mxu0 }
 0x203   : > { %v1325_v45 = vadd.f32 %v4724_v18, %v6302_v57  ;;  %v4727_v26 = vadd.f32 %v4726_v25, %v4725_v20  ;;  %v4791_v28 = vadd.f32 %v4790_v59, %v4789_v22 }
 0x205   : > { %v1328_v51 = vadd.f32 %v4727_v26, %v6304_v63  ;;  %v6341_v29 = vadd.f32 %v4788_v21, %v1325_v45 }
 0x207   : > { %v6343_v30 = vadd.f32 %v4791_v28, %v1328_v51  ;;  %v4728_v31 = vpop.f32.mrb[40].mxu1  ;;  %v4792_v37 = vpop.f32.mrb[40].mxu0  ;;  %v6357_v28 = vstv %s400_s8 }
 0x208   : > { %v4729_v39 = vpop.f32.mrb[41].mxu1  ;;  %v4793_v40 = vpop.f32.mrb[41].mxu0 }
 0x209   : > { %v4730_v42 = vadd.f32 %v4729_v39, %v4728_v31  ;;  %v4731_v43 = vpop.f32.mrb[42].mxu1  ;;  %v4794_v44 = vadd.f32 %v4793_v40, %v4792_v37  ;;  %v4795_v46 = vpop.f32.mrb[42].mxu0 }
 0x20a   : > { %v4732_v7 = vpop.f32.mrb[43].mxu1  ;;  %v4796_v50 = vpop.f32.mrb[43].mxu0 }
 0x20b   : > { %v1333_v57 = vadd.f32 %v4730_v42, %v6306_v5  ;;  %v4733_v53 = vadd.f32 %v4732_v7, %v4731_v43  ;;  %v4797_v55 = vadd.f32 %v4796_v50, %v4795_v46 }
 0x20d   : > { %v1336_v63 = vadd.f32 %v4733_v53, %v6308_v11  ;;  %v6347_v56 = vadd.f32 %v4794_v44, %v1333_v57 }
 0x20f   : > { %v6349_v58 = vadd.f32 %v4797_v55, %v1336_v63  ;;  %v4734_v60 = vpop.f32.mrb[44].mxu1  ;;  %v4798_v61 = vpop.f32.mrb[44].mxu0 }
 0x210   : > { %v4735_v62 = vpop.f32.mrb[45].mxu1  ;;  %v4799_v1 = vpop.f32.mrb[45].mxu0 }
 0x211   : > { %v4736_v2 = vadd.f32 %v4735_v62, %v4734_v60  ;;  %v4737_v3 = vpop.f32.mrb[46].mxu1  ;;  %v4800_v47 = vadd.f32 %v4799_v1, %v4798_v61  ;;  %v4801_v4 = vpop.f32.mrb[46].mxu0 }
 0x212   : > { %v4738_v19 = vpop.f32.mrb[47].mxu1  ;;  %v4802_v8 = vpop.f32.mrb[47].mxu0 }
 0x213   : > { %v1341_v5 = vadd.f32 %v4736_v2, %v6310_v17  ;;  %v4739_v24 = vadd.f32 %v4738_v19, %v4737_v3  ;;  %v4803_v13 = vadd.f32 %v4802_v8, %v4801_v4 }
 0x215   : > { %v1344_v11 = vadd.f32 %v4739_v24, %v6314_v23  ;;  %v6353_v14 = vadd.f32 %v4800_v47, %v1341_v5 }
 0x217   : > { %v6355_v15 = vadd.f32 %v4803_v13, %v1344_v11  ;;  %v4820_v16 = vpop.f32.mrb[48].mxu1  ;;  %v4884_v18 = vpop.f32.mrb[48].mxu0 }
 0x218   : > { %v4821_v20 = vpop.f32.mrb[49].mxu1  ;;  %v4885_v21 = vpop.f32.mrb[49].mxu0 }
 0x219   : > { %v4822_v22 = vadd.f32 %v4821_v20, %v4820_v16  ;;  %v4823_v25 = vpop.f32.mrb[50].mxu1  ;;  %v4886_v59 = vadd.f32 %v4885_v21, %v4884_v18  ;;  %v4887_v45 = vpop.f32.mrb[50].mxu0 }
 0x21a   : > { %v4824_v26 = vpop.f32.mrb[51].mxu1  ;;  %v4888_v17 = vpop.f32.mrb[51].mxu0 }
 0x21b   : > { %v1479_v51 = vadd.f32 %v4822_v22, %v6316_v48  ;;  %v4825_v31 = vadd.f32 %v4824_v26, %v4823_v25  ;;  %v4889_v23 = vadd.f32 %v4888_v17, %v4887_v45  ;;  %v1857_v45 = vld [vmem:[#allocation11 + $0x50] sm:$0xff] }
 0x21d   : > { %v1482_v37 = vadd.f32 %v4825_v31, %v6318_v49  ;;  %v1542_v39 = vmul.f32 %v6357_v28, %v1479_v51  ;;  %v1861_v51 = vld [vmem:[#allocation11 + $0x70] sm:$0xff]  ;;  %v1858_v31 = vld [vmem:[#allocation11 + $0x58] sm:$0xff] }
 0x21f   : > { %v1769_v40 = vadd.f32 %v4886_v59, %v1542_v39  ;;  %v1543_v42 = vmul.f32 %v6357_v28, %v1482_v37  ;;  %v4826_v43 = vpop.f32.mrb[52].mxu1  ;;  %v4890_v44 = vpop.f32.mrb[52].mxu0  ;;  %v6370_v37 = vld [vmem:[#allocation11 + $0x90] sm:$0xff] }
 0x220   : > { %v4827_v46 = vpop.f32.mrb[53].mxu1  ;;  %v4891_v7 = vpop.f32.mrb[53].mxu0 }
 0x221   : > { %v1772_v50 = vadd.f32 %v4889_v23, %v1543_v42  ;;  %v4828_v57 = vadd.f32 %v4827_v46, %v4826_v43  ;;  %v4829_v53 = vpop.f32.mrb[54].mxu1  ;;  %v4892_v55 = vadd.f32 %v4891_v7, %v4890_v44  ;;  %v4893_v63 = vpop.f32.mrb[54].mxu0  ;;  %v1862_v23 = vld [vmem:[#allocation11 + $0x78] sm:$0xff]  ;;  %v6373_v44 = vld [vmem:[#allocation11 + $0xb0] sm:$0xff] }
 0x222   : > { %v4830_v60 = vpop.f32.mrb[55].mxu1  ;;  %v4894_v48 = vpop.f32.mrb[55].mxu0  ;;  %v6377_v46 = vld [vmem:[#allocation11 + $0xb8] sm:$0xff] }
 0x223   : > { %v1831_v61 = vpack.c.bf16 %v1772_v50, %v1769_v40  ;;  %v1487_v62 = vadd.f32 %v4828_v57, %v6320_v6  ;;  %v4831_v49 = vadd.f32 %v4830_v60, %v4829_v53  ;;  %v4895_v1 = vadd.f32 %v4894_v48, %v4893_v63 }
 0x224   : > { %v4414_v57 = vcombine.low %v1857_v45, %v1861_v51  ;;  %v4415_v53 = vcombine.high %v1857_v45, %v1861_v51  ;;  %v1885_v51 = vld [vmem:[#allocation11 + $0x130] sm:$0xff] }
 0x225   : > { %5151 = vtanh.bf16 %v1831_v61  ;;  %v1490_v2 = vadd.f32 %v4831_v49, %v6322_v52  ;;  %v1544_v3 = vmul.f32 %v6357_v28, %v1487_v62 }
 0x227   : > { %v1777_v47 = vadd.f32 %v4892_v55, %v1544_v3  ;;  %v1545_v4 = vmul.f32 %v6357_v28, %v1490_v2  ;;  %v4832_v19 = vpop.f32.mrb[56].mxu1  ;;  %v4896_v8 = vpop.f32.mrb[56].mxu0  ;;  %v4417_v55 = vcombine.high %v1858_v31, %v1862_v23  ;;  %v4416_v2 = vcombine.low %v1858_v31, %v1862_v23 }
 0x228   : > { %v4833_v5 = vpop.f32.mrb[57].mxu1  ;;  %v4897_v24 = vpop.f32.mrb[57].mxu0  ;;  %v4423_v3 = vcombine.high %v6370_v37, %v6373_v44 }
 0x229   : > { %v1780_v13 = vadd.f32 %v4895_v1, %v1545_v4  ;;  %v4834_v11 = vadd.f32 %v4833_v5, %v4832_v19  ;;  %v4835_v16 = vpop.f32.mrb[58].mxu1  ;;  %v4898_v18 = vadd.f32 %v4897_v24, %v4896_v8  ;;  %v4899_v20 = vpop.f32.mrb[58].mxu0 }
 0x22a   : > { %v4836_v6 = vpop.f32.mrb[59].mxu1  ;;  %v4900_v21 = vpop.f32.mrb[59].mxu0 }
 0x22b   : > { %v1832_v22 = vpack.c.bf16 %v1780_v13, %v1777_v47  ;;  %v1495_v25 = vadd.f32 %v4834_v11, %v6324_v27  ;;  %v4837_v52 = vadd.f32 %v4836_v6, %v4835_v16  ;;  %v4901_v59 = vadd.f32 %v4900_v21, %v4899_v20  ;;  %v6375_v27 = vld [vmem:[#allocation11 + $0x98] sm:$0xff] }
 0x22c   : > { %v4425_v47 = vcombine.high %v6375_v27, %v6377_v46  ;;  %v4422_v16 = vcombine.low %v6370_v37, %v6373_v44  ;;  %v4424_v6 = vcombine.low %v6375_v27, %v6377_v46  ;;  %v1882_v46 = vld [vmem:[#allocation11 + $0x118] sm:$0xff] }
 0x22d   : > { %5153 = vtanh.bf16 %v1832_v22  ;;  %v1498_v26 = vadd.f32 %v4837_v52, %v6326_v0  ;;  %v1546_v17 = vmul.f32 %v6357_v28, %v1495_v25 }
 0x22f   : > { %v1785_v39 = vadd.f32 %v4898_v18, %v1546_v17  ;;  %v1547_v40 = vmul.f32 %v6357_v28, %v1498_v26  ;;  %v4838_v42 = vpop.f32.mrb[60].mxu1  ;;  %v4902_v43 = vpop.f32.mrb[60].mxu0  ;;  %v1881_v17 = vld [vmem:[#allocation11 + $0x110] sm:$0xff] }
 0x230   : > { %v6379_v7 = vpop.eup %5151  ;;  %v4839_v0 = vpop.f32.mrb[61].mxu1  ;;  %v4439_v27 = vcombine.high %v1881_v17, %v1885_v51 }
 0x231   : > { %v4903_v50 = vpop.f32.mrb[61].mxu0  ;;  %v1788_v63 = vadd.f32 %v4901_v59, %v1547_v40  ;;  %v4840_v60 = vadd.f32 %v4839_v0, %v4838_v42  ;;  %v4841_v48 = vpop.f32.mrb[62].mxu1  ;;  %2264 = vmatmul.mubr.bf16.vlgmr.msra.gmra.mrb[80].mxu1 %v6379_v7  ;;  %2377 = vmatmul.mubr.bf16.vlgmr.msra.gmra.mrb[80].mxu0 %v6379_v7  ;;  %v1886_v0 = vld [vmem:[#allocation11 + $0x138] sm:$0xff] }
 0x232   : > { %v4904_v61 = vadd.f32 %v4903_v50, %v4902_v43  ;;  %v4905_v62 = vpop.f32.mrb[62].mxu0  ;;  %v4842_v49 = vpop.f32.mrb[63].mxu1  ;;  %2458 = vmatpush1.bf16.msra.mxu1 %v4406_v36  ;;  %2571 = vmatpush1.bf16.msra.mxu0 %v4408_v41  ;;  %v1877_v36 = vld [vmem:[#allocation11 + $0xf0] sm:$0xff]  ;;  %v1878_v41 = vld [vmem:[#allocation11 + $0xf8] sm:$0xff] }
 0x233   : > { %v4906_v1 = vpop.f32.mrb[63].mxu0  ;;  %v1833_v4 = vpack.c.bf16 %v1788_v63, %v1785_v39  ;;  %v1503_v19 = vadd.f32 %v4840_v60, %v6329_v12  ;;  %v4843_v8 = vadd.f32 %v4842_v49, %v4841_v48  ;;  %2273 = vmatprep.mubr.bf16.mxu1 %v5819_v32  ;;  %2386 = vmatprep.mubr.bf16.mxu0 %v5819_v32  ;;  %v6410_v50 = vld [vmem:[#allocation11 + $0x150] sm:$0xff]  ;;  %v1890_v63 = vld [vmem:[#allocation11 + $0x158] sm:$0xff] }
 0x234   : > { %v4907_v5 = vadd.f32 %v4906_v1, %v4905_v62  ;;  %2459 = vmatprep.subr.bf16.mxu1 %v4415_v53  ;;  %2572 = vmatprep.subr.bf16.mxu0 %v4417_v55  ;;  %v4431_v21 = vcombine.high %v1873_v33, %v1877_v36  ;;  %v4433_v22 = vcombine.high %v1874_v38, %v1878_v41  ;;  %v1893_v55 = vld [vmem:[#allocation11 + $0x170] sm:$0xff] }
 0x235   : > { %5155 = vtanh.bf16 %v1833_v4  ;;  %v1506_v34 = vadd.f32 %v4843_v8, %v6331_v54  ;;  %v1548_v35 = vmul.f32 %v6357_v28, %v1503_v19  ;;  %v4430_v37 = vcombine.low %v1873_v33, %v1877_v36 }
 0x236   : > { %2460 = vmatpush1.bf16.msra.mxu1 %v4414_v57  ;;  %2573 = vmatpush1.bf16.msra.mxu0 %v4416_v2  ;;  %v4432_v44 = vcombine.low %v1874_v38, %v1878_v41  ;;  %v4438_v49 = vcombine.low %v1881_v17, %v1885_v51  ;;  %v4441_v1 = vcombine.high %v1882_v46, %v1886_v0 }
 0x237   : > { %v1793_v12 = vadd.f32 %v4904_v61, %v1548_v35  ;;  %v1549_v24 = vmul.f32 %v6357_v28, %v1506_v34  ;;  %v4844_v13 = vpop.f32.mrb[64].mxu1  ;;  %v4908_v11 = vpop.f32.mrb[64].mxu0  ;;  %2461 = vmatprep.subr.bf16.mxu1 %v4423_v3  ;;  %2574 = vmatprep.subr.bf16.mxu0 %v4425_v47  ;;  %v4447_v4 = vcombine.high %v6410_v50, %v1893_v55 }
 0x238   : > { %v6401_v18 = vpop.eup %5153  ;;  %v4845_v54 = vpop.f32.mrb[65].mxu1 }
 0x239   : > { %v4909_v20 = vpop.f32.mrb[65].mxu0  ;;  %v1796_v25 = vadd.f32 %v4907_v5, %v1549_v24  ;;  %v4846_v52 = vadd.f32 %v4845_v54, %v4844_v13  ;;  %v4847_v59 = vpop.f32.mrb[66].mxu1  ;;  %2274 = vmatmul.mubr.bf16.gmra.mrb[84].mxu1 %v6401_v18  ;;  %2387 = vmatmul.mubr.bf16.gmra.mrb[84].mxu0 %v6401_v18  ;;  %v1897_v54 = vld [vmem:[#allocation11 + $0x190] sm:$0xff] }
 0x23a   : > { %v4910_v45 = vadd.f32 %v4909_v20, %v4908_v11  ;;  %v4911_v26 = vpop.f32.mrb[66].mxu0  ;;  %v4848_v31 = vpop.f32.mrb[67].mxu1  ;;  %2283 = vmatprep.mubr.bf16.mxu1 %v5819_v32  ;;  %2396 = vmatprep.mubr.bf16.mxu0 %v5819_v32  ;;  %v4446_v11 = vcombine.low %v6410_v50, %v1893_v55  ;;  %v1901_v20 = vld [vmem:[#allocation11 + $0x1b0] sm:$0xff] }
 0x23b   : > { %v4912_v23 = vpop.f32.mrb[67].mxu0  ;;  %v1834_v39 = vpack.c.bf16 %v1796_v25, %v1793_v12  ;;  %v1511_v40 = vadd.f32 %v4846_v52, %v6335_v9  ;;  %v4849_v42 = vadd.f32 %v4848_v31, %v4847_v59  ;;  %2462 = vmatpush1.bf16.msra.mxu1 %v4422_v16  ;;  %2575 = vmatpush1.bf16.msra.mxu0 %v4424_v6  ;;  %v1894_v9 = vld [vmem:[#allocation11 + $0x178] sm:$0xff]  ;;  %v1909_v52 = vld [vmem:[#allocation11 + $0x1f0] sm:$0xff] }
 0x23c   : > { %v4913_v43 = vadd.f32 %v4912_v23, %v4911_v26  ;;  %2463 = vmatprep.subr.bf16.mxu1 %v4431_v21  ;;  %2576 = vmatprep.subr.bf16.mxu0 %v4433_v22  ;;  %v4449_v19 = vcombine.high %v1890_v63, %v1894_v9  ;;  %v4448_v16 = vcombine.low %v1890_v63, %v1894_v9  ;;  %v1898_v6 = vld [vmem:[#allocation11 + $0x198] sm:$0xff] }
 0x23d   : > { %5157 = vtanh.bf16 %v1834_v39  ;;  %v1514_v57 = vadd.f32 %v4849_v42, %v6337_v10  ;;  %v1550_v53 = vmul.f32 %v6357_v28, %v1511_v40  ;;  %v4440_v10 = vcombine.low %v1882_v46, %v1886_v0  ;;  %v1902_v25 = vld [vmem:[#allocation11 + $0x1b8] sm:$0xff] }
 0x23e   : > { %v4454_v51 = vcombine.low %v1897_v54, %v1901_v20  ;;  %v4455_v31 = vcombine.high %v1897_v54, %v1901_v20  ;;  %v1906_v23 = vld [vmem:[#allocation11 + $0x1d8] sm:$0xff]  ;;  %v4456_v42 = vcombine.low %v1898_v6, %v1902_v25 }
 0x23f   : > { %v1801_v60 = vadd.f32 %v4910_v45, %v1550_v53  ;;  %v1551_v48 = vmul.f32 %v6357_v28, %v1514_v57  ;;  %v4850_v61 = vpop.f32.mrb[68].mxu1  ;;  %v4914_v62 = vpop.f32.mrb[68].mxu0  ;;  %2464 = vmatpush1.bf16.msra.mxu1 %v4430_v37  ;;  %2577 = vmatpush1.bf16.msra.mxu0 %v4432_v44  ;;  %v1910_v37 = vld [vmem:[#allocation11 + $0x1f8] sm:$0xff] }
 0x240   : > { %v6415_v2 = vpop.eup %5155  ;;  %v4851_v3 = vpop.f32.mrb[69].mxu1  ;;  %2465 = vmatprep.subr.bf16.mxu1 %v4439_v27  ;;  %2578 = vmatprep.subr.bf16.mxu0 %v4441_v1  ;;  %v4465_v63 = vcombine.high %v1906_v23, %v1910_v37 }
 0x241   : > { %v4915_v47 = vpop.f32.mrb[69].mxu0  ;;  %v1804_v8 = vadd.f32 %v4913_v43, %v1551_v48  ;;  %v4852_v5 = vadd.f32 %v4851_v3, %v4850_v61  ;;  %v4853_v33 = vpop.f32.mrb[70].mxu1  ;;  %2284 = vmatmul.mubr.bf16.gmra.mrb[88].mxu1 %v6415_v2  ;;  %2397 = vmatmul.mubr.bf16.gmra.mrb[88].mxu0 %v6415_v2  ;;  %v4457_v43 = vcombine.high %v1898_v6, %v1902_v25 }
 0x242   : > { %v4916_v34 = vadd.f32 %v4915_v47, %v4914_v62  ;;  %v4917_v35 = vpop.f32.mrb[70].mxu0  ;;  %v4854_v36 = vpop.f32.mrb[71].mxu1  ;;  %2293 = vmatprep.mubr.bf16.mxu1 %v5819_v32  ;;  %2406 = vmatprep.mubr.bf16.mxu0 %v5819_v32 }
 0x243   : > { %v4918_v38 = vpop.f32.mrb[71].mxu0  ;;  %v1835_v41 = vpack.c.bf16 %v1804_v8, %v1801_v60  ;;  %v1519_v12 = vadd.f32 %v4852_v5, %v6341_v29  ;;  %v4855_v24 = vadd.f32 %v4854_v36, %v4853_v33  ;;  %2466 = vmatpush1.bf16.msra.mxu1 %v4438_v49  ;;  %2579 = vmatpush1.bf16.msra.mxu0 %v4440_v10  ;;  %v1905_v29 = vld [vmem:[#allocation11 + $0x1d0] sm:$0xff] }
 0x244   : > { %v4919_v13 = vadd.f32 %v4918_v38, %v4917_v35  ;;  %2467 = vmatprep.subr.bf16.mxu1 %v4447_v4  ;;  %2580 = vmatprep.subr.bf16.mxu0 %v4449_v19  ;;  %v4463_v44 = vcombine.high %v1905_v29, %v1909_v52  ;;  %v4462_v62 = vcombine.low %v1905_v29, %v1909_v52 }
 0x245   : > { %5159 = vtanh.bf16 %v1835_v41  ;;  %v1522_v21 = vadd.f32 %v4855_v24, %v6343_v30  ;;  %v1552_v22 = vmul.f32 %v6357_v28, %v1519_v12 }
 0x247   : > { %v1809_v59 = vadd.f32 %v4916_v34, %v1552_v22  ;;  %v1553_v45 = vmul.f32 %v6357_v28, %v1522_v21  ;;  %v4856_v26 = vpop.f32.mrb[72].mxu1  ;;  %v4920_v17 = vpop.f32.mrb[72].mxu0  ;;  %2468 = vmatpush1.bf16.msra.mxu1 %v4446_v11  ;;  %2581 = vmatpush1.bf16.msra.mxu0 %v4448_v16 }
 0x248   : > { %v6427_v39 = vpop.eup %5157  ;;  %v4857_v40 = vpop.f32.mrb[73].mxu1  ;;  %2469 = vmatprep.subr.bf16.mxu1 %v4455_v31  ;;  %2582 = vmatprep.subr.bf16.mxu0 %v4457_v43 }
 0x249   : > { %v4921_v30 = vpop.f32.mrb[73].mxu0  ;;  %v1812_v27 = vadd.f32 %v4919_v13, %v1553_v45  ;;  %v4858_v46 = vadd.f32 %v4857_v40, %v4856_v26  ;;  %v4859_v0 = vpop.f32.mrb[74].mxu1  ;;  %2294 = vmatmul.mubr.bf16.gmra.mrb[92].mxu1 %v6427_v39  ;;  %2407 = vmatmul.mubr.bf16.gmra.mrb[92].mxu0 %v6427_v39 }
 0x24a   : > { %v4922_v50 = vadd.f32 %v4921_v30, %v4920_v17  ;;  %v4923_v57 = vpop.f32.mrb[74].mxu0  ;;  %v4860_v53 = vpop.f32.mrb[75].mxu1  ;;  %2303 = vmatprep.mubr.bf16.mxu1 %v5819_v32  ;;  %2416 = vmatprep.mubr.bf16.mxu0 %v5819_v32 }
 0x24b   : > { %v4924_v55 = vpop.f32.mrb[75].mxu0  ;;  %v1836_v9 = vpack.c.bf16 %v1812_v27, %v1809_v59  ;;  %v1527_v60 = vadd.f32 %v4858_v46, %v6347_v56  ;;  %v4861_v48 = vadd.f32 %v4860_v53, %v4859_v0  ;;  %2470 = vmatpush1.bf16.msra.mxu1 %v4454_v51  ;;  %2583 = vmatpush1.bf16.msra.mxu0 %v4456_v42 }
 0x24c   : > { %v4925_v61 = vadd.f32 %v4924_v55, %v4923_v57  ;;  %2471 = vmatprep.subr.bf16.mxu1 %v4463_v44  ;;  %2584 = vmatprep.subr.bf16.mxu0 %v4465_v63  ;;  %v4464_v56 = vcombine.low %v1906_v23, %v1910_v37 }
 0x24d   : > { %5161 = vtanh.bf16 %v1836_v9  ;;  %v1530_v49 = vadd.f32 %v4861_v48, %v6349_v58  ;;  %v1554_v1 = vmul.f32 %v6357_v28, %v1527_v60 }
 0x24f   : > { %v1817_v3 = vadd.f32 %v4922_v50, %v1554_v1  ;;  %v1555_v47 = vmul.f32 %v6357_v28, %v1530_v49  ;;  %v4862_v10 = vpop.f32.mrb[76].mxu1  ;;  %v4926_v4 = vpop.f32.mrb[76].mxu0  ;;  %2472 = vmatpush1.bf16.msra.mxu1 %v4462_v62  ;;  %2585 = vmatpush1.bf16.msra.mxu0 %v4464_v56 }
 0x250   : > { %v5160_v19 = vpop.eup %5159  ;;  %v4863_v8 = vpop.f32.mrb[77].mxu1 }
 0x251   : > { %v4927_v5 = vpop.f32.mrb[77].mxu0  ;;  %v1820_v33 = vadd.f32 %v4925_v61, %v1555_v47  ;;  %v4864_v34 = vadd.f32 %v4863_v8, %v4862_v10  ;;  %v4865_v35 = vpop.f32.mrb[78].mxu1  ;;  %2304 = vmatmul.mubr.bf16.gmra.mrb[96].mxu1 %v5160_v19  ;;  %2417 = vmatmul.mubr.bf16.gmra.mrb[96].mxu0 %v5160_v19 }
 0x252   : > { %v4928_v58 = vadd.f32 %v4927_v5, %v4926_v4  ;;  %v4929_v36 = vpop.f32.mrb[78].mxu0  ;;  %v4866_v38 = vpop.f32.mrb[79].mxu1  ;;  %2313 = vmatprep.mubr.bf16.mxu1 %v5819_v32  ;;  %2426 = vmatprep.mubr.bf16.mxu0 %v5819_v32 }
 0x253   : > { %v4930_v41 = vpop.f32.mrb[79].mxu0  ;;  %v1837_v12 = vpack.c.bf16 %v1820_v33, %v1817_v3  ;;  %v1535_v24 = vadd.f32 %v4864_v34, %v6353_v14  ;;  %v4867_v13 = vadd.f32 %v4866_v38, %v4865_v35 }
 0x254   : > { %v4931_v11 = vadd.f32 %v4930_v41, %v4929_v36 }
 0x255   : > { %5163 = vtanh.bf16 %v1837_v12  ;;  %v1538_v16 = vadd.f32 %v4867_v13, %v6355_v15  ;;  %v1556_v54 = vmul.f32 %v6357_v28, %v1535_v24 }
 0x257   : > { %v1825_v20 = vadd.f32 %v4928_v58, %v1556_v54  ;;  %v1557_v6 = vmul.f32 %v6357_v28, %v1538_v16 }
 0x258   : > { %v5162_v21 = vpop.eup %5161 }
 0x259   : > { %v1828_v22 = vadd.f32 %v4931_v11, %v1557_v6  ;;  %2314 = vmatmul.mubr.bf16.gmra.mrb[100].mxu1 %v5162_v21  ;;  %2427 = vmatmul.mubr.bf16.gmra.mrb[100].mxu0 %v5162_v21 }
 0x25a   : > { %2323 = vmatprep.mubr.bf16.mxu1 %v5819_v32  ;;  %2436 = vmatprep.mubr.bf16.mxu0 %v5819_v32 }
 0x25b   : > { %v1838_v14 = vpack.c.bf16 %v1828_v22, %v1825_v20 }
 0x25d   : > { %5165 = vtanh.bf16 %v1838_v14 }
 0x260   : > { %v5164_v25 = vpop.eup %5163 }
 0x261   : > { %2324 = vmatmul.mubr.bf16.gmra.mrb[104].mxu1 %v5164_v25  ;;  %2437 = vmatmul.mubr.bf16.gmra.mrb[104].mxu0 %v5164_v25 }
 0x262   : > { %2333 = vmatprep.mubr.bf16.mxu1 %v5819_v32  ;;  %2446 = vmatprep.mubr.bf16.mxu0 %v5819_v32 }
 0x268   : > { %v5166_v15 = vpop.eup %5165 }
 0x269   : > { %2334 = vmatmul.mubr.bf16.gmra.mrb[108].mxu1 %v5166_v15  ;;  %2447 = vmatmul.mubr.bf16.gmra.mrb[108].mxu0 %v5166_v15 }
 0x26a   : > { %2489 = vmatprep.mubr.bf16.mxu1 %v5819_v32  ;;  %2602 = vmatprep.mubr.bf16.mxu0 %v5819_v32 }
 0x271   : > { %2490 = vmatmul.mubr.bf16.vlgmr.msra.gmra.mrb[112].mxu1 %v6379_v7  ;;  %2603 = vmatmul.mubr.bf16.vlgmr.msra.gmra.mrb[112].mxu0 %v6379_v7 }
 0x272   : > { %2499 = vmatprep.mubr.bf16.mxu1 %v5819_v32  ;;  %2612 = vmatprep.mubr.bf16.mxu0 %v5819_v32 }
 0x279   : > { %2500 = vmatmul.mubr.bf16.gmra.mrb[116].mxu1 %v6401_v18  ;;  %2613 = vmatmul.mubr.bf16.gmra.mrb[116].mxu0 %v6401_v18 }
 0x27a   : > { %2509 = vmatprep.mubr.bf16.mxu1 %v5819_v32  ;;  %2622 = vmatprep.mubr.bf16.mxu0 %v5819_v32 }
 0x281   : > { %2510 = vmatmul.mubr.bf16.gmra.mrb[120].mxu1 %v6415_v2  ;;  %2623 = vmatmul.mubr.bf16.gmra.mrb[120].mxu0 %v6415_v2 }
 0x282   : > { %2519 = vmatprep.mubr.bf16.mxu1 %v5819_v32  ;;  %2632 = vmatprep.mubr.bf16.mxu0 %v5819_v32 }
 0x289   : > { %2520 = vmatmul.mubr.bf16.gmra.mrb[124].mxu1 %v6427_v39  ;;  %2633 = vmatmul.mubr.bf16.gmra.mrb[124].mxu0 %v6427_v39 }
 0x28a   : > { %2529 = vmatprep.mubr.bf16.mxu1 %v5819_v32  ;;  %2642 = vmatprep.mubr.bf16.mxu0 %v5819_v32 }
 0x291   : > { %2530 = vmatmul.mubr.bf16.gmra.mrb[128].mxu1 %v5160_v19  ;;  %2643 = vmatmul.mubr.bf16.gmra.mrb[128].mxu0 %v5160_v19 }
 0x292   : > { %2539 = vmatprep.mubr.bf16.mxu1 %v5819_v32  ;;  %2652 = vmatprep.mubr.bf16.mxu0 %v5819_v32 }
 0x299   : > { %2540 = vmatmul.mubr.bf16.gmra.mrb[132].mxu1 %v5162_v21  ;;  %2653 = vmatmul.mubr.bf16.gmra.mrb[132].mxu0 %v5162_v21 }
 0x29a   : > { %2549 = vmatprep.mubr.bf16.mxu1 %v5819_v32  ;;  %2662 = vmatprep.mubr.bf16.mxu0 %v5819_v32 }
 0x2a1   : > { %2550 = vmatmul.mubr.bf16.gmra.mrb[136].mxu1 %v5164_v25  ;;  %2663 = vmatmul.mubr.bf16.gmra.mrb[136].mxu0 %v5164_v25 }
 0x2a2   : > { %2559 = vmatprep.mubr.bf16.mxu1 %v5819_v32  ;;  %2672 = vmatprep.mubr.bf16.mxu0 %v5819_v32 }
 0x2a9   : > { %2560 = vmatmul.mubr.bf16.gmra.mrb[140].mxu1 %v5166_v15  ;;  %2673 = vmatmul.mubr.bf16.gmra.mrb[140].mxu0 %v5166_v15 }
 0x304   : > { %v2265_v7 = vpop.f32.mrb[80].mxu1  ;;  %v2378_v18 = vpop.f32.mrb[80].mxu0 }
 0x305   : > { %v2267_v2 = vpop.f32.mrb[81].mxu1  ;;  %v2380_v29 = vpop.f32.mrb[81].mxu0 }
 0x306   : > { %v2269_v52 = vpop.f32.mrb[82].mxu1  ;;  %v2382_v59 = vpop.f32.mrb[82].mxu0 }
 0x307   : > { %v2683_v45 = vpack.c.bf16 %v2269_v52, %v2265_v7  ;;  %v2685_v26 = vpack.c.bf16 %v2382_v59, %v2378_v18  ;;  %v2271_v17 = vpop.f32.mrb[83].mxu1  ;;  %v2384_v51 = vpop.f32.mrb[83].mxu0 }
 0x308   : > { %v2684_v31 = vpack.c.bf16 %v2271_v17, %v2267_v2  ;;  %v2686_v23 = vpack.c.bf16 %v2384_v51, %v2380_v29 }
 0x309   : > { %v4466_v37 = vmul.bf16 3216621497, %v2683_v45  ;;  %v4468_v39 = vmul.bf16 3216621497, %v2685_v26 }
 0x30a   : > { %v4467_v40 = vmul.bf16 3216621497, %v2684_v31  ;;  %v4469_v30 = vmul.bf16 3216621497, %v2686_v23 }
 0x30b   : > { %5167 = vpow.bf16 %v4466_v37 }
 0x30c   : > { %5169 = vpow.bf16 %v4468_v39  ;;  %v2275_v32 = vpop.f32.mrb[84].mxu1  ;;  %v2388_v42 = vpop.f32.mrb[84].mxu0 }
 0x30d   : > { %5171 = vpow.bf16 %v4467_v40  ;;  %v2277_v43 = vpop.f32.mrb[85].mxu1  ;;  %v2390_v44 = vpop.f32.mrb[85].mxu0 }
 0x30e   : > { %5173 = vpow.bf16 %v4469_v30  ;;  %v2279_v27 = vpop.f32.mrb[86].mxu1  ;;  %v2392_v46 = vpop.f32.mrb[86].mxu0 }
 0x30f   : > { %v2691_v0 = vpack.c.bf16 %v2279_v27, %v2275_v32  ;;  %v2693_v50 = vpack.c.bf16 %v2392_v46, %v2388_v42  ;;  %v2281_v57 = vpop.f32.mrb[87].mxu1  ;;  %v2394_v53 = vpop.f32.mrb[87].mxu0 }
 0x310   : > { %v2692_v55 = vpack.c.bf16 %v2281_v57, %v2277_v43  ;;  %v2694_v63 = vpack.c.bf16 %v2394_v53, %v2390_v44 }
 0x311   : > { %v4474_v9 = vmul.bf16 3216621497, %v2691_v0  ;;  %v4476_v60 = vmul.bf16 3216621497, %v2693_v50 }
 0x312   : > { %v4475_v48 = vmul.bf16 3216621497, %v2692_v55  ;;  %v4477_v61 = vmul.bf16 3216621497, %v2694_v63 }
 0x313   : > { %5175 = vpow.bf16 %v4474_v9 }
 0x314   : > { %5177 = vpow.bf16 %v4476_v60  ;;  %v2285_v62 = vpop.f32.mrb[88].mxu1  ;;  %v2398_v49 = vpop.f32.mrb[88].mxu0 }
 0x315   : > { %5179 = vpow.bf16 %v4475_v48  ;;  %v2287_v1 = vpop.f32.mrb[89].mxu1  ;;  %v2400_v3 = vpop.f32.mrb[89].mxu0 }
 0x316   : > { %v5168_v47 = vpop.eup %5167  ;;  %5181 = vpow.bf16 %v4477_v61  ;;  %v2289_v10 = vpop.f32.mrb[90].mxu1 }
 0x317   : > { %v2402_v4 = vpop.f32.mrb[90].mxu0  ;;  %v5170_v56 = vpop.eup %5169  ;;  %v3003_v19 = vadd.bf16 1065369472, %v5168_v47  ;;  %v2699_v8 = vpack.c.bf16 %v2289_v10, %v2285_v62 }
 0x318   : > { %v2701_v5 = vpack.c.bf16 %v2402_v4, %v2398_v49  ;;  %v2291_v33 = vpop.f32.mrb[91].mxu1  ;;  %v2404_v34 = vpop.f32.mrb[91].mxu0  ;;  %v3005_v58 = vadd.bf16 1065369472, %v5170_v56 }
 0x319   : > { %v5172_v35 = vpop.eup %5171  ;;  %v2700_v36 = vpack.c.bf16 %v2291_v33, %v2287_v1  ;;  %v2702_v38 = vpack.c.bf16 %v2404_v34, %v2400_v3  ;;  %5183 = vrcp.bf16 %v3003_v19  ;;  %v4482_v24 = vmul.bf16 3216621497, %v2699_v8 }
 0x31a   : > { %v5174_v41 = vpop.eup %5173  ;;  %v3004_v12 = vadd.bf16 1065369472, %v5172_v35  ;;  %5185 = vrcp.bf16 %v3005_v58  ;;  %v4484_v11 = vmul.bf16 3216621497, %v2701_v5 }
 0x31b   : > { %v3006_v13 = vadd.bf16 1065369472, %v5174_v41  ;;  %v4483_v16 = vmul.bf16 3216621497, %v2700_v36  ;;  %v4485_v54 = vmul.bf16 3216621497, %v2702_v38 }
 0x31c   : > { %5187 = vrcp.bf16 %v3004_v12  ;;  %v2295_v20 = vpop.f32.mrb[92].mxu1  ;;  %v2408_v6 = vpop.f32.mrb[92].mxu0  ;;  %v5423_v41 = vld [vmem:[%s6114_s22] sm:$0xff] }
 0x31d   : > { %5189 = vrcp.bf16 %v3006_v13  ;;  %v2297_v21 = vpop.f32.mrb[93].mxu1  ;;  %v2410_v22 = vpop.f32.mrb[93].mxu0 }
 0x31e   : > { %5191 = vpow.bf16 %v4482_v24  ;;  %v5176_v14 = vpop.eup %5175  ;;  %v2299_v25 = vpop.f32.mrb[94].mxu1  ;;  %v5424_v24 = vld [vmem:[%s6114_s22 + $0x40] sm:$0xff] }
 0x31f   : > { %5193 = vpow.bf16 %v4484_v11  ;;  %v2412_v15 = vpop.f32.mrb[94].mxu0  ;;  %v5178_v7 = vpop.eup %5177  ;;  %v3011_v18 = vadd.bf16 1065369472, %v5176_v14  ;;  %v2707_v2 = vpack.c.bf16 %v2299_v25, %v2295_v20  ;;  %v5425_v20 = vld [vmem:[%s6114_s22 + $0x10] sm:$0xff] }
 0x320   : > { %5195 = vpow.bf16 %v4483_v16  ;;  %v2709_v29 = vpack.c.bf16 %v2412_v15, %v2408_v6  ;;  %v2301_v52 = vpop.f32.mrb[95].mxu1  ;;  %v2414_v59 = vpop.f32.mrb[95].mxu0  ;;  %v3013_v26 = vadd.bf16 1065369472, %v5178_v7 }
 0x321   : > { %v5180_v45 = vpop.eup %5179  ;;  %5197 = vpow.bf16 %v4485_v54  ;;  %v2708_v17 = vpack.c.bf16 %v2301_v52, %v2297_v21  ;;  %v2710_v51 = vpack.c.bf16 %v2414_v59, %v2410_v22  ;;  %v4490_v37 = vmul.bf16 3216621497, %v2707_v2  ;;  %v5426_v21 = vld [vmem:[%s6114_s22 + $0x50] sm:$0xff] }
 0x322   : > { %v5182_v31 = vpop.eup %5181  ;;  %5199 = vrcp.bf16 %v3011_v18  ;;  %v3012_v23 = vadd.bf16 1065369472, %v5180_v45  ;;  %v4492_v40 = vmul.bf16 3216621497, %v2709_v29 }
 0x323   : > { %5201 = vrcp.bf16 %v3013_v26  ;;  %v3014_v39 = vadd.bf16 1065369472, %v5182_v31  ;;  %v4491_v30 = vmul.bf16 3216621497, %v2708_v17  ;;  %v4493_v42 = vmul.bf16 3216621497, %v2710_v51 }
 0x324   : > { %5203 = vrcp.bf16 %v3012_v23  ;;  %v5184_v32 = vpop.eup %5183  ;;  %v6471_v43 = vpop.f32.mrb[96].mxu1  ;;  %v5427_v51 = vld [vmem:[%s6114_s22 + $0x8] sm:$0xff] }
 0x325   : > { %5205 = vrcp.bf16 %v3014_v39  ;;  %v6473_v44 = vpop.f32.mrb[96].mxu0  ;;  %v5186_v27 = vpop.eup %5185  ;;  %v3068_v46 = vmul.bf16 1065369472, %v5184_v32  ;;  %v5428_v23 = vld [vmem:[%s6114_s22 + $0x48] sm:$0xff] }
 0x326   : > { %5207 = vpow.bf16 %v4490_v37  ;;  %v6476_v0 = vpop.f32.mrb[97].mxu1  ;;  %v6478_v50 = vpop.f32.mrb[97].mxu0  ;;  %v3072_v53 = vmul.bf16 1065369472, %v5186_v27 }
 0x327   : > { %v5188_v57 = vpop.eup %5187  ;;  %5209 = vpow.bf16 %v4492_v40  ;;  %v6480_v55 = vpop.f32.mrb[98].mxu1  ;;  %v3579_v60 = vunpack.c.l.bf16 %v3068_v46  ;;  %v3587_v48 = vunpack.c.h.bf16 %v3068_v46 }
 0x328   : > { %v6482_v63 = vpop.f32.mrb[98].mxu0  ;;  %v5190_v9 = vpop.eup %5189  ;;  %v3070_v61 = vmul.bf16 1065369472, %v5188_v57  ;;  %5211 = vpow.bf16 %v4491_v30  ;;  %v3581_v3 = vunpack.c.l.bf16 %v3072_v53  ;;  %v3589_v47 = vunpack.c.h.bf16 %v3072_v53 }
 0x329   : > { %v6484_v62 = vpop.f32.mrb[99].mxu1  ;;  %v6486_v49 = vpop.f32.mrb[99].mxu0  ;;  %v3074_v10 = vmul.bf16 1065369472, %v5190_v9  ;;  %5213 = vpow.bf16 %v4493_v42  ;;  %v3707_v56 = vmul.f32 %v3579_v60, %v6357_v28  ;;  %v3715_v19 = vmul.f32 %v3587_v48, %v6357_v28 }
 0x32a   : > { %v6488_v1 = vpop.eup %5191  ;;  %v4530_v8 = vcombine.low %v3068_v46, %v3070_v61  ;;  %v4534_v5 = vcombine.high %v3068_v46, %v3070_v61  ;;  %v3709_v34 = vmul.f32 %v3581_v3, %v6357_v28  ;;  %v3717_v35 = vmul.f32 %v3589_v47, %v6357_v28 }
 0x32b   : > { %v6490_v4 = vpop.eup %5193  ;;  %v3580_v58 = vunpack.c.l.bf16 %v3070_v61  ;;  %v3588_v36 = vunpack.c.h.bf16 %v3070_v61  ;;  %v3835_v12 = vmul.f32 %v5423_v41, %v3707_v56  ;;  %v3843_v13 = vmul.f32 %v5424_v24, %v3715_v19  ;;  %v5429_v19 = vld [vmem:[%s6114_s22 + $0x18] sm:$0xff] }
 0x32c   : > { %v6494_v33 = vpop.eup %5195  ;;  %3515 = vst [vmem:[%s6504_s12] sm:$0xff] %v4530_v8  ;;  %3519 = vst [vmem:[%s6504_s12 + $0x20] sm:$0xff] %v4534_v5  ;;  %v4531_v11 = vcombine.low %v3072_v53, %v3074_v10  ;;  %v4535_v16 = vcombine.high %v3072_v53, %v3074_v10  ;;  %v3837_v6 = vmul.f32 %v5425_v20, %v3709_v34  ;;  %v6512_v15 = vpop.f32.mrb[100].mxu1  ;;  %v3582_v2 = vunpack.c.l.bf16 %v3074_v10  ;;  %v5430_v5 = vld [vmem:[%s6114_s22 + $0x58] sm:$0xff]  ;;  %v5432_v20 = vld [vmem:[%s6114_s22 + $0xc0] sm:$0xff] }
 0x32d   : > { %v6498_v38 = vpop.eup %5197  ;;  %v3845_v22 = vmul.f32 %v5426_v21, %v3717_v35  ;;  %v3708_v14 = vmul.f32 %v3580_v58, %v6357_v28  ;;  %v3716_v25 = vmul.f32 %v3588_v36, %v6357_v28  ;;  %v6514_v7 = vpop.f32.mrb[100].mxu0  ;;  %3963 = vst [vmem:[%s6518_s23] sm:$0xff] %v3835_v12  ;;  %3971 = vst [vmem:[%s6518_s23 + $0x40] sm:$0xff] %v3843_v13  ;;  %v3590_v29 = vunpack.c.h.bf16 %v3074_v10 }
 0x32e   : > { %v5200_v54 = vpop.eup %5199  ;;  %3516 = vst [vmem:[%s6504_s12 + $0x8] sm:$0xff] %v4531_v11  ;;  %3520 = vst [vmem:[%s6504_s12 + $0x28] sm:$0xff] %v4535_v16  ;;  %v3019_v59 = vadd.bf16 1065369472, %v6488_v1  ;;  %v6525_v45 = vpop.f32.mrb[101].mxu1  ;;  %v3710_v27 = vmul.f32 %v3582_v2, %v6357_v28  ;;  %v5431_v16 = vld [vmem:[%s6114_s22 + $0x80] sm:$0xff] }
 0x32f   : > { %v5202_v18 = vpop.eup %5201  ;;  %v3084_v52 = vmul.bf16 1065369472, %v5200_v54  ;;  %v6527_v26 = vpop.f32.mrb[101].mxu0  ;;  %3965 = vst [vmem:[%s6518_s23 + $0x10] sm:$0xff] %v3837_v6  ;;  %3973 = vst [vmem:[%s6518_s23 + $0x50] sm:$0xff] %v3845_v22  ;;  %v3836_v31 = vmul.f32 %v5427_v51, %v3708_v14  ;;  %v3844_v37 = vmul.f32 %v5428_v23, %v3716_v25  ;;  %v3718_v46 = vmul.f32 %v3590_v29, %v6357_v28  ;;  %v5433_v14 = vld [vmem:[%s6114_s22 + $0x90] sm:$0xff] }
 0x330   : > { %v5204_v17 = vpop.eup %5203  ;;  %v3088_v39 = vmul.bf16 1065369472, %v5202_v18  ;;  %v3021_v40 = vadd.bf16 1065369472, %v6490_v4  ;;  %v6534_v30 = vpop.f32.mrb[102].mxu1  ;;  %v3838_v8 = vmul.f32 %v5429_v19, %v3710_v27  ;;  %v5434_v18 = vld [vmem:[%s6114_s22 + $0xd0] sm:$0xff]  ;;  %5215 = vrcp.bf16 %v3019_v59 }
 0x331   : > { %v6536_v32 = vpop.f32.mrb[102].mxu0  ;;  %v5206_v42 = vpop.eup %5205  ;;  %v3595_v57 = vunpack.c.l.bf16 %v3084_v52  ;;  %v3603_v53 = vunpack.c.h.bf16 %v3084_v52  ;;  %3964 = vst [vmem:[%s6518_s23 + $0x8] sm:$0xff] %v3836_v31  ;;  %3972 = vst [vmem:[%s6518_s23 + $0x48] sm:$0xff] %v3844_v37  ;;  %v3086_v47 = vmul.bf16 1065369472, %v5204_v17  ;;  %v3846_v34 = vmul.f32 %v5430_v5, %v3718_v46  ;;  %v5437_v5 = vld [vmem:[%s6114_s22 + $0x98] sm:$0xff] }
 0x332   : > { %v6540_v9 = vpop.f32.mrb[103].mxu1  ;;  %v6542_v60 = vpop.f32.mrb[103].mxu0  ;;  %v3597_v61 = vunpack.c.l.bf16 %v3088_v39  ;;  %v3605_v3 = vunpack.c.h.bf16 %v3088_v39  ;;  %v3090_v10 = vmul.bf16 1065369472, %v5206_v42  ;;  %3966 = vst [vmem:[%s6518_s23 + $0x18] sm:$0xff] %v3838_v8  ;;  %5217 = vrcp.bf16 %v3021_v40 }
 0x333   : > { %v6544_v48 = vpop.eup %5207  ;;  %v3723_v35 = vmul.f32 %v3595_v57, %v6357_v28  ;;  %v3731_v58 = vmul.f32 %v3603_v53, %v6357_v28  ;;  %v4538_v24 = vcombine.low %v3084_v52, %v3086_v47  ;;  %v4542_v13 = vcombine.high %v3084_v52, %v3086_v47  ;;  %3974 = vst [vmem:[%s6518_s23 + $0x58] sm:$0xff] %v3846_v34 }
 0x334   : > { %v6548_v56 = vpop.eup %5209  ;;  %v3725_v41 = vmul.f32 %v3597_v61, %v6357_v28  ;;  %v3733_v12 = vmul.f32 %v3605_v3, %v6357_v28  ;;  %v3596_v21 = vunpack.c.l.bf16 %v3086_v47  ;;  %v3604_v22 = vunpack.c.h.bf16 %v3086_v47  ;;  %v6568_v17 = vpop.f32.mrb[104].mxu1  ;;  %v5435_v61 = vld [vmem:[%s6114_s22 + $0x88] sm:$0xff] }
 0x335   : > { %v6554_v36 = vpop.eup %5211  ;;  %v3851_v54 = vmul.f32 %v5431_v16, %v3723_v35  ;;  %v3859_v6 = vmul.f32 %v5432_v20, %v3731_v58  ;;  %3523 = vst [vmem:[%s6504_s12 + $0x40] sm:$0xff] %v4538_v24  ;;  %3527 = vst [vmem:[%s6504_s12 + $0x60] sm:$0xff] %v4542_v13  ;;  %v4539_v29 = vcombine.low %v3088_v39, %v3090_v10  ;;  %v6570_v51 = vpop.f32.mrb[104].mxu0  ;;  %v3598_v37 = vunpack.c.l.bf16 %v3090_v10  ;;  %v5436_v47 = vld [vmem:[%s6114_s22 + $0xc8] sm:$0xff]  ;;  %v5438_v35 = vld [vmem:[%s6114_s22 + $0xd8] sm:$0xff] }
 0x336   : > { %v6558_v11 = vpop.eup %5213  ;;  %v3853_v25 = vmul.f32 %v5433_v14, %v3725_v41  ;;  %v3861_v2 = vmul.f32 %v5434_v18, %v3733_v12  ;;  %v4543_v52 = vcombine.high %v3088_v39, %v3090_v10  ;;  %v3724_v31 = vmul.f32 %v3596_v21, %v6357_v28  ;;  %v6576_v27 = vpop.f32.mrb[105].mxu1 }
 0x337   : > { %3979 = vst [vmem:[%s6518_s23 + $0x80] sm:$0xff] %v3851_v54  ;;  %3987 = vst [vmem:[%s6518_s23 + $0xc0] sm:$0xff] %v3859_v6  ;;  %v3732_v23 = vmul.f32 %v3604_v22, %v6357_v28  ;;  %v3606_v42 = vunpack.c.h.bf16 %v3090_v10  ;;  %v6578_v46 = vpop.f32.mrb[105].mxu0  ;;  %v3020_v39 = vadd.bf16 1065369472, %v6494_v33  ;;  %v3726_v19 = vmul.f32 %v3598_v37, %v6357_v28  ;;  %v6593_v1 = vpop.f32.mrb[106].mxu1 }
 0x338   : > { %3981 = vst [vmem:[%s6518_s23 + $0x90] sm:$0xff] %v3853_v25  ;;  %3989 = vst [vmem:[%s6518_s23 + $0xd0] sm:$0xff] %v3861_v2  ;;  %v3022_v57 = vadd.bf16 1065369472, %v6498_v38  ;;  %v3027_v53 = vadd.bf16 1065369472, %v6544_v48  ;;  %v3852_v3 = vmul.f32 %v5435_v61, %v3724_v31  ;;  %v2715_v41 = vpack.c.bf16 %v6480_v55, %v6471_v43 }
 0x339   : > { %3524 = vst [vmem:[%s6504_s12 + $0x48] sm:$0xff] %v4539_v29  ;;  %3528 = vst [vmem:[%s6504_s12 + $0x68] sm:$0xff] %v4543_v52  ;;  %v3860_v10 = vmul.f32 %v5436_v47, %v3732_v23  ;;  %v3734_v8 = vmul.f32 %v3606_v42, %v6357_v28  ;;  %v6595_v59 = vpop.f32.mrb[106].mxu0  ;;  %v3029_v33 = vadd.bf16 1065369472, %v6548_v56  ;;  %v3854_v34 = vmul.f32 %v5437_v5, %v3726_v19  ;;  %v6608_v4 = vpop.f32.mrb[107].mxu1 }
 0x33a   : > { %v3028_v38 = vadd.bf16 1065369472, %v6554_v36  ;;  %v3030_v48 = vadd.bf16 1065369472, %v6558_v11  ;;  %3980 = vst [vmem:[%s6518_s23 + $0x88] sm:$0xff] %v3852_v3  ;;  %5219 = vrcp.bf16 %v3020_v39  ;;  %v6610_v40 = vpop.f32.mrb[107].mxu0  ;;  %v2717_v56 = vpack.c.bf16 %v6482_v63, %v6473_v44 }
 0x33b   : > { %3988 = vst [vmem:[%s6518_s23 + $0xc8] sm:$0xff] %v3860_v10  ;;  %v3862_v58 = vmul.f32 %v5438_v35, %v3734_v8  ;;  %5221 = vrcp.bf16 %v3022_v57  ;;  %v2716_v36 = vpack.c.bf16 %v6484_v62, %v6476_v0  ;;  %v2718_v12 = vpack.c.bf16 %v6486_v49, %v6478_v50  ;;  %3982 = vst [vmem:[%s6518_s23 + $0x98] sm:$0xff] %v3854_v34  ;;  %v5216_v54 = vpop.eup %5215  ;;  %v5445_v29 = vld [vmem:[%s6114_s22 + $0x118] sm:$0xff]  ;;  %v5447_v25 = vld [vmem:[%s6114_s22 + $0x180] sm:$0xff] }
 0x33c   : > { %5223 = vrcp.bf16 %v3027_v53  ;;  %v4498_v24 = vmul.bf16 3216621497, %v2715_v41  ;;  %v2723_v43 = vpack.c.bf16 %v6534_v30, %v6512_v15  ;;  %v2725_v55 = vpack.c.bf16 %v6536_v32, %v6514_v7  ;;  %v6626_v62 = vpop.f32.mrb[108].mxu1  ;;  %v6628_v50 = vpop.f32.mrb[108].mxu0 }
 0x33d   : > { %3990 = vst [vmem:[%s6518_s23 + $0xd8] sm:$0xff] %v3862_v58  ;;  %5225 = vrcp.bf16 %v3029_v33  ;;  %v4500_v13 = vmul.bf16 3216621497, %v2717_v56  ;;  %v4499_v44 = vmul.bf16 3216621497, %v2716_v36  ;;  %v2724_v0 = vpack.c.bf16 %v6540_v9, %v6525_v45  ;;  %v6636_v30 = vpop.f32.mrb[109].mxu1  ;;  %v5218_v2 = vpop.eup %5217 }
 0x33e   : > { %5227 = vrcp.bf16 %v3028_v38  ;;  %v4501_v63 = vmul.bf16 3216621497, %v2718_v12  ;;  %v2726_v49 = vpack.c.bf16 %v6542_v60, %v6527_v26  ;;  %v6638_v32 = vpop.f32.mrb[109].mxu0  ;;  %v4506_v45 = vmul.bf16 3216621497, %v2723_v43  ;;  %v6644_v16 = vpop.f32.mrb[110].mxu1 }
 0x33f   : > { %5229 = vrcp.bf16 %v3030_v48  ;;  %7653 = vst [vmem:[#allocation21_spill] sm:$0xff] %v6638_v32  ;;  %v6646_v26 = vpop.f32.mrb[110].mxu0  ;;  %v4508_v60 = vmul.bf16 3216621497, %v2725_v55  ;;  %v4507_v20 = vmul.bf16 3216621497, %v2724_v0 }
 0x340   : > { %5231 = vpow.bf16 %v4498_v24  ;;  %v6650_v21 = vpop.f32.mrb[111].mxu1  ;;  %v6652_v22 = vpop.f32.mrb[111].mxu0  ;;  %v3100_v14 = vmul.bf16 1065369472, %v5216_v54  ;;  %v6660_v37 = vmul.bf16 1065369472, %v5218_v2 }
 0x341   : > { %5233 = vpow.bf16 %v4500_v13  ;;  %v6666_v61 = vmul.bf16 3216621497, %v2726_v49  ;;  %v5439_v12 = vld [vmem:[%s6114_s22 + $0x100] sm:$0xff]  ;;  %v5441_v2 = vld [vmem:[%s6114_s22 + $0x110] sm:$0xff] }
 0x342   : > { %5235 = vpow.bf16 %v4499_v44  ;;  %v3611_v31 = vunpack.c.l.bf16 %v3100_v14  ;;  %v3619_v23 = vunpack.c.h.bf16 %v3100_v14  ;;  %v3613_v19 = vunpack.c.l.bf16 %v6660_v37  ;;  %v5440_v43 = vld [vmem:[%s6114_s22 + $0x140] sm:$0xff]  ;;  %v5450_v9 = vld [vmem:[%s6114_s22 + $0x1d0] sm:$0xff] }
 0x343   : > { %5237 = vpow.bf16 %v4501_v63  ;;  %v3621_v8 = vunpack.c.h.bf16 %v6660_v37 }
 0x344   : > { %5239 = vpow.bf16 %v4506_v45  ;;  %v6662_v42 = vpop.f32.mrb[112].mxu1  ;;  %v6664_v39 = vpop.f32.mrb[112].mxu0  ;;  %v3739_v47 = vmul.f32 %v3611_v31, %v6357_v28  ;;  %v3747_v10 = vmul.f32 %v3619_v23, %v6357_v28  ;;  %v3741_v13 = vmul.f32 %v3613_v19, %v6357_v28  ;;  %v5442_v31 = vld [vmem:[%s6114_s22 + $0x150] sm:$0xff]  ;;  %v5443_v19 = vld [vmem:[%s6114_s22 + $0x108] sm:$0xff] }
 0x345   : > { %v5220_v52 = vpop.eup %5219  ;;  %5241 = vpow.bf16 %v4508_v60  ;;  %v6672_v33 = vpop.f32.mrb[113].mxu1  ;;  %v3749_v44 = vmul.f32 %v3621_v8, %v6357_v28 }
 0x346   : > { %v5222_v57 = vpop.eup %5221  ;;  %v3102_v53 = vmul.bf16 1065369472, %v5220_v52  ;;  %5243 = vpow.bf16 %v4507_v20  ;;  %v6674_v38 = vpop.f32.mrb[113].mxu0  ;;  %v3867_v24 = vmul.f32 %v5439_v12, %v3739_v47  ;;  %v3875_v55 = vmul.f32 %v5440_v43, %v3747_v10 }
 0x347   : > { %v5224_v3 = vpop.eup %5223  ;;  %v6676_v41 = vpop.f32.mrb[114].mxu1  ;;  %v3106_v54 = vmul.bf16 1065369472, %v5222_v57  ;;  %v3869_v52 = vmul.f32 %v5441_v2, %v3741_v13  ;;  %v3877_v23 = vmul.f32 %v5442_v31, %v3749_v44  ;;  %v5444_v57 = vld [vmem:[%s6114_s22 + $0x148] sm:$0xff]  ;;  %5245 = vpow.bf16 %v6666_v61 }
 0x348   : > { %v5226_v48 = vpop.eup %5225  ;;  %v4546_v5 = vcombine.low %v3100_v14, %v3102_v53  ;;  %v4550_v34 = vcombine.high %v3100_v14, %v3102_v53  ;;  %v3612_v35 = vunpack.c.l.bf16 %v3102_v53  ;;  %v3620_v58 = vunpack.c.h.bf16 %v3102_v53  ;;  %v6678_v56 = vpop.f32.mrb[114].mxu0  ;;  %3995 = vst [vmem:[%s6518_s23 + $0x100] sm:$0xff] %v3867_v24  ;;  %4003 = vst [vmem:[%s6518_s23 + $0x140] sm:$0xff] %v3875_v55 }
 0x349   : > { %v5228_v36 = vpop.eup %5227  ;;  %v6684_v63 = vpop.f32.mrb[115].mxu1  ;;  %v3116_v20 = vmul.bf16 1065369472, %v5224_v3  ;;  %v6700_v53 = vmul.bf16 1065369472, %v5226_v48  ;;  %3997 = vst [vmem:[%s6518_s23 + $0x110] sm:$0xff] %v3869_v52  ;;  %v3614_v48 = vunpack.c.l.bf16 %v3106_v54 }
 0x34a   : > { %v6686_v0 = vpop.f32.mrb[115].mxu0  ;;  %v6688_v49 = vpop.eup %5229  ;;  %3531 = vst [vmem:[%s6504_s12 + $0x80] sm:$0xff] %v4546_v5  ;;  %3535 = vst [vmem:[%s6504_s12 + $0xa0] sm:$0xff] %v4550_v34  ;;  %v3740_v45 = vmul.f32 %v3612_v35, %v6357_v28  ;;  %v3748_v60 = vmul.f32 %v3620_v58, %v6357_v28  ;;  %v3118_v47 = vmul.bf16 1065369472, %v5228_v36  ;;  %v4547_v5 = vcombine.low %v6660_v37, %v3106_v54 }
 0x34b   : > { %v6694_v14 = vpop.eup %5231  ;;  %v4551_v34 = vcombine.high %v6660_v37, %v3106_v54  ;;  %4005 = vst [vmem:[%s6518_s23 + $0x150] sm:$0xff] %v3877_v23  ;;  %v3622_v58 = vunpack.c.h.bf16 %v3106_v54  ;;  %v3627_v36 = vunpack.c.l.bf16 %v3116_v20  ;;  %v3635_v12 = vunpack.c.h.bf16 %v3116_v20 }
 0x34c   : > { %v6702_v10 = vpop.eup %5233  ;;  %v3868_v8 = vmul.f32 %v5443_v19, %v3740_v45  ;;  %v3876_v3 = vmul.f32 %v5444_v57, %v3748_v60  ;;  %v6712_v24 = vpop.f32.mrb[116].mxu1  ;;  %3532 = vst [vmem:[%s6504_s12 + $0x88] sm:$0xff] %v4547_v5  ;;  %v3629_v37 = vunpack.c.l.bf16 %v6700_v53  ;;  %v3637_v13 = vunpack.c.h.bf16 %v6700_v53 }
 0x34d   : > { %v6708_v35 = vpop.eup %5235  ;;  %v6714_v43 = vpop.f32.mrb[116].mxu0  ;;  %3536 = vst [vmem:[%s6504_s12 + $0xa8] sm:$0xff] %v4551_v34  ;;  %v4554_v44 = vcombine.low %v3116_v20, %v3118_v47  ;;  %v4558_v45 = vcombine.high %v3116_v20, %v3118_v47  ;;  %v3742_v52 = vmul.f32 %v3614_v48, %v6357_v28  ;;  %v3750_v31 = vmul.f32 %v3622_v58, %v6357_v28 }
 0x34e   : > { %v6716_v55 = vpop.eup %5237  ;;  %3996 = vst [vmem:[%s6518_s23 + $0x108] sm:$0xff] %v3868_v8  ;;  %4004 = vst [vmem:[%s6518_s23 + $0x148] sm:$0xff] %v3876_v3  ;;  %v6724_v60 = vpop.f32.mrb[117].mxu1  ;;  %v3755_v23 = vmul.f32 %v3627_v36, %v6357_v28  ;;  %v3763_v19 = vmul.f32 %v3635_v12, %v6357_v28  ;;  %v3757_v3 = vmul.f32 %v3629_v37, %v6357_v28  ;;  %v3628_v34 = vunpack.c.l.bf16 %v3118_v47  ;;  %v5446_v37 = vld [vmem:[%s6114_s22 + $0x158] sm:$0xff] }
 0x34f   : > { %v6726_v54 = vpop.f32.mrb[117].mxu0  ;;  %v6728_v2 = vpop.eup %5239  ;;  %v3765_v5 = vmul.f32 %v3637_v13, %v6357_v28  ;;  %3539 = vst [vmem:[%s6504_s12 + $0xc0] sm:$0xff] %v4554_v44  ;;  %3543 = vst [vmem:[%s6504_s12 + $0xe0] sm:$0xff] %v4558_v45  ;;  %v3636_v48 = vunpack.c.h.bf16 %v3118_v47  ;;  %v3870_v18 = vmul.f32 %v5445_v29, %v3742_v52  ;;  %v3878_v13 = vmul.f32 %v5446_v37, %v3750_v31  ;;  %v5448_v45 = vld [vmem:[%s6114_s22 + $0x1c0] sm:$0xff]  ;;  %v5449_v47 = vld [vmem:[%s6114_s22 + $0x190] sm:$0xff] }
 0x350   : > { %v6734_v8 = vpop.f32.mrb[118].mxu1  ;;  %v6736_v20 = vpop.f32.mrb[118].mxu0  ;;  %v3883_v44 = vmul.f32 %v5447_v25, %v3755_v23  ;;  %v3891_v6 = vmul.f32 %v5448_v45, %v3763_v19  ;;  %v3885_v11 = vmul.f32 %v5449_v47, %v3757_v3  ;;  %v3756_v15 = vmul.f32 %v3628_v34, %v6357_v28  ;;  %v5452_v23 = vld [vmem:[%s6114_s22 + $0x1c8] sm:$0xff] }
 0x351   : > { %v6738_v57 = vpop.eup %5241  ;;  %v6744_v58 = vpop.f32.mrb[119].mxu1  ;;  %v3893_v7 = vmul.f32 %v5450_v9, %v3765_v5  ;;  %v3764_v32 = vmul.f32 %v3636_v48, %v6357_v28  ;;  %3998 = vst [vmem:[%s6518_s23 + $0x118] sm:$0xff] %v3870_v18  ;;  %4006 = vst [vmem:[%s6518_s23 + $0x158] sm:$0xff] %v3878_v13  ;;  %v3122_v25 = vmul.bf16 1065369472, %v6688_v49  ;;  %v5451_v9 = vld [vmem:[%s6114_s22 + $0x188] sm:$0xff] }
 0x352   : > { %v6746_v36 = vpop.f32.mrb[119].mxu0  ;;  %v6748_v12 = vpop.eup %5243  ;;  %4011 = vst [vmem:[%s6518_s23 + $0x180] sm:$0xff] %v3883_v44  ;;  %4019 = vst [vmem:[%s6518_s23 + $0x1c0] sm:$0xff] %v3891_v6  ;;  %v3035_v29 = vadd.bf16 1065369472, %v6694_v14  ;;  %v3884_v31 = vmul.f32 %v5451_v9, %v3756_v15  ;;  %v5454_v44 = vld [vmem:[%s6114_s22 + $0x1d8] sm:$0xff] }
 0x353   : > { %v3037_v52 = vadd.bf16 1065369472, %v6702_v10  ;;  %4013 = vst [vmem:[%s6518_s23 + $0x190] sm:$0xff] %v3885_v11  ;;  %4021 = vst [vmem:[%s6518_s23 + $0x1d0] sm:$0xff] %v3893_v7  ;;  %v3892_v18 = vmul.f32 %v5452_v23, %v3764_v32  ;;  %v3036_v6 = vadd.bf16 1065369472, %v6708_v35  ;;  %v4555_v14 = vcombine.low %v6700_v53, %v3122_v25 }
 0x354   : > { %v3038_v49 = vadd.bf16 1065369472, %v6716_v55  ;;  %v4559_v10 = vcombine.high %v6700_v53, %v3122_v25  ;;  %v3630_v19 = vunpack.c.l.bf16 %v3122_v25  ;;  %v3638_v3 = vunpack.c.h.bf16 %v3122_v25  ;;  %v6774_v61 = vpop.f32.mrb[120].mxu1  ;;  %v6776_v11 = vpop.f32.mrb[120].mxu0  ;;  %4012 = vst [vmem:[%s6518_s23 + $0x188] sm:$0xff] %v3884_v31 }
 0x355   : > { %7654 = vst [vmem:[#allocation22_spill] sm:$0xff] %v6776_v11  ;;  %4020 = vst [vmem:[%s6518_s23 + $0x1c8] sm:$0xff] %v3892_v18  ;;  %5247 = vrcp.bf16 %v3035_v29  ;;  %v3043_v15 = vadd.bf16 1065369472, %v6728_v2  ;;  %v3045_v7 = vadd.bf16 1065369472, %v6738_v57  ;;  %v7655_v32 = vpack.c.bf16 %v6593_v1, %v6568_v17 }
 0x356   : > { %3540 = vst [vmem:[%s6504_s12 + $0xc8] sm:$0xff] %v4555_v14  ;;  %3544 = vst [vmem:[%s6504_s12 + $0xe8] sm:$0xff] %v4559_v10  ;;  %v3758_v53 = vmul.f32 %v3630_v19, %v6357_v28  ;;  %v3766_v55 = vmul.f32 %v3638_v3, %v6357_v28  ;;  %5249 = vrcp.bf16 %v3037_v52  ;;  %v3044_v5 = vadd.bf16 1065369472, %v6748_v12  ;;  %v6790_v34 = vpop.f32.mrb[121].mxu1  ;;  %v6792_v2 = vpop.f32.mrb[121].mxu0 }
 0x357   : > { %v4514_v35 = vmul.bf16 3216621497, %v7655_v32  ;;  %7656 = vst [vmem:[#allocation23_spill] sm:$0xff] %v6790_v34  ;;  %7657 = vst [vmem:[#allocation24_spill] sm:$0xff] %v6792_v2  ;;  %5251 = vrcp.bf16 %v3036_v6  ;;  %v6800_v48 = vpop.f32.mrb[122].mxu1  ;;  %v6802_v37 = vpop.f32.mrb[122].mxu0  ;;  %v7660_v52 = vpack.c.bf16 %v6595_v59, %v6570_v51  ;;  %v7661_v31 = vpack.c.bf16 %v6608_v4, %v6576_v27 }
 0x358   : > { %v5453_v12 = vld [vmem:[%s6114_s22 + $0x198] sm:$0xff]  ;;  %v3894_v45 = vmul.f32 %v5454_v44, %v3766_v55  ;;  %5253 = vrcp.bf16 %v3038_v49  ;;  %v6808_v25 = vpop.f32.mrb[123].mxu1  ;;  %v6810_v29 = vpop.f32.mrb[123].mxu0  ;;  %v7662_v18 = vpack.c.bf16 %v6610_v40, %v6578_v46  ;;  %v7665_v19 = vpack.c.bf16 %v6644_v16, %v6626_v62  ;;  %v5456_v14 = vld [vmem:[%s6114_s22 + $0x240] sm:$0xff]  ;;  %v5457_v1 = vld [vmem:[%s6114_s22 + $0x210] sm:$0xff] }
 0x359   : > { %v3886_v13 = vmul.f32 %v5453_v12, %v3758_v53  ;;  %7658 = vst [vmem:[#allocation25_spill] sm:$0xff] %v6808_v25  ;;  %7659 = vst [vmem:[#allocation26_spill] sm:$0xff] %v6810_v29  ;;  %5255 = vrcp.bf16 %v3043_v15  ;;  %v4516_v9 = vmul.bf16 3216621497, %v7660_v52  ;;  %v4515_v23 = vmul.bf16 3216621497, %v7661_v31  ;;  %v5246_v10 = vpop.eup %5245 }
 0x35a   : > { %4022 = vst [vmem:[%s6518_s23 + $0x1d8] sm:$0xff] %v3894_v45  ;;  %5257 = vrcp.bf16 %v3045_v7  ;;  %v4517_v6 = vmul.bf16 3216621497, %v7662_v18  ;;  %v4522_v3 = vmul.bf16 3216621497, %v7665_v19  ;;  %v7666_v7 = vpack.c.bf16 %v6646_v26, %v6628_v50  ;;  %v7671_v26 = vld [vmem:[#allocation21_spill] sm:$0xff] }
 0x35b   : > { %4014 = vst [vmem:[%s6518_s23 + $0x198] sm:$0xff] %v3886_v13  ;;  %5259 = vrcp.bf16 %v3044_v5  ;;  %v3046_v15 = vadd.bf16 1065369472, %v5246_v10  ;;  %v7668_v5 = vpack.c.bf16 %v6650_v21, %v6636_v30  ;;  %v7672_v44 = vpack.c.bf16 %v6652_v22, %v7671_v26  ;;  %v5463_v2 = vld [vmem:[%s6114_s22 + $0x280] sm:$0xff]  ;;  %v5465_v34 = vld [vmem:[%s6114_s22 + $0x290] sm:$0xff] }
 0x35c   : > { %5261 = vpow.bf16 %v4514_v35  ;;  %v6835_v4 = vpop.f32.mrb[124].mxu1  ;;  %v6837_v40 = vpop.f32.mrb[124].mxu0  ;;  %v4524_v32 = vmul.bf16 3216621497, %v7666_v7  ;;  %v5464_v29 = vld [vmem:[%s6114_s22 + $0x2c0] sm:$0xff] }
 0x35d   : > { %7663 = vst [vmem:[#allocation27_spill] sm:$0xff] %v6835_v4  ;;  %7664 = vst [vmem:[#allocation28_spill] sm:$0xff] %v6837_v40  ;;  %5263 = vpow.bf16 %v4516_v9  ;;  %v6847_v53 = vpop.f32.mrb[125].mxu1  ;;  %v6849_v55 = vpop.f32.mrb[125].mxu0  ;;  %v4523_v12 = vmul.bf16 3216621497, %v7668_v5 }
 0x35e   : > { %5265 = vpow.bf16 %v4515_v23  ;;  %7667 = vst [vmem:[#allocation29_spill] sm:$0xff] %v6847_v53  ;;  %v6856_v16 = vpop.f32.mrb[126].mxu1  ;;  %v6858_v13 = vpop.f32.mrb[126].mxu0  ;;  %v4525_v45 = vmul.bf16 3216621497, %v7672_v44 }
 0x35f   : > { %5267 = vpow.bf16 %v4517_v6  ;;  %7669 = vst [vmem:[#allocation30_spill] sm:$0xff] %v6856_v16  ;;  %7670 = vst [vmem:[#allocation31_spill] sm:$0xff] %v6858_v13  ;;  %v6867_v21 = vpop.f32.mrb[127].mxu1  ;;  %v6869_v9 = vpop.f32.mrb[127].mxu0 }
 0x360   : > { %v5248_v50 = vpop.eup %5247  ;;  %5269 = vrcp.bf16 %v3046_v15  ;;  %7673 = vst [vmem:[#allocation21_spill] sm:$0xff] %v6867_v21 }
 0x361   : > { %v5250_v31 = vpop.eup %5249  ;;  %v3132_v23 = vmul.bf16 1065369472, %v5248_v50  ;;  %5271 = vpow.bf16 %v4522_v3 }
 0x362   : > { %v5252_v6 = vpop.eup %5251  ;;  %v3136_v10 = vmul.bf16 1065369472, %v5250_v31  ;;  %5273 = vpow.bf16 %v4524_v32 }
 0x363   : > { %v5254_v22 = vpop.eup %5253  ;;  %v3643_v19 = vunpack.c.l.bf16 %v3132_v23  ;;  %v3651_v15 = vunpack.c.h.bf16 %v3132_v23  ;;  %v3134_v7 = vmul.bf16 1065369472, %v5252_v6  ;;  %5275 = vpow.bf16 %v4523_v12 }
 0x364   : > { %v5256_v5 = vpop.eup %5255  ;;  %v3645_v26 = vunpack.c.l.bf16 %v3136_v10  ;;  %v3653_v44 = vunpack.c.h.bf16 %v3136_v10  ;;  %v3138_v30 = vmul.bf16 1065369472, %v5254_v22  ;;  %5277 = vpow.bf16 %v4525_v45  ;;  %v6873_v52 = vpop.f32.mrb[128].mxu1 }
 0x365   : > { %v6875_v50 = vpop.f32.mrb[128].mxu0  ;;  %v5258_v3 = vpop.eup %5257  ;;  %v3771_v18 = vmul.f32 %v3643_v19, %v6357_v28  ;;  %v3779_v32 = vmul.f32 %v3651_v15, %v6357_v28  ;;  %v4562_v31 = vcombine.low %v3132_v23, %v3134_v7  ;;  %v4566_v6 = vcombine.high %v3132_v23, %v3134_v7  ;;  %v5455_v23 = vld [vmem:[%s6114_s22 + $0x200] sm:$0xff] }
 0x366   : > { %v6879_v12 = vpop.f32.mrb[129].mxu1  ;;  %v6881_v62 = vpop.f32.mrb[129].mxu0  ;;  %v3773_v22 = vmul.f32 %v3645_v26, %v6357_v28  ;;  %v3781_v35 = vmul.f32 %v3653_v44, %v6357_v28  ;;  %v3644_v46 = vunpack.c.l.bf16 %v3134_v7  ;;  %v3652_v59 = vunpack.c.h.bf16 %v3134_v7 }
 0x367   : > { %v5260_v45 = vpop.eup %5259  ;;  %v6885_v19 = vpop.f32.mrb[130].mxu1  ;;  %v3899_v51 = vmul.f32 %v5455_v23, %v3771_v18  ;;  %v3907_v49 = vmul.f32 %v5456_v14, %v3779_v32  ;;  %3547 = vst [vmem:[%s6504_s12 + $0x100] sm:$0xff] %v4562_v31  ;;  %3551 = vst [vmem:[%s6504_s12 + $0x120] sm:$0xff] %v4566_v6  ;;  %v4563_v26 = vcombine.low %v3136_v10, %v3138_v30  ;;  %v5458_v18 = vld [vmem:[%s6114_s22 + $0x250] sm:$0xff]  ;;  %v3654_v23 = vunpack.c.h.bf16 %v3138_v30 }
 0x368   : > { %v6887_v15 = vpop.f32.mrb[130].mxu0  ;;  %v6889_v27 = vpop.eup %5261  ;;  %v4567_v44 = vcombine.high %v3136_v10, %v3138_v30  ;;  %v3901_v17 = vmul.f32 %v5457_v1, %v3773_v22  ;;  %v3909_v14 = vmul.f32 %v5458_v18, %v3781_v35  ;;  %v3772_v32 = vmul.f32 %v3644_v46, %v6357_v28  ;;  %v5459_v46 = vld [vmem:[%s6114_s22 + $0x208] sm:$0xff] }
 0x369   : > { %v6895_v7 = vpop.f32.mrb[131].mxu1  ;;  %v6897_v47 = vpop.f32.mrb[131].mxu0  ;;  %v3780_v31 = vmul.f32 %v3652_v59, %v6357_v28  ;;  %4027 = vst [vmem:[%s6518_s23 + $0x200] sm:$0xff] %v3899_v51  ;;  %4035 = vst [vmem:[%s6518_s23 + $0x240] sm:$0xff] %v3907_v49  ;;  %v3646_v10 = vunpack.c.l.bf16 %v3138_v30  ;;  %v3148_v53 = vmul.bf16 1065369472, %v5256_v5  ;;  %v3782_v5 = vmul.f32 %v3654_v23, %v6357_v28 }
 0x36a   : > { %v6899_v57 = vpop.eup %5263  ;;  %3548 = vst [vmem:[%s6504_s12 + $0x108] sm:$0xff] %v4563_v26  ;;  %3552 = vst [vmem:[%s6504_s12 + $0x128] sm:$0xff] %v4567_v44  ;;  %v6911_v21 = vmul.bf16 1065369472, %v5258_v3  ;;  %v3900_v35 = vmul.f32 %v5459_v46, %v3772_v32  ;;  %v5460_v59 = vld [vmem:[%s6114_s22 + $0x248] sm:$0xff]  ;;  %v5461_v23 = vld [vmem:[%s6114_s22 + $0x218] sm:$0xff] }
 0x36b   : > { %v6905_v6 = vpop.eup %5265  ;;  %4029 = vst [vmem:[%s6518_s23 + $0x210] sm:$0xff] %v3901_v17  ;;  %4037 = vst [vmem:[%s6518_s23 + $0x250] sm:$0xff] %v3909_v14  ;;  %v3908_v22 = vmul.f32 %v5460_v59, %v3780_v31  ;;  %v3150_v18 = vmul.bf16 1065369472, %v5260_v45  ;;  %v3051_v49 = vadd.bf16 1065369472, %v6889_v27  ;;  %v3774_v30 = vmul.f32 %v3646_v10, %v6357_v28 }
 0x36c   : > { %v6913_v1 = vpop.eup %5267  ;;  %v3659_v3 = vunpack.c.l.bf16 %v3148_v53  ;;  %v3667_v26 = vunpack.c.h.bf16 %v3148_v53  ;;  %4028 = vst [vmem:[%s6518_s23 + $0x208] sm:$0xff] %v3900_v35  ;;  %v3661_v17 = vunpack.c.l.bf16 %v6911_v21  ;;  %v3669_v14 = vunpack.c.h.bf16 %v6911_v21  ;;  %v6928_v32 = vpop.f32.mrb[132].mxu1  ;;  %v5462_v59 = vld [vmem:[%s6114_s22 + $0x258] sm:$0xff] }
 0x36d   : > { %v5270_v51 = vpop.eup %5269  ;;  %4036 = vst [vmem:[%s6518_s23 + $0x248] sm:$0xff] %v3908_v22  ;;  %v4570_v45 = vcombine.low %v3148_v53, %v3150_v18  ;;  %v4574_v27 = vcombine.high %v3148_v53, %v3150_v18  ;;  %v6930_v31 = vpop.f32.mrb[132].mxu0  ;;  %v3902_v46 = vmul.f32 %v5461_v23, %v3774_v30  ;;  %v3910_v35 = vmul.f32 %v5462_v59, %v3782_v5 }
 0x36e   : > { %v6922_v44 = vpop.eup %5271  ;;  %v3787_v22 = vmul.f32 %v3659_v3, %v6357_v28  ;;  %v3795_v40 = vmul.f32 %v3667_v26, %v6357_v28  ;;  %v6938_v13 = vpop.f32.mrb[133].mxu1  ;;  %v3789_v16 = vmul.f32 %v3661_v17, %v6357_v28  ;;  %v3797_v30 = vmul.f32 %v3669_v14, %v6357_v28 }
 0x36f   : > { %v6932_v10 = vpop.eup %5273  ;;  %v6940_v53 = vpop.f32.mrb[133].mxu0  ;;  %3555 = vst [vmem:[%s6504_s12 + $0x140] sm:$0xff] %v4570_v45  ;;  %3559 = vst [vmem:[%s6504_s12 + $0x160] sm:$0xff] %v4574_v27  ;;  %v3660_v5 = vunpack.c.l.bf16 %v3150_v18  ;;  %v3668_v23 = vunpack.c.h.bf16 %v3150_v18  ;;  %v3154_v45 = vmul.bf16 1065369472, %v5270_v51  ;;  %5279 = vrcp.bf16 %v3051_v49 }
 0x370   : > { %v6942_v4 = vpop.eup %5275  ;;  %v6948_v3 = vpop.f32.mrb[134].mxu1  ;;  %4030 = vst [vmem:[%s6518_s23 + $0x218] sm:$0xff] %v3902_v46  ;;  %4038 = vst [vmem:[%s6518_s23 + $0x258] sm:$0xff] %v3910_v35  ;;  %v3915_v17 = vmul.f32 %v5463_v2, %v3787_v22  ;;  %v3923_v14 = vmul.f32 %v5464_v29, %v3795_v40  ;;  %v3917_v25 = vmul.f32 %v5465_v34, %v3789_v16  ;;  %v5466_v46 = vld [vmem:[%s6114_s22 + $0x2d0] sm:$0xff]  ;;  %v5467_v34 = vld [vmem:[%s6114_s22 + $0x288] sm:$0xff] }
 0x371   : > { %v6950_v26 = vpop.f32.mrb[134].mxu0  ;;  %v6952_v59 = vpop.eup %5277  ;;  %v3925_v11 = vmul.f32 %v5466_v46, %v3797_v30  ;;  %v3788_v35 = vmul.f32 %v3660_v5, %v6357_v28  ;;  %v3796_v2 = vmul.f32 %v3668_v23, %v6357_v28  ;;  %v4571_v29 = vcombine.low %v6911_v21, %v3154_v45  ;;  %v5468_v22 = vld [vmem:[%s6114_s22 + $0x2c8] sm:$0xff]  ;;  %v5469_v46 = vld [vmem:[%s6114_s22 + $0x298] sm:$0xff] }
 0x372   : > { %v6958_v18 = vpop.f32.mrb[135].mxu1  ;;  %v6960_v27 = vpop.f32.mrb[135].mxu0  ;;  %4043 = vst [vmem:[%s6518_s23 + $0x280] sm:$0xff] %v3915_v17  ;;  %4051 = vst [vmem:[%s6518_s23 + $0x2c0] sm:$0xff] %v3923_v14  ;;  %v4575_v40 = vcombine.high %v6911_v21, %v3154_v45  ;;  %v3662_v49 = vunpack.c.l.bf16 %v3154_v45  ;;  %v3670_v51 = vunpack.c.h.bf16 %v3154_v45  ;;  %v3053_v5 = vadd.bf16 1065369472, %v6899_v57 }
 0x373   : > { %4045 = vst [vmem:[%s6518_s23 + $0x290] sm:$0xff] %v3917_v25  ;;  %4053 = vst [vmem:[%s6518_s23 + $0x2d0] sm:$0xff] %v3925_v11  ;;  %v3916_v16 = vmul.f32 %v5467_v34, %v3788_v35  ;;  %v3924_v30 = vmul.f32 %v5468_v22, %v3796_v2  ;;  %v3052_v23 = vadd.bf16 1065369472, %v6905_v6  ;;  %v3054_v14 = vadd.bf16 1065369472, %v6913_v1 }
 0x374   : > { %3556 = vst [vmem:[%s6504_s12 + $0x148] sm:$0xff] %v4571_v29  ;;  %3560 = vst [vmem:[%s6504_s12 + $0x168] sm:$0xff] %v4575_v40  ;;  %v3790_v21 = vmul.f32 %v3662_v49, %v6357_v28  ;;  %v3798_v17 = vmul.f32 %v3670_v51, %v6357_v28  ;;  %v3059_v11 = vadd.bf16 1065369472, %v6922_v44  ;;  %5281 = vrcp.bf16 %v3053_v5  ;;  %v5470_v2 = vld [vmem:[%s6114_s22 + $0x2d8] sm:$0xff]  ;;  %v6992_v44 = vpop.f32.mrb[136].mxu1 }
 0x375   : > { %4044 = vst [vmem:[%s6518_s23 + $0x288] sm:$0xff] %v3916_v16  ;;  %4052 = vst [vmem:[%s6518_s23 + $0x2c8] sm:$0xff] %v3924_v30  ;;  %v3061_v25 = vadd.bf16 1065369472, %v6932_v10  ;;  %v3060_v57 = vadd.bf16 1065369472, %v6942_v4  ;;  %v7674_v6 = vpack.c.bf16 %v6676_v41, %v6662_v42  ;;  %5283 = vrcp.bf16 %v3052_v23 }
 0x376   : > { %v3918_v35 = vmul.f32 %v5469_v46, %v3790_v21  ;;  %v3926_v29 = vmul.f32 %v5470_v2, %v3798_v17  ;;  %v3062_v1 = vadd.bf16 1065369472, %v6952_v59  ;;  %v6994_v40 = vpop.f32.mrb[136].mxu0  ;;  %5285 = vrcp.bf16 %v3054_v14  ;;  %v7002_v10 = vpop.f32.mrb[137].mxu1 }
 0x377   : > { %v4470_v45 = vmul.bf16 3216621497, %v7674_v6  ;;  %v7004_v49 = vpop.f32.mrb[137].mxu0  ;;  %5287 = vrcp.bf16 %v3059_v11  ;;  %v7014_v16 = vpop.f32.mrb[138].mxu1  ;;  %v7676_v30 = vpack.c.bf16 %v6678_v56, %v6664_v39  ;;  %v7677_v23 = vpack.c.bf16 %v6684_v63, %v6672_v33 }
 0x378   : > { %7675 = vst [vmem:[#allocation32_spill] sm:$0xff] %v7004_v49  ;;  %4046 = vst [vmem:[%s6518_s23 + $0x298] sm:$0xff] %v3918_v35  ;;  %v7016_v22 = vpop.f32.mrb[138].mxu0  ;;  %5289 = vrcp.bf16 %v3061_v25  ;;  %v7678_v17 = vpack.c.bf16 %v6686_v0, %v6674_v38  ;;  %v7679_v11 = vpack.c.bf16 %v6734_v8, %v6712_v24  ;;  %v7036_v56 = vpop.f32.mrb[139].mxu1  ;;  %v7681_v8 = vpack.c.bf16 %v6736_v20, %v6714_v43  ;;  %v5472_v20 = vld [vmem:[%s6114_s22 + $0x340] sm:$0xff] }
 0x379   : > { %4054 = vst [vmem:[%s6518_s23 + $0x2d8] sm:$0xff] %v3926_v29  ;;  %v4472_v5 = vmul.bf16 3216621497, %v7676_v30  ;;  %5291 = vrcp.bf16 %v3060_v57  ;;  %v4471_v21 = vmul.bf16 3216621497, %v7677_v23  ;;  %v7038_v63 = vpop.f32.mrb[139].mxu0  ;;  %v7682_v29 = vpack.c.bf16 %v6744_v58, %v6724_v60 }
 0x37a   : > { %v4473_v14 = vmul.bf16 3216621497, %v7678_v17  ;;  %v4478_v6 = vmul.bf16 3216621497, %v7679_v11  ;;  %v5280_v46 = vpop.eup %5279  ;;  %5293 = vrcp.bf16 %v3062_v1  ;;  %7680 = vst [vmem:[#allocation33_spill] sm:$0xff] %v7038_v63  ;;  %v7683_v23 = vpack.c.bf16 %v6746_v36, %v6726_v54  ;;  %v5482_v63 = vld [vmem:[%s6114_s22 + $0x3d0] sm:$0xff] }
 0x37b   : > { %v3164_v38 = vmul.bf16 1065369472, %v5280_v46  ;;  %5295 = vpow.bf16 %v4470_v45  ;;  %v4480_v57 = vmul.bf16 3216621497, %v7681_v8  ;;  %v4479_v1 = vmul.bf16 3216621497, %v7682_v29 }
 0x37c   : > { %5297 = vpow.bf16 %v4472_v5  ;;  %v7050_v30 = vpop.f32.mrb[140].mxu1  ;;  %v7052_v45 = vpop.f32.mrb[140].mxu0  ;;  %v4481_v5 = vmul.bf16 3216621497, %v7683_v23  ;;  %v5471_v29 = vld [vmem:[%s6114_s22 + $0x300] sm:$0xff] }
 0x37d   : > { %v3675_v35 = vunpack.c.l.bf16 %v3164_v38  ;;  %v3683_v2 = vunpack.c.h.bf16 %v3164_v38  ;;  %5299 = vpow.bf16 %v4471_v21  ;;  %v7061_v21 = vpop.f32.mrb[141].mxu1  ;;  %v7063_v60 = vpop.f32.mrb[141].mxu0 }
 0x37e   : > { %5301 = vpow.bf16 %v4473_v14  ;;  %v7067_v54 = vpop.f32.mrb[142].mxu1  ;;  %v7069_v36 = vpop.f32.mrb[142].mxu0 }
 0x37f   : > { %v5282_v58 = vpop.eup %5281  ;;  %v3803_v17 = vmul.f32 %v3675_v35, %v6357_v28  ;;  %v3811_v14 = vmul.f32 %v3683_v2, %v6357_v28  ;;  %5303 = vpow.bf16 %v4478_v6  ;;  %v7073_v35 = vpop.f32.mrb[143].mxu1 }
 0x380   : > { %v5284_v11 = vpop.eup %5283  ;;  %v3168_v46 = vmul.bf16 1065369472, %v5282_v58  ;;  %5305 = vpow.bf16 %v4480_v57  ;;  %v7075_v2 = vpop.f32.mrb[143].mxu0 }
 0x381   : > { %v5286_v8 = vpop.eup %5285  ;;  %v3931_v23 = vmul.f32 %v5471_v29, %v3803_v17  ;;  %v3939_v43 = vmul.f32 %v5472_v20, %v3811_v14  ;;  %v3166_v24 = vmul.bf16 1065369472, %v5284_v11  ;;  %5307 = vpow.bf16 %v4479_v1 }
 0x382   : > { %v5288_v6 = vpop.eup %5287  ;;  %v3677_v0 = vunpack.c.l.bf16 %v3168_v46  ;;  %v3685_v33 = vunpack.c.h.bf16 %v3168_v46  ;;  %v3170_v39 = vmul.bf16 1065369472, %v5286_v8  ;;  %5309 = vpow.bf16 %v4481_v5 }
 0x383   : > { %v5290_v57 = vpop.eup %5289  ;;  %4059 = vst [vmem:[%s6518_s23 + $0x300] sm:$0xff] %v3931_v23  ;;  %4067 = vst [vmem:[%s6518_s23 + $0x340] sm:$0xff] %v3939_v43  ;;  %v4578_v58 = vcombine.low %v3164_v38, %v3166_v24  ;;  %v4582_v17 = vcombine.high %v3164_v38, %v3166_v24  ;;  %v3676_v20 = vunpack.c.l.bf16 %v3166_v24  ;;  %v3684_v14 = vunpack.c.h.bf16 %v3166_v24 }
 0x384   : > { %v5292_v1 = vpop.eup %5291  ;;  %v3805_v11 = vmul.f32 %v3677_v0, %v6357_v28  ;;  %v3813_v29 = vmul.f32 %v3685_v33, %v6357_v28  ;;  %v4579_v25 = vcombine.low %v3168_v46, %v3170_v39  ;;  %v4583_v8 = vcombine.high %v3168_v46, %v3170_v39  ;;  %v5473_v0 = vld [vmem:[%s6114_s22 + $0x310] sm:$0xff] }
 0x385   : > { %v5294_v34 = vpop.eup %5293  ;;  %3563 = vst [vmem:[%s6504_s12 + $0x180] sm:$0xff] %v4578_v58  ;;  %3567 = vst [vmem:[%s6504_s12 + $0x1a0] sm:$0xff] %v4582_v17  ;;  %v3804_v5 = vmul.f32 %v3676_v20, %v6357_v28  ;;  %v3812_v38 = vmul.f32 %v3684_v14, %v6357_v28  ;;  %v3678_v24 = vunpack.c.l.bf16 %v3170_v39  ;;  %v3686_v43 = vunpack.c.h.bf16 %v3170_v39  ;;  %v5474_v33 = vld [vmem:[%s6114_s22 + $0x350] sm:$0xff]  ;;  %v5475_v20 = vld [vmem:[%s6114_s22 + $0x308] sm:$0xff] }
 0x386   : > { %v7085_v23 = vpop.eup %5295  ;;  %v3933_v51 = vmul.f32 %v5473_v0, %v3805_v11  ;;  %v3941_v59 = vmul.f32 %v5474_v33, %v3813_v29  ;;  %3564 = vst [vmem:[%s6504_s12 + $0x188] sm:$0xff] %v4579_v25  ;;  %3568 = vst [vmem:[%s6504_s12 + $0x1a8] sm:$0xff] %v4583_v8  ;;  %v3180_v46 = vmul.bf16 1065369472, %v5288_v6  ;;  %v7091_v58 = vmul.bf16 1065369472, %v5290_v57 }
 0x387   : > { %v7093_v17 = vpop.eup %5297  ;;  %v3932_v39 = vmul.f32 %v5475_v20, %v3804_v5  ;;  %v5476_v14 = vld [vmem:[%s6114_s22 + $0x348] sm:$0xff]  ;;  %v3806_v11 = vmul.f32 %v3678_v24, %v6357_v28  ;;  %v3814_v0 = vmul.f32 %v3686_v43, %v6357_v28  ;;  %v5477_v5 = vld [vmem:[%s6114_s22 + $0x318] sm:$0xff]  ;;  %v3182_v20 = vmul.bf16 1065369472, %v5292_v1 }
 0x388   : > { %v3940_v41 = vmul.f32 %v5476_v14, %v3812_v38  ;;  %v7099_v29 = vpop.eup %5299  ;;  %4061 = vst [vmem:[%s6518_s23 + $0x310] sm:$0xff] %v3933_v51  ;;  %4069 = vst [vmem:[%s6518_s23 + $0x350] sm:$0xff] %v3941_v59  ;;  %v3691_v25 = vunpack.c.l.bf16 %v3180_v46  ;;  %v3699_v6 = vunpack.c.h.bf16 %v3180_v46  ;;  %v3693_v57 = vunpack.c.l.bf16 %v7091_v58  ;;  %v5478_v24 = vld [vmem:[%s6114_s22 + $0x358] sm:$0xff] }
 0x389   : > { %v3701_v8 = vunpack.c.h.bf16 %v7091_v58  ;;  %v7105_v33 = vpop.eup %5301  ;;  %4060 = vst [vmem:[%s6518_s23 + $0x308] sm:$0xff] %v3932_v39  ;;  %v3934_v38 = vmul.f32 %v5477_v5, %v3806_v11  ;;  %v3942_v43 = vmul.f32 %v5478_v24, %v3814_v0  ;;  %v3186_v51 = vmul.bf16 1065369472, %v5294_v34 }
 0x38a   : > { %4068 = vst [vmem:[%s6518_s23 + $0x348] sm:$0xff] %v3940_v41  ;;  %v7111_v59 = vpop.eup %5303  ;;  %v3819_v14 = vmul.f32 %v3691_v25, %v6357_v28  ;;  %v3827_v42 = vmul.f32 %v3699_v6, %v6357_v28  ;;  %v3821_v4 = vmul.f32 %v3693_v57, %v6357_v28  ;;  %v4586_v34 = vcombine.low %v3180_v46, %v3182_v20  ;;  %v5479_v25 = vld [vmem:[%s6114_s22 + $0x380] sm:$0xff] }
 0x38b   : > { %v3829_v41 = vmul.f32 %v3701_v8, %v6357_v28  ;;  %v7117_v39 = vpop.eup %5305  ;;  %4062 = vst [vmem:[%s6518_s23 + $0x318] sm:$0xff] %v3934_v38  ;;  %4070 = vst [vmem:[%s6518_s23 + $0x358] sm:$0xff] %v3942_v43  ;;  %v4590_v1 = vcombine.high %v3180_v46, %v3182_v20  ;;  %v3692_v11 = vunpack.c.l.bf16 %v3182_v20  ;;  %v3700_v0 = vunpack.c.h.bf16 %v3182_v20  ;;  %v5480_v57 = vld [vmem:[%s6114_s22 + $0x3c0] sm:$0xff]  ;;  %v5481_v8 = vld [vmem:[%s6114_s22 + $0x390] sm:$0xff] }
 0x38c   : > { %v5308_v5 = vpop.eup %5307  ;;  %v3947_v6 = vmul.f32 %v5479_v25, %v3819_v14  ;;  %v3955_v24 = vmul.f32 %v5480_v57, %v3827_v42  ;;  %v3949_v49 = vmul.f32 %v5481_v8, %v3821_v4  ;;  %3571 = vst [vmem:[%s6504_s12 + $0x1c0] sm:$0xff] %v4586_v34  ;;  %v4587_v14 = vcombine.low %v7091_v58, %v3186_v51  ;;  %v5483_v34 = vld [vmem:[%s6114_s22 + $0x388] sm:$0xff]  ;;  %v5485_v8 = vld [vmem:[%s6114_s22 + $0x398] sm:$0xff] }
 0x38d   : > { %v3957_v38 = vmul.f32 %v5482_v63, %v3829_v41  ;;  %v5310_v43 = vpop.eup %5309  ;;  %3575 = vst [vmem:[%s6504_s12 + $0x1e0] sm:$0xff] %v4590_v1  ;;  %v3820_v46 = vmul.f32 %v3692_v11, %v6357_v28  ;;  %v3828_v20 = vmul.f32 %v3700_v0, %v6357_v28  ;;  %v4591_v25 = vcombine.high %v7091_v58, %v3186_v51  ;;  %v5484_v11 = vld [vmem:[%s6114_s22 + $0x3c8] sm:$0xff] }
 0x38e   : > { %4075 = vst [vmem:[%s6518_s23 + $0x380] sm:$0xff] %v3947_v6  ;;  %4083 = vst [vmem:[%s6518_s23 + $0x3c0] sm:$0xff] %v3955_v24  ;;  %v3694_v4 = vunpack.c.l.bf16 %v3186_v51  ;;  %v3702_v42 = vunpack.c.h.bf16 %v3186_v51  ;;  %v3007_v63 = vadd.bf16 1065369472, %v7085_v23  ;;  %v3009_v41 = vadd.bf16 1065369472, %v7093_v17 }
 0x38f   : > { %4077 = vst [vmem:[%s6518_s23 + $0x390] sm:$0xff] %v3949_v49  ;;  %4085 = vst [vmem:[%s6518_s23 + $0x3d0] sm:$0xff] %v3957_v38  ;;  %v3948_v1 = vmul.f32 %v5483_v34, %v3820_v46  ;;  %v3956_v0 = vmul.f32 %v5484_v11, %v3828_v20  ;;  %v3008_v58 = vadd.bf16 1065369472, %v7099_v29  ;;  %v3010_v49 = vadd.bf16 1065369472, %v7105_v33 }
 0x390   : > { %3572 = vst [vmem:[%s6504_s12 + $0x1c8] sm:$0xff] %v4587_v14  ;;  %3576 = vst [vmem:[%s6504_s12 + $0x1e8] sm:$0xff] %v4591_v25  ;;  %v3822_v6 = vmul.f32 %v3694_v4, %v6357_v28  ;;  %v3830_v51 = vmul.f32 %v3702_v42, %v6357_v28  ;;  %5311 = vrcp.bf16 %v3007_v63  ;;  %v3015_v23 = vadd.bf16 1065369472, %v7111_v59  ;;  %v5486_v38 = vld [vmem:[%s6114_s22 + $0x3d8] sm:$0xff]  ;;  %v7685_v14 = vld [vmem:[#allocation22_spill] sm:$0xff] }
 0x391   : > { %4076 = vst [vmem:[%s6518_s23 + $0x388] sm:$0xff] %v3948_v1  ;;  %4084 = vst [vmem:[%s6518_s23 + $0x3c8] sm:$0xff] %v3956_v0  ;;  %5313 = vrcp.bf16 %v3009_v41  ;;  %v3017_v17 = vadd.bf16 1065369472, %v7117_v39  ;;  %v3016_v57 = vadd.bf16 1065369472, %v5308_v5  ;;  %v2743_v46 = vpack.c.bf16 %v7067_v54, %v7050_v30 }
 0x392   : > { %v3018_v24 = vadd.bf16 1065369472, %v5310_v43  ;;  %v3950_v29 = vmul.f32 %v5485_v8, %v3822_v6  ;;  %v3958_v33 = vmul.f32 %v5486_v38, %v3830_v51  ;;  %5315 = vrcp.bf16 %v3008_v58  ;;  %v7687_v42 = vld [vmem:[#allocation25_spill] sm:$0xff]  ;;  %v7688_v63 = vld [vmem:[#allocation23_spill] sm:$0xff]  ;;  %v7690_v1 = vld [vmem:[#allocation26_spill] sm:$0xff] }
 0x393   : > { %5317 = vrcp.bf16 %v3010_v49  ;;  %v2745_v59 = vpack.c.bf16 %v7069_v36, %v7052_v45  ;;  %v2744_v20 = vpack.c.bf16 %v7073_v35, %v7061_v21  ;;  %v2746_v39 = vpack.c.bf16 %v7075_v2, %v7063_v60  ;;  %v7691_v11 = vld [vmem:[#allocation24_spill] sm:$0xff]  ;;  %v7693_v49 = vld [vmem:[#allocation30_spill] sm:$0xff]  ;;  %v7694_v6 = vld [vmem:[#allocation27_spill] sm:$0xff] }
 0x394   : > { %4078 = vst [vmem:[%s6518_s23 + $0x398] sm:$0xff] %v3950_v29  ;;  %4086 = vst [vmem:[%s6518_s23 + $0x3d8] sm:$0xff] %v3958_v33  ;;  %5319 = vrcp.bf16 %v3015_v23  ;;  %v7684_v5 = vpack.c.bf16 %v6800_v48, %v6774_v61  ;;  %v7686_v25 = vpack.c.bf16 %v6802_v37, %v7685_v14  ;;  %v7689_v41 = vpack.c.bf16 %v7687_v42, %v7688_v63  ;;  %v7696_v51 = vld [vmem:[#allocation31_spill] sm:$0xff]  ;;  %v7697_v23 = vld [vmem:[#allocation28_spill] sm:$0xff] }
 0x395   : > { %5321 = vrcp.bf16 %v3017_v17  ;;  %v7692_v0 = vpack.c.bf16 %v7690_v1, %v7691_v11  ;;  %v7695_v61 = vpack.c.bf16 %v7693_v49, %v7694_v6  ;;  %v7698_v37 = vpack.c.bf16 %v7696_v51, %v7697_v23  ;;  %v7700_v8 = vld [vmem:[#allocation29_spill] sm:$0xff] }
 0x396   : > { %v4486_v43 = vmul.bf16 3216621497, %v7684_v5  ;;  %v4488_v4 = vmul.bf16 3216621497, %v7686_v25  ;;  %5323 = vrcp.bf16 %v3016_v57  ;;  %v4487_v34 = vmul.bf16 3216621497, %v7689_v41 }
 0x397   : > { %5325 = vrcp.bf16 %v3018_v24  ;;  %v4489_v58 = vmul.bf16 3216621497, %v7692_v0  ;;  %v4494_v48 = vmul.bf16 3216621497, %v7695_v61  ;;  %v4496_v17 = vmul.bf16 3216621497, %v7698_v37 }
 0x398   : > { %5327 = vpow.bf16 %v4486_v43  ;;  %v7699_v57 = vld [vmem:[#allocation21_spill] sm:$0xff]  ;;  %v7702_v33 = vpack.c.bf16 %v6869_v9, %v6849_v55 }
 0x399   : > { %5329 = vpow.bf16 %v4488_v4  ;;  %v7701_v29 = vpack.c.bf16 %v7699_v57, %v7700_v8  ;;  %v5487_v8 = vld [vmem:[%s6114_s22 + $0x20] sm:$0xff] }
 0x39a   : > { %5331 = vpow.bf16 %v4487_v34  ;;  %v4497_v5 = vmul.bf16 3216621497, %v7702_v33 }
 0x39b   : > { %v4495_v38 = vmul.bf16 3216621497, %v7701_v29  ;;  %v5312_v24 = vpop.eup %5311  ;;  %5333 = vpow.bf16 %v4489_v58 }
 0x39c   : > { %v5314_v43 = vpop.eup %5313  ;;  %v3076_v14 = vmul.bf16 1065369472, %v5312_v24  ;;  %5335 = vpow.bf16 %v4494_v48 }
 0x39d   : > { %v5316_v25 = vpop.eup %5315  ;;  %v3080_v4 = vmul.bf16 1065369472, %v5314_v43  ;;  %5337 = vpow.bf16 %v4496_v17 }
 0x39e   : > { %v5318_v42 = vpop.eup %5317  ;;  %v3583_v63 = vunpack.c.l.bf16 %v3076_v14  ;;  %v3591_v41 = vunpack.c.h.bf16 %v3076_v14  ;;  %v3078_v34 = vmul.bf16 1065369472, %v5316_v25  ;;  %5339 = vpow.bf16 %v4495_v38  ;;  %v5488_v38 = vld [vmem:[%s6114_s22 + $0x60] sm:$0xff] }
 0x39f   : > { %v5320_v1 = vpop.eup %5319  ;;  %v3585_v11 = vunpack.c.l.bf16 %v3080_v4  ;;  %v3593_v0 = vunpack.c.h.bf16 %v3080_v4  ;;  %v3082_v58 = vmul.bf16 1065369472, %v5318_v42  ;;  %5341 = vpow.bf16 %v4497_v5  ;;  %v5490_v42 = vld [vmem:[%s6114_s22 + $0x70] sm:$0xff] }
 0x3a0   : > { %v5322_v55 = vpop.eup %5321  ;;  %v3711_v9 = vmul.f32 %v3583_v63, %v6357_v28  ;;  %v3719_v49 = vmul.f32 %v3591_v41, %v6357_v28  ;;  %v4532_v6 = vcombine.low %v3076_v14, %v3078_v34  ;;  %v4536_v61 = vcombine.high %v3076_v14, %v3078_v34  ;;  %v5489_v14 = vld [vmem:[%s6114_s22 + $0x30] sm:$0xff] }
 0x3a1   : > { %v5324_v48 = vpop.eup %5323  ;;  %v3713_v51 = vmul.f32 %v3585_v11, %v6357_v28  ;;  %v3721_v23 = vmul.f32 %v3593_v0, %v6357_v28  ;;  %v3584_v37 = vunpack.c.l.bf16 %v3078_v34  ;;  %v3592_v17 = vunpack.c.h.bf16 %v3078_v34 }
 0x3a2   : > { %v5326_v57 = vpop.eup %5325  ;;  %v3839_v29 = vmul.f32 %v5487_v8, %v3711_v9  ;;  %v3847_v24 = vmul.f32 %v5488_v38, %v3719_v49  ;;  %3517 = vst [vmem:[%s6504_s12 + $0x10] sm:$0xff] %v4532_v6  ;;  %3521 = vst [vmem:[%s6504_s12 + $0x30] sm:$0xff] %v4536_v61  ;;  %v4533_v33 = vcombine.low %v3080_v4, %v3082_v58  ;;  %v3594_v0 = vunpack.c.h.bf16 %v3082_v58  ;;  %v5491_v61 = vld [vmem:[%s6114_s22 + $0x28] sm:$0xff] }
 0x3a3   : > { %v4537_v5 = vcombine.high %v3080_v4, %v3082_v58  ;;  %v7193_v43 = vpop.eup %5327  ;;  %v3841_v25 = vmul.f32 %v5489_v14, %v3713_v51  ;;  %v3849_v63 = vmul.f32 %v5490_v42, %v3721_v23  ;;  %v3712_v41 = vmul.f32 %v3584_v37, %v6357_v28  ;;  %v5492_v23 = vld [vmem:[%s6114_s22 + $0x68] sm:$0xff] }
 0x3a4   : > { %v3720_v34 = vmul.f32 %v3592_v17, %v6357_v28  ;;  %v7199_v11 = vpop.eup %5329  ;;  %3967 = vst [vmem:[%s6518_s23 + $0x20] sm:$0xff] %v3839_v29  ;;  %3975 = vst [vmem:[%s6518_s23 + $0x60] sm:$0xff] %v3847_v24  ;;  %v3586_v4 = vunpack.c.l.bf16 %v3082_v58  ;;  %v3092_v9 = vmul.bf16 1065369472, %v5320_v1  ;;  %v3096_v49 = vmul.bf16 1065369472, %v5322_v55 }
 0x3a5   : > { %3518 = vst [vmem:[%s6504_s12 + $0x18] sm:$0xff] %v4533_v33  ;;  %3522 = vst [vmem:[%s6504_s12 + $0x38] sm:$0xff] %v4537_v5  ;;  %v7205_v6 = vpop.eup %5331  ;;  %v3840_v51 = vmul.f32 %v5491_v61, %v3712_v41  ;;  %v3094_v17 = vmul.bf16 1065369472, %v5324_v48  ;;  %v3098_v8 = vmul.bf16 1065369472, %v5326_v57  ;;  %v3722_v1 = vmul.f32 %v3594_v0, %v6357_v28 }
 0x3a6   : > { %3969 = vst [vmem:[%s6518_s23 + $0x30] sm:$0xff] %v3841_v25  ;;  %3977 = vst [vmem:[%s6518_s23 + $0x70] sm:$0xff] %v3849_v63  ;;  %v3848_v37 = vmul.f32 %v5492_v23, %v3720_v34  ;;  %v7211_v29 = vpop.eup %5333  ;;  %v3714_v58 = vmul.f32 %v3586_v4, %v6357_v28  ;;  %v3599_v55 = vunpack.c.l.bf16 %v3092_v9  ;;  %v3607_v38 = vunpack.c.h.bf16 %v3092_v9  ;;  %v5493_v25 = vld [vmem:[%s6114_s22 + $0x38] sm:$0xff] }
 0x3a7   : > { %v7215_v24 = vpop.eup %5335  ;;  %3968 = vst [vmem:[%s6518_s23 + $0x28] sm:$0xff] %v3840_v51  ;;  %v3601_v33 = vunpack.c.l.bf16 %v3096_v49  ;;  %v3609_v5 = vunpack.c.h.bf16 %v3096_v49  ;;  %v4540_v14 = vcombine.low %v3092_v9, %v3094_v17  ;;  %v4544_v48 = vcombine.high %v3092_v9, %v3094_v17  ;;  %v5494_v63 = vld [vmem:[%s6114_s22 + $0x78] sm:$0xff] }
 0x3a8   : > { %3976 = vst [vmem:[%s6518_s23 + $0x68] sm:$0xff] %v3848_v37  ;;  %v7219_v57 = vpop.eup %5337  ;;  %v3842_v42 = vmul.f32 %v5493_v25, %v3714_v58  ;;  %v3850_v41 = vmul.f32 %v5494_v63, %v3722_v1  ;;  %v3727_v34 = vmul.f32 %v3599_v55, %v6357_v28  ;;  %v3735_v4 = vmul.f32 %v3607_v38, %v6357_v28  ;;  %v5495_v58 = vld [vmem:[%s6114_s22 + $0xa0] sm:$0xff] }
 0x3a9   : > { %v5340_v0 = vpop.eup %5339  ;;  %v3729_v61 = vmul.f32 %v3601_v33, %v6357_v28  ;;  %v3737_v9 = vmul.f32 %v3609_v5, %v6357_v28  ;;  %3525 = vst [vmem:[%s6504_s12 + $0x50] sm:$0xff] %v4540_v14  ;;  %3529 = vst [vmem:[%s6504_s12 + $0x70] sm:$0xff] %v4544_v48  ;;  %v3600_v51 = vunpack.c.l.bf16 %v3094_v17  ;;  %v3608_v23 = vunpack.c.h.bf16 %v3094_v17  ;;  %v5496_v55 = vld [vmem:[%s6114_s22 + $0xe0] sm:$0xff]  ;;  %v5497_v5 = vld [vmem:[%s6114_s22 + $0xb0] sm:$0xff] }
 0x3aa   : > { %v5342_v37 = vpop.eup %5341  ;;  %3970 = vst [vmem:[%s6518_s23 + $0x38] sm:$0xff] %v3842_v42  ;;  %3978 = vst [vmem:[%s6518_s23 + $0x78] sm:$0xff] %v3850_v41  ;;  %v3855_v1 = vmul.f32 %v5495_v58, %v3727_v34  ;;  %v3863_v38 = vmul.f32 %v5496_v55, %v3735_v4  ;;  %v4541_v25 = vcombine.low %v3096_v49, %v3098_v8  ;;  %v5498_v48 = vld [vmem:[%s6114_s22 + $0xf0] sm:$0xff]  ;;  %v3602_v41 = vunpack.c.l.bf16 %v3098_v8 }
 0x3ab   : > { %v4545_v33 = vcombine.high %v3096_v49, %v3098_v8  ;;  %v3857_v14 = vmul.f32 %v5497_v5, %v3729_v61  ;;  %v3865_v17 = vmul.f32 %v5498_v48, %v3737_v9  ;;  %v3728_v63 = vmul.f32 %v3600_v51, %v6357_v28  ;;  %v5499_v61 = vld [vmem:[%s6114_s22 + $0xa8] sm:$0xff] }
 0x3ac   : > { %v3736_v42 = vmul.f32 %v3608_v23, %v6357_v28  ;;  %3983 = vst [vmem:[%s6518_s23 + $0xa0] sm:$0xff] %v3855_v1  ;;  %3991 = vst [vmem:[%s6518_s23 + $0xe0] sm:$0xff] %v3863_v38  ;;  %v3610_v34 = vunpack.c.h.bf16 %v3098_v8  ;;  %v3023_v49 = vadd.bf16 1065369472, %v7193_v43  ;;  %v3025_v4 = vadd.bf16 1065369472, %v7199_v11 }
 0x3ad   : > { %3526 = vst [vmem:[%s6504_s12 + $0x58] sm:$0xff] %v4541_v25  ;;  %3530 = vst [vmem:[%s6504_s12 + $0x78] sm:$0xff] %v4545_v33  ;;  %v3856_v9 = vmul.f32 %v5499_v61, %v3728_v63  ;;  %v5500_v51 = vld [vmem:[%s6114_s22 + $0xe8] sm:$0xff]  ;;  %v3024_v58 = vadd.bf16 1065369472, %v7205_v6  ;;  %v3730_v55 = vmul.f32 %v3602_v41, %v6357_v28  ;;  %v5501_v38 = vld [vmem:[%s6114_s22 + $0xb8] sm:$0xff]  ;;  %v7704_v48 = vpack.c.bf16 %v6887_v15, %v6875_v50 }
 0x3ae   : > { %3985 = vst [vmem:[%s6518_s23 + $0xb0] sm:$0xff] %v3857_v14  ;;  %3993 = vst [vmem:[%s6518_s23 + $0xf0] sm:$0xff] %v3865_v17  ;;  %v3864_v23 = vmul.f32 %v5500_v51, %v3736_v42  ;;  %v3026_v1 = vadd.bf16 1065369472, %v7211_v29  ;;  %v3738_v8 = vmul.f32 %v3610_v34, %v6357_v28  ;;  %5343 = vrcp.bf16 %v3023_v49  ;;  %v5502_v33 = vld [vmem:[%s6114_s22 + $0xf8] sm:$0xff] }
 0x3af   : > { %v3031_v43 = vadd.bf16 1065369472, %v7215_v24  ;;  %3984 = vst [vmem:[%s6518_s23 + $0xa8] sm:$0xff] %v3856_v9  ;;  %5345 = vrcp.bf16 %v3025_v4  ;;  %v3033_v11 = vadd.bf16 1065369472, %v7219_v57  ;;  %v3858_v25 = vmul.f32 %v5501_v38, %v3730_v55 }
 0x3b0   : > { %3992 = vst [vmem:[%s6518_s23 + $0xe8] sm:$0xff] %v3864_v23  ;;  %v3866_v6 = vmul.f32 %v5502_v33, %v3738_v8  ;;  %5347 = vrcp.bf16 %v3024_v58  ;;  %v3032_v29 = vadd.bf16 1065369472, %v5340_v0  ;;  %v3034_v5 = vadd.bf16 1065369472, %v5342_v37 }
 0x3b1   : > { %5349 = vrcp.bf16 %v3026_v1  ;;  %3986 = vst [vmem:[%s6518_s23 + $0xb8] sm:$0xff] %v3858_v25  ;;  %v7703_v14 = vpack.c.bf16 %v6885_v19, %v6873_v52  ;;  %v4504_v57 = vmul.bf16 3216621497, %v7704_v48  ;;  %v7705_v17 = vpack.c.bf16 %v6895_v7, %v6879_v12  ;;  %v5503_v25 = vld [vmem:[%s6114_s22 + $0x120] sm:$0xff]  ;;  %v5505_v48 = vld [vmem:[%s6114_s22 + $0x130] sm:$0xff] }
 0x3b2   : > { %3994 = vst [vmem:[%s6518_s23 + $0xf8] sm:$0xff] %v3866_v6  ;;  %5351 = vrcp.bf16 %v3031_v43  ;;  %v7706_v0 = vpack.c.bf16 %v6897_v47, %v6881_v62  ;;  %v7707_v52 = vpack.c.bf16 %v6948_v3, %v6928_v32  ;;  %v7708_v50 = vpack.c.bf16 %v6950_v26, %v6930_v31  ;;  %v5504_v6 = vld [vmem:[%s6114_s22 + $0x160] sm:$0xff] }
 0x3b3   : > { %v4502_v24 = vmul.bf16 3216621497, %v7703_v14  ;;  %5353 = vrcp.bf16 %v3033_v11  ;;  %v4503_v63 = vmul.bf16 3216621497, %v7705_v17  ;;  %v7709_v12 = vpack.c.bf16 %v6958_v18, %v6938_v13  ;;  %v5506_v17 = vld [vmem:[%s6114_s22 + $0x170] sm:$0xff] }
 0x3b4   : > { %5355 = vrcp.bf16 %v3032_v29  ;;  %v4505_v37 = vmul.bf16 3216621497, %v7706_v0  ;;  %v4510_v19 = vmul.bf16 3216621497, %v7707_v52  ;;  %v4512_v15 = vmul.bf16 3216621497, %v7708_v50 }
 0x3b5   : > { %5357 = vrcp.bf16 %v3034_v5  ;;  %v4511_v7 = vmul.bf16 3216621497, %v7709_v12  ;;  %v7710_v47 = vpack.c.bf16 %v6960_v27, %v6940_v53 }
 0x3b6   : > { %5359 = vpow.bf16 %v4502_v24 }
 0x3b7   : > { %5361 = vpow.bf16 %v4504_v57  ;;  %v4513_v62 = vmul.bf16 3216621497, %v7710_v47 }
 0x3b8   : > { %5363 = vpow.bf16 %v4503_v63 }
 0x3b9   : > { %v5344_v42 = vpop.eup %5343  ;;  %5365 = vpow.bf16 %v4505_v37 }
 0x3ba   : > { %v5346_v41 = vpop.eup %5345  ;;  %v3108_v34 = vmul.bf16 1065369472, %v5344_v42  ;;  %5367 = vpow.bf16 %v4510_v19  ;;  %v5507_v42 = vld [vmem:[%s6114_s22 + $0x128] sm:$0xff] }
 0x3bb   : > { %v5348_v32 = vpop.eup %5347  ;;  %v3112_v3 = vmul.bf16 1065369472, %v5346_v41  ;;  %5369 = vpow.bf16 %v4512_v15 }
 0x3bc   : > { %v5350_v49 = vpop.eup %5349  ;;  %v3615_v31 = vunpack.c.l.bf16 %v3108_v34  ;;  %v3623_v26 = vunpack.c.h.bf16 %v3108_v34  ;;  %v3110_v4 = vmul.bf16 1065369472, %v5348_v32  ;;  %5371 = vpow.bf16 %v4511_v7 }
 0x3bd   : > { %v5352_v61 = vpop.eup %5351  ;;  %v3617_v13 = vunpack.c.l.bf16 %v3112_v3  ;;  %v3625_v18 = vunpack.c.h.bf16 %v3112_v3  ;;  %v3114_v9 = vmul.bf16 1065369472, %v5350_v49  ;;  %5373 = vpow.bf16 %v4513_v62  ;;  %v5508_v62 = vld [vmem:[%s6114_s22 + $0x168] sm:$0xff] }
 0x3be   : > { %v5354_v53 = vpop.eup %5353  ;;  %v3743_v27 = vmul.f32 %v3615_v31, %v6357_v28  ;;  %v3751_v51 = vmul.f32 %v3623_v26, %v6357_v28  ;;  %v4548_v23 = vcombine.low %v3108_v34, %v3110_v4  ;;  %v4552_v58 = vcombine.high %v3108_v34, %v3110_v4 }
 0x3bf   : > { %v5356_v1 = vpop.eup %5355  ;;  %v3745_v55 = vmul.f32 %v3617_v13, %v6357_v28  ;;  %v3753_v8 = vmul.f32 %v3625_v18, %v6357_v28  ;;  %v3616_v43 = vunpack.c.l.bf16 %v3110_v4  ;;  %v3624_v11 = vunpack.c.h.bf16 %v3110_v4 }
 0x3c0   : > { %v5358_v38 = vpop.eup %5357  ;;  %v3871_v33 = vmul.f32 %v5503_v25, %v3743_v27  ;;  %v3879_v29 = vmul.f32 %v5504_v6, %v3751_v51  ;;  %3533 = vst [vmem:[%s6504_s12 + $0x90] sm:$0xff] %v4548_v23  ;;  %3537 = vst [vmem:[%s6504_s12 + $0xb0] sm:$0xff] %v4552_v58  ;;  %v4549_v5 = vcombine.low %v3112_v3, %v3114_v9  ;;  %v3618_v19 = vunpack.c.l.bf16 %v3114_v9  ;;  %v5509_v51 = vld [vmem:[%s6114_s22 + $0x138] sm:$0xff] }
 0x3c1   : > { %v4553_v14 = vcombine.high %v3112_v3, %v3114_v9  ;;  %v7291_v24 = vpop.eup %5359  ;;  %v3873_v57 = vmul.f32 %v5505_v48, %v3745_v55  ;;  %v3881_v63 = vmul.f32 %v5506_v17, %v3753_v8  ;;  %v3744_v0 = vmul.f32 %v3616_v43, %v6357_v28  ;;  %v5510_v58 = vld [vmem:[%s6114_s22 + $0x178] sm:$0xff] }
 0x3c2   : > { %v3752_v37 = vmul.f32 %v3624_v11, %v6357_v28  ;;  %v7297_v52 = vpop.eup %5361  ;;  %3999 = vst [vmem:[%s6518_s23 + $0x120] sm:$0xff] %v3871_v33  ;;  %4007 = vst [vmem:[%s6518_s23 + $0x160] sm:$0xff] %v3879_v29  ;;  %v3626_v50 = vunpack.c.h.bf16 %v3114_v9  ;;  %v3124_v15 = vmul.bf16 1065369472, %v5352_v61  ;;  %v3128_v12 = vmul.bf16 1065369472, %v5354_v53 }
 0x3c3   : > { %3534 = vst [vmem:[%s6504_s12 + $0x98] sm:$0xff] %v4549_v5  ;;  %3538 = vst [vmem:[%s6504_s12 + $0xb8] sm:$0xff] %v4553_v14  ;;  %v7303_v7 = vpop.eup %5363  ;;  %v3872_v47 = vmul.f32 %v5507_v42, %v3744_v0  ;;  %v3126_v34 = vmul.bf16 1065369472, %v5356_v1  ;;  %v3130_v32 = vmul.bf16 1065369472, %v5358_v38  ;;  %v3746_v49 = vmul.f32 %v3618_v19, %v6357_v28 }
 0x3c4   : > { %4001 = vst [vmem:[%s6518_s23 + $0x130] sm:$0xff] %v3873_v57  ;;  %4009 = vst [vmem:[%s6518_s23 + $0x170] sm:$0xff] %v3881_v63  ;;  %v3880_v41 = vmul.f32 %v5508_v62, %v3752_v37  ;;  %v7309_v3 = vpop.eup %5365  ;;  %v3754_v31 = vmul.f32 %v3626_v50, %v6357_v28  ;;  %v3631_v26 = vunpack.c.l.bf16 %v3124_v15  ;;  %v3639_v4 = vunpack.c.h.bf16 %v3124_v15  ;;  %v5511_v29 = vld [vmem:[%s6114_s22 + $0x1a0] sm:$0xff]  ;;  %v5513_v63 = vld [vmem:[%s6114_s22 + $0x1b0] sm:$0xff] }
 0x3c5   : > { %v7313_v61 = vpop.eup %5367  ;;  %4000 = vst [vmem:[%s6518_s23 + $0x128] sm:$0xff] %v3872_v47  ;;  %v3633_v13 = vunpack.c.l.bf16 %v3128_v12  ;;  %v3641_v18 = vunpack.c.h.bf16 %v3128_v12  ;;  %v4556_v9 = vcombine.low %v3124_v15, %v3126_v34  ;;  %v4560_v53 = vcombine.high %v3124_v15, %v3126_v34  ;;  %v5512_v14 = vld [vmem:[%s6114_s22 + $0x1e0] sm:$0xff]  ;;  %v5514_v37 = vld [vmem:[%s6114_s22 + $0x1f0] sm:$0xff] }
 0x3c6   : > { %4008 = vst [vmem:[%s6518_s23 + $0x168] sm:$0xff] %v3880_v41  ;;  %v7317_v27 = vpop.eup %5369  ;;  %v3874_v23 = vmul.f32 %v5509_v51, %v3746_v49  ;;  %v3882_v1 = vmul.f32 %v5510_v58, %v3754_v31  ;;  %v3759_v55 = vmul.f32 %v3631_v26, %v6357_v28  ;;  %v3767_v8 = vmul.f32 %v3639_v4, %v6357_v28  ;;  %v5515_v41 = vld [vmem:[%s6114_s22 + $0x1a8] sm:$0xff] }
 0x3c7   : > { %v5372_v43 = vpop.eup %5371  ;;  %v3761_v11 = vmul.f32 %v3633_v13, %v6357_v28  ;;  %v3769_v38 = vmul.f32 %v3641_v18, %v6357_v28  ;;  %3541 = vst [vmem:[%s6504_s12 + $0xd0] sm:$0xff] %v4556_v9  ;;  %3545 = vst [vmem:[%s6504_s12 + $0xf0] sm:$0xff] %v4560_v53  ;;  %v3632_v25 = vunpack.c.l.bf16 %v3126_v34  ;;  %v3640_v33 = vunpack.c.h.bf16 %v3126_v34  ;;  %v5516_v49 = vld [vmem:[%s6114_s22 + $0x1e8] sm:$0xff]  ;;  %v5517_v18 = vld [vmem:[%s6114_s22 + $0x1b8] sm:$0xff] }
 0x3c8   : > { %v5374_v6 = vpop.eup %5373  ;;  %4002 = vst [vmem:[%s6518_s23 + $0x138] sm:$0xff] %v3874_v23  ;;  %4010 = vst [vmem:[%s6518_s23 + $0x178] sm:$0xff] %v3882_v1  ;;  %v3887_v5 = vmul.f32 %v5511_v29, %v3759_v55  ;;  %v3895_v48 = vmul.f32 %v5512_v14, %v3767_v8  ;;  %v4557_v57 = vcombine.low %v3128_v12, %v3130_v32  ;;  %v3634_v42 = vunpack.c.l.bf16 %v3130_v32  ;;  %v5518_v53 = vld [vmem:[%s6114_s22 + $0x1f8] sm:$0xff]  ;;  %v7714_v8 = vld [vmem:[#allocation33_spill] sm:$0xff] }
 0x3c9   : > { %v4561_v17 = vcombine.high %v3128_v12, %v3130_v32  ;;  %v3889_v0 = vmul.f32 %v5513_v63, %v3761_v11  ;;  %v3897_v19 = vmul.f32 %v5514_v37, %v3769_v38  ;;  %v3760_v50 = vmul.f32 %v3632_v25, %v6357_v28 }
 0x3ca   : > { %v3768_v15 = vmul.f32 %v3640_v33, %v6357_v28  ;;  %4015 = vst [vmem:[%s6518_s23 + $0x1a0] sm:$0xff] %v3887_v5  ;;  %4023 = vst [vmem:[%s6518_s23 + $0x1e0] sm:$0xff] %v3895_v48  ;;  %v3642_v47 = vunpack.c.h.bf16 %v3130_v32  ;;  %v3039_v12 = vadd.bf16 1065369472, %v7291_v24  ;;  %v3041_v62 = vadd.bf16 1065369472, %v7297_v52 }
 0x3cb   : > { %3542 = vst [vmem:[%s6504_s12 + $0xd8] sm:$0xff] %v4557_v57  ;;  %3546 = vst [vmem:[%s6504_s12 + $0xf8] sm:$0xff] %v4561_v17  ;;  %v3888_v34 = vmul.f32 %v5515_v41, %v3760_v50  ;;  %v3040_v26 = vadd.bf16 1065369472, %v7303_v7  ;;  %v3042_v4 = vadd.bf16 1065369472, %v7309_v3  ;;  %v3762_v13 = vmul.f32 %v3634_v42, %v6357_v28 }
 0x3cc   : > { %4017 = vst [vmem:[%s6518_s23 + $0x1b0] sm:$0xff] %v3889_v0  ;;  %4025 = vst [vmem:[%s6518_s23 + $0x1f0] sm:$0xff] %v3897_v19  ;;  %v3896_v31 = vmul.f32 %v5516_v49, %v3768_v15  ;;  %v3770_v32 = vmul.f32 %v3642_v47, %v6357_v28  ;;  %5375 = vrcp.bf16 %v3039_v12  ;;  %v3047_v24 = vadd.bf16 1065369472, %v7313_v61  ;;  %v5519_v0 = vld [vmem:[%s6114_s22 + $0x220] sm:$0xff]  ;;  %v5521_v12 = vld [vmem:[%s6114_s22 + $0x230] sm:$0xff] }
 0x3cd   : > { %4016 = vst [vmem:[%s6518_s23 + $0x1a8] sm:$0xff] %v3888_v34  ;;  %5377 = vrcp.bf16 %v3041_v62  ;;  %v3049_v52 = vadd.bf16 1065369472, %v7317_v27  ;;  %v3890_v9 = vmul.f32 %v5517_v18, %v3762_v13  ;;  %v3048_v3 = vadd.bf16 1065369472, %v5372_v43  ;;  %v7715_v43 = vld [vmem:[#allocation32_spill] sm:$0xff] }
 0x3ce   : > { %4024 = vst [vmem:[%s6518_s23 + $0x1e8] sm:$0xff] %v3896_v31  ;;  %v3898_v7 = vmul.f32 %v5518_v53, %v3770_v32  ;;  %5379 = vrcp.bf16 %v3040_v26  ;;  %v3050_v51 = vadd.bf16 1065369472, %v5374_v6  ;;  %v7711_v23 = vpack.c.bf16 %v7014_v16, %v6992_v44  ;;  %v5520_v19 = vld [vmem:[%s6114_s22 + $0x260] sm:$0xff]  ;;  %v5522_v41 = vld [vmem:[%s6114_s22 + $0x270] sm:$0xff]  ;;  %v5523_v18 = vld [vmem:[%s6114_s22 + $0x228] sm:$0xff] }
 0x3cf   : > { %5381 = vrcp.bf16 %v3042_v4  ;;  %4018 = vst [vmem:[%s6518_s23 + $0x1b8] sm:$0xff] %v3890_v9  ;;  %v7712_v58 = vpack.c.bf16 %v7016_v22, %v6994_v40  ;;  %v7713_v1 = vpack.c.bf16 %v7036_v56, %v7002_v10  ;;  %v7716_v11 = vpack.c.bf16 %v7714_v8, %v7715_v43  ;;  %v5524_v53 = vld [vmem:[%s6114_s22 + $0x268] sm:$0xff] }
 0x3d0   : > { %4026 = vst [vmem:[%s6518_s23 + $0x1f8] sm:$0xff] %v3898_v7  ;;  %5383 = vrcp.bf16 %v3047_v24  ;;  %v4518_v61 = vmul.bf16 3216621497, %v7711_v23  ;;  %v4526_v44 = vmul.bf16 3216621497, %v2743_v46 }
 0x3d1   : > { %5385 = vrcp.bf16 %v3049_v52  ;;  %v4520_v27 = vmul.bf16 3216621497, %v7712_v58  ;;  %v4519_v55 = vmul.bf16 3216621497, %v7713_v1  ;;  %v4521_v38 = vmul.bf16 3216621497, %v7716_v11 }
 0x3d2   : > { %5387 = vrcp.bf16 %v3048_v3  ;;  %v4528_v40 = vmul.bf16 3216621497, %v2745_v59  ;;  %v4527_v10 = vmul.bf16 3216621497, %v2744_v20  ;;  %v4529_v22 = vmul.bf16 3216621497, %v2746_v39 }
 0x3d3   : > { %5389 = vrcp.bf16 %v3050_v51 }
 0x3d4   : > { %5391 = vpow.bf16 %v4518_v61 }
 0x3d5   : > { %5393 = vpow.bf16 %v4520_v27 }
 0x3d6   : > { %5395 = vpow.bf16 %v4519_v55 }
 0x3d7   : > { %v5376_v16 = vpop.eup %5375  ;;  %5397 = vpow.bf16 %v4521_v38 }
 0x3d8   : > { %v5378_v56 = vpop.eup %5377  ;;  %v3140_v25 = vmul.bf16 1065369472, %v5376_v16  ;;  %5399 = vpow.bf16 %v4526_v44  ;;  %v5526_v16 = vld [vmem:[%s6114_s22 + $0x278] sm:$0xff] }
 0x3d9   : > { %v5380_v30 = vpop.eup %5379  ;;  %v3144_v54 = vmul.bf16 1065369472, %v5378_v56  ;;  %5401 = vpow.bf16 %v4528_v40  ;;  %v5525_v40 = vld [vmem:[%s6114_s22 + $0x238] sm:$0xff] }
 0x3da   : > { %v5382_v46 = vpop.eup %5381  ;;  %v3647_v45 = vunpack.c.l.bf16 %v3140_v25  ;;  %v3655_v36 = vunpack.c.h.bf16 %v3140_v25  ;;  %v3142_v59 = vmul.bf16 1065369472, %v5380_v30  ;;  %5403 = vpow.bf16 %v4527_v10 }
 0x3db   : > { %v5384_v33 = vpop.eup %5383  ;;  %v3649_v21 = vunpack.c.l.bf16 %v3144_v54  ;;  %v3657_v35 = vunpack.c.h.bf16 %v3144_v54  ;;  %v3146_v20 = vmul.bf16 1065369472, %v5382_v46  ;;  %5405 = vpow.bf16 %v4529_v22 }
 0x3dc   : > { %v5386_v60 = vpop.eup %5385  ;;  %v3775_v2 = vmul.f32 %v3647_v45, %v6357_v28  ;;  %v3783_v39 = vmul.f32 %v3655_v36, %v6357_v28  ;;  %v4564_v6 = vcombine.low %v3140_v25, %v3142_v59  ;;  %v4568_v29 = vcombine.high %v3140_v25, %v3142_v59 }
 0x3dd   : > { %v5388_v5 = vpop.eup %5387  ;;  %v3777_v14 = vmul.f32 %v3649_v21, %v6357_v28  ;;  %v3785_v48 = vmul.f32 %v3657_v35, %v6357_v28  ;;  %v3648_v57 = vunpack.c.l.bf16 %v3142_v59  ;;  %v3656_v17 = vunpack.c.h.bf16 %v3142_v59  ;;  %v5528_v35 = vld [vmem:[%s6114_s22 + $0x2e0] sm:$0xff] }
 0x3de   : > { %v5390_v63 = vpop.eup %5389  ;;  %v3903_v37 = vmul.f32 %v5519_v0, %v3775_v2  ;;  %v3911_v50 = vmul.f32 %v5520_v19, %v3783_v39  ;;  %3549 = vst [vmem:[%s6504_s12 + $0x110] sm:$0xff] %v4564_v6  ;;  %3553 = vst [vmem:[%s6504_s12 + $0x130] sm:$0xff] %v4568_v29  ;;  %v4565_v15 = vcombine.low %v3144_v54, %v3146_v20  ;;  %v3650_v4 = vunpack.c.l.bf16 %v3146_v20  ;;  %v5529_v39 = vld [vmem:[%s6114_s22 + $0x2b0] sm:$0xff] }
 0x3df   : > { %v4569_v42 = vcombine.high %v3144_v54, %v3146_v20  ;;  %v7389_v47 = vpop.eup %5391  ;;  %v3905_v62 = vmul.f32 %v5521_v12, %v3777_v14  ;;  %v3913_v34 = vmul.f32 %v5522_v41, %v3785_v48  ;;  %v3776_v49 = vmul.f32 %v3648_v57, %v6357_v28  ;;  %v5530_v29 = vld [vmem:[%s6114_s22 + $0x2f0] sm:$0xff] }
 0x3e0   : > { %v3784_v31 = vmul.f32 %v3656_v17, %v6357_v28  ;;  %v7395_v26 = vpop.eup %5393  ;;  %4031 = vst [vmem:[%s6518_s23 + $0x220] sm:$0xff] %v3903_v37  ;;  %4039 = vst [vmem:[%s6518_s23 + $0x260] sm:$0xff] %v3911_v50  ;;  %v3658_v13 = vunpack.c.h.bf16 %v3146_v20  ;;  %v3156_v32 = vmul.bf16 1065369472, %v5384_v33  ;;  %v3160_v24 = vmul.bf16 1065369472, %v5386_v60 }
 0x3e1   : > { %3550 = vst [vmem:[%s6504_s12 + $0x118] sm:$0xff] %v4565_v15  ;;  %3554 = vst [vmem:[%s6504_s12 + $0x138] sm:$0xff] %v4569_v42  ;;  %v7401_v52 = vpop.eup %5395  ;;  %v3904_v9 = vmul.f32 %v5523_v18, %v3776_v49  ;;  %v3158_v3 = vmul.bf16 1065369472, %v5388_v5  ;;  %v3162_v51 = vmul.bf16 1065369472, %v5390_v63  ;;  %v3778_v61 = vmul.f32 %v3650_v4, %v6357_v28 }
 0x3e2   : > { %4033 = vst [vmem:[%s6518_s23 + $0x230] sm:$0xff] %v3905_v62  ;;  %4041 = vst [vmem:[%s6518_s23 + $0x270] sm:$0xff] %v3913_v34  ;;  %v3912_v7 = vmul.f32 %v5524_v53, %v3784_v31  ;;  %v7407_v23 = vpop.eup %5397  ;;  %v3786_v58 = vmul.f32 %v3658_v13, %v6357_v28  ;;  %v3663_v27 = vunpack.c.l.bf16 %v3156_v32  ;;  %v3671_v1 = vunpack.c.h.bf16 %v3156_v32  ;;  %v5527_v33 = vld [vmem:[%s6114_s22 + $0x2a0] sm:$0xff]  ;;  %v5531_v37 = vld [vmem:[%s6114_s22 + $0x2a8] sm:$0xff] }
 0x3e3   : > { %v7411_v55 = vpop.eup %5399  ;;  %4032 = vst [vmem:[%s6518_s23 + $0x228] sm:$0xff] %v3904_v9  ;;  %v3665_v8 = vunpack.c.l.bf16 %v3160_v24  ;;  %v3673_v43 = vunpack.c.h.bf16 %v3160_v24  ;;  %v4572_v11 = vcombine.low %v3156_v32, %v3158_v3  ;;  %v4576_v38 = vcombine.high %v3156_v32, %v3158_v3  ;;  %v5532_v50 = vld [vmem:[%s6114_s22 + $0x2e8] sm:$0xff]  ;;  %v5533_v49 = vld [vmem:[%s6114_s22 + $0x2b8] sm:$0xff] }
 0x3e4   : > { %4040 = vst [vmem:[%s6518_s23 + $0x268] sm:$0xff] %v3912_v7  ;;  %v7415_v44 = vpop.eup %5401  ;;  %v3906_v10 = vmul.f32 %v5525_v40, %v3778_v61  ;;  %v3914_v22 = vmul.f32 %v5526_v16, %v3786_v58  ;;  %v3791_v56 = vmul.f32 %v3663_v27, %v6357_v28  ;;  %v3799_v25 = vmul.f32 %v3671_v1, %v6357_v28 }
 0x3e5   : > { %v5404_v30 = vpop.eup %5403  ;;  %v3793_v54 = vmul.f32 %v3665_v8, %v6357_v28  ;;  %v3801_v46 = vmul.f32 %v3673_v43, %v6357_v28  ;;  %3557 = vst [vmem:[%s6504_s12 + $0x150] sm:$0xff] %v4572_v11  ;;  %3561 = vst [vmem:[%s6504_s12 + $0x170] sm:$0xff] %v4576_v38  ;;  %v3664_v45 = vunpack.c.l.bf16 %v3158_v3  ;;  %v3672_v36 = vunpack.c.h.bf16 %v3158_v3 }
 0x3e6   : > { %v5406_v59 = vpop.eup %5405  ;;  %4034 = vst [vmem:[%s6518_s23 + $0x238] sm:$0xff] %v3906_v10  ;;  %4042 = vst [vmem:[%s6518_s23 + $0x278] sm:$0xff] %v3914_v22  ;;  %v3919_v21 = vmul.f32 %v5527_v33, %v3791_v56  ;;  %v3927_v20 = vmul.f32 %v5528_v35, %v3799_v25  ;;  %v4573_v60 = vcombine.low %v3160_v24, %v3162_v51  ;;  %v3666_v57 = vunpack.c.l.bf16 %v3162_v51  ;;  %v5535_v25 = vld [vmem:[%s6114_s22 + $0x320] sm:$0xff] }
 0x3e7   : > { %v4577_v2 = vcombine.high %v3160_v24, %v3162_v51  ;;  %v3921_v6 = vmul.f32 %v5529_v39, %v3793_v54  ;;  %v3929_v5 = vmul.f32 %v5530_v29, %v3801_v46  ;;  %v3792_v14 = vmul.f32 %v3664_v45, %v6357_v28  ;;  %v5536_v54 = vld [vmem:[%s6114_s22 + $0x360] sm:$0xff] }
 0x3e8   : > { %v3800_v48 = vmul.f32 %v3672_v36, %v6357_v28  ;;  %4047 = vst [vmem:[%s6518_s23 + $0x2a0] sm:$0xff] %v3919_v21  ;;  %4055 = vst [vmem:[%s6518_s23 + $0x2e0] sm:$0xff] %v3927_v20  ;;  %v3674_v17 = vunpack.c.h.bf16 %v3162_v51  ;;  %v3055_v63 = vadd.bf16 1065369472, %v7389_v47  ;;  %v3057_v0 = vadd.bf16 1065369472, %v7395_v26 }
 0x3e9   : > { %3558 = vst [vmem:[%s6504_s12 + $0x158] sm:$0xff] %v4573_v60  ;;  %3562 = vst [vmem:[%s6504_s12 + $0x178] sm:$0xff] %v4577_v2  ;;  %v3920_v19 = vmul.f32 %v5531_v37, %v3792_v14  ;;  %v3056_v42 = vadd.bf16 1065369472, %v7401_v52  ;;  %v3058_v12 = vadd.bf16 1065369472, %v7407_v23  ;;  %v3794_v62 = vmul.f32 %v3666_v57, %v6357_v28 }
 0x3ea   : > { %4049 = vst [vmem:[%s6518_s23 + $0x2b0] sm:$0xff] %v3921_v6  ;;  %4057 = vst [vmem:[%s6518_s23 + $0x2f0] sm:$0xff] %v3929_v5  ;;  %v3928_v15 = vmul.f32 %v5532_v50, %v3800_v48  ;;  %v3802_v41 = vmul.f32 %v3674_v17, %v6357_v28  ;;  %5407 = vrcp.bf16 %v3055_v63  ;;  %v3063_v47 = vadd.bf16 1065369472, %v7411_v55  ;;  %v5534_v26 = vld [vmem:[%s6114_s22 + $0x2f8] sm:$0xff]  ;;  %v5538_v21 = vld [vmem:[%s6114_s22 + $0x370] sm:$0xff] }
 0x3eb   : > { %4048 = vst [vmem:[%s6518_s23 + $0x2a8] sm:$0xff] %v3920_v19  ;;  %5409 = vrcp.bf16 %v3057_v0  ;;  %v3065_v34 = vadd.bf16 1065369472, %v7415_v44  ;;  %v3922_v31 = vmul.f32 %v5533_v49, %v3794_v62  ;;  %v3064_v13 = vadd.bf16 1065369472, %v5404_v30  ;;  %v5539_v5 = vld [vmem:[%s6114_s22 + $0x328] sm:$0xff] }
 0x3ec   : > { %4056 = vst [vmem:[%s6518_s23 + $0x2e8] sm:$0xff] %v3928_v15  ;;  %v3930_v4 = vmul.f32 %v5534_v26, %v3802_v41  ;;  %5411 = vrcp.bf16 %v3056_v42  ;;  %v3066_v32 = vadd.bf16 1065369472, %v5406_v59  ;;  %v5537_v59 = vld [vmem:[%s6114_s22 + $0x330] sm:$0xff]  ;;  %v5540_v48 = vld [vmem:[%s6114_s22 + $0x368] sm:$0xff]  ;;  %v5541_v41 = vld [vmem:[%s6114_s22 + $0x338] sm:$0xff] }
 0x3ed   : > { %5413 = vrcp.bf16 %v3058_v12  ;;  %4050 = vst [vmem:[%s6518_s23 + $0x2b8] sm:$0xff] %v3922_v31 }
 0x3ee   : > { %4058 = vst [vmem:[%s6518_s23 + $0x2f8] sm:$0xff] %v3930_v4  ;;  %5415 = vrcp.bf16 %v3063_v47 }
 0x3ef   : > { %5417 = vrcp.bf16 %v3065_v34  ;;  %v5542_v34 = vld [vmem:[%s6114_s22 + $0x378] sm:$0xff] }
 0x3f0   : > { %5419 = vrcp.bf16 %v3064_v13 }
 0x3f1   : > { %5421 = vrcp.bf16 %v3066_v32 }
 0x3f5   : > { %v5408_v24 = vpop.eup %5407 }
 0x3f6   : > { %v5410_v52 = vpop.eup %5409  ;;  %v3172_v18 = vmul.bf16 1065369472, %v5408_v24 }
 0x3f7   : > { %v5412_v9 = vpop.eup %5411  ;;  %v3176_v53 = vmul.bf16 1065369472, %v5410_v52  ;;  %v5543_v52 = vld [vmem:[%s6114_s22 + $0x3a0] sm:$0xff] }
 0x3f8   : > { %v5414_v7 = vpop.eup %5413  ;;  %v3679_v3 = vunpack.c.l.bf16 %v3172_v18  ;;  %v3687_v51 = vunpack.c.h.bf16 %v3172_v18  ;;  %v3174_v23 = vmul.bf16 1065369472, %v5412_v9  ;;  %v5544_v9 = vld [vmem:[%s6114_s22 + $0x3e0] sm:$0xff] }
 0x3f9   : > { %v5416_v61 = vpop.eup %5415  ;;  %v3681_v58 = vunpack.c.l.bf16 %v3176_v53  ;;  %v3689_v27 = vunpack.c.h.bf16 %v3176_v53  ;;  %v3178_v1 = vmul.bf16 1065369472, %v5414_v7 }
 0x3fa   : > { %v5418_v55 = vpop.eup %5417  ;;  %v3807_v8 = vmul.f32 %v3679_v3, %v6357_v28  ;;  %v3815_v43 = vmul.f32 %v3687_v51, %v6357_v28  ;;  %v4580_v11 = vcombine.low %v3172_v18, %v3174_v23  ;;  %v4584_v38 = vcombine.high %v3172_v18, %v3174_v23  ;;  %v5545_v51 = vld [vmem:[%s6114_s22 + $0x3b0] sm:$0xff] }
 0x3fb   : > { %v5420_v44 = vpop.eup %5419  ;;  %v3809_v40 = vmul.f32 %v3681_v58, %v6357_v28  ;;  %v3817_v10 = vmul.f32 %v3689_v27, %v6357_v28  ;;  %v3680_v16 = vunpack.c.l.bf16 %v3174_v23  ;;  %v3688_v22 = vunpack.c.h.bf16 %v3174_v23 }
 0x3fc   : > { %v5422_v56 = vpop.eup %5421  ;;  %v3935_v30 = vmul.f32 %v5535_v25, %v3807_v8  ;;  %v3943_v46 = vmul.f32 %v5536_v54, %v3815_v43  ;;  %3565 = vst [vmem:[%s6504_s12 + $0x190] sm:$0xff] %v4580_v11  ;;  %3569 = vst [vmem:[%s6504_s12 + $0x1b0] sm:$0xff] %v4584_v38  ;;  %v4581_v45 = vcombine.low %v3176_v53, %v3178_v1  ;;  %v3682_v2 = vunpack.c.l.bf16 %v3178_v1  ;;  %v5547_v43 = vld [vmem:[%s6114_s22 + $0x3a8] sm:$0xff] }
 0x3fd   : > { %v4585_v36 = vcombine.high %v3176_v53, %v3178_v1  ;;  %v3937_v33 = vmul.f32 %v5537_v59, %v3809_v40  ;;  %v3945_v35 = vmul.f32 %v5538_v21, %v3817_v10  ;;  %v3808_v20 = vmul.f32 %v3680_v16, %v6357_v28  ;;  %v5548_v38 = vld [vmem:[%s6114_s22 + $0x3e8] sm:$0xff] }
 0x3fe   : > { %v3816_v60 = vmul.f32 %v3688_v22, %v6357_v28  ;;  %4063 = vst [vmem:[%s6518_s23 + $0x320] sm:$0xff] %v3935_v30  ;;  %4071 = vst [vmem:[%s6518_s23 + $0x360] sm:$0xff] %v3943_v46  ;;  %v3690_v39 = vunpack.c.h.bf16 %v3178_v1  ;;  %v3188_v6 = vmul.bf16 1065369472, %v5416_v61  ;;  %v3192_v29 = vmul.bf16 1065369472, %v5418_v55 }
 0x3ff   : > { %3566 = vst [vmem:[%s6504_s12 + $0x198] sm:$0xff] %v4581_v45  ;;  %3570 = vst [vmem:[%s6504_s12 + $0x1b8] sm:$0xff] %v4585_v36  ;;  %v3936_v14 = vmul.f32 %v5539_v5, %v3808_v20  ;;  %v3190_v17 = vmul.bf16 1065369472, %v5420_v44  ;;  %v7475_v63 = vmul.bf16 1065369472, %v5422_v56  ;;  %v3810_v0 = vmul.f32 %v3682_v2, %v6357_v28 }
 0x400   : > { %4065 = vst [vmem:[%s6518_s23 + $0x330] sm:$0xff] %v3937_v33  ;;  %4073 = vst [vmem:[%s6518_s23 + $0x370] sm:$0xff] %v3945_v35  ;;  %v3944_v57 = vmul.f32 %v5540_v48, %v3816_v60  ;;  %v3818_v37 = vmul.f32 %v3690_v39, %v6357_v28  ;;  %v3695_v19 = vunpack.c.l.bf16 %v3188_v6  ;;  %v3703_v50 = vunpack.c.h.bf16 %v3188_v6  ;;  %v5546_v61 = vld [vmem:[%s6114_s22 + $0x3f0] sm:$0xff] }
 0x401   : > { %4064 = vst [vmem:[%s6518_s23 + $0x328] sm:$0xff] %v3936_v14  ;;  %v3697_v15 = vunpack.c.l.bf16 %v3192_v29  ;;  %v3705_v42 = vunpack.c.h.bf16 %v3192_v29  ;;  %v4588_v12 = vcombine.low %v3188_v6, %v3190_v17  ;;  %v4592_v62 = vcombine.high %v3188_v6, %v3190_v17 }
 0x402   : > { %4072 = vst [vmem:[%s6518_s23 + $0x368] sm:$0xff] %v3944_v57  ;;  %v3938_v47 = vmul.f32 %v5541_v41, %v3810_v0  ;;  %v3946_v49 = vmul.f32 %v5542_v34, %v3818_v37  ;;  %v3823_v31 = vmul.f32 %v3695_v19, %v6357_v28  ;;  %v3831_v26 = vmul.f32 %v3703_v50, %v6357_v28 }
 0x403   : > { %v3825_v4 = vmul.f32 %v3697_v15, %v6357_v28  ;;  %v3833_v13 = vmul.f32 %v3705_v42, %v6357_v28  ;;  %3573 = vst [vmem:[%s6504_s12 + $0x1d0] sm:$0xff] %v4588_v12  ;;  %3577 = vst [vmem:[%s6504_s12 + $0x1f0] sm:$0xff] %v4592_v62  ;;  %v3696_v32 = vunpack.c.l.bf16 %v3190_v17  ;;  %v3704_v24 = vunpack.c.h.bf16 %v3190_v17 }
 0x404   : > { %4066 = vst [vmem:[%s6518_s23 + $0x338] sm:$0xff] %v3938_v47  ;;  %4074 = vst [vmem:[%s6518_s23 + $0x378] sm:$0xff] %v3946_v49  ;;  %v3951_v18 = vmul.f32 %v5543_v52, %v3823_v31  ;;  %v3959_v53 = vmul.f32 %v5544_v9, %v3831_v26  ;;  %v4589_v7 = vcombine.low %v3192_v29, %v7475_v63  ;;  %v3698_v55 = vunpack.c.l.bf16 %v7475_v63 }
 0x405   : > { %v4593_v3 = vcombine.high %v3192_v29, %v7475_v63  ;;  %v3953_v23 = vmul.f32 %v5545_v51, %v3825_v4  ;;  %v3961_v58 = vmul.f32 %v5546_v61, %v3833_v13  ;;  %v3824_v27 = vmul.f32 %v3696_v32, %v6357_v28 }
 0x406   : > { %v3832_v1 = vmul.f32 %v3704_v24, %v6357_v28  ;;  %4079 = vst [vmem:[%s6518_s23 + $0x3a0] sm:$0xff] %v3951_v18  ;;  %4087 = vst [vmem:[%s6518_s23 + $0x3e0] sm:$0xff] %v3959_v53  ;;  %v3706_v8 = vunpack.c.h.bf16 %v7475_v63 }
 0x407   : > { %3574 = vst [vmem:[%s6504_s12 + $0x1d8] sm:$0xff] %v4589_v7  ;;  %3578 = vst [vmem:[%s6504_s12 + $0x1f8] sm:$0xff] %v4593_v3  ;;  %v3952_v11 = vmul.f32 %v5547_v43, %v3824_v27 }
 0x408   : > { %4081 = vst [vmem:[%s6518_s23 + $0x3b0] sm:$0xff] %v3953_v23  ;;  %4089 = vst [vmem:[%s6518_s23 + $0x3f0] sm:$0xff] %v3961_v58  ;;  %v3960_v44 = vmul.f32 %v5548_v38, %v3832_v1 }
 0x409   : > { %5708 = shalt.err (!%p5705_p3)
}
 0x40a   : > { %s5709_s14 = scalar_lea.hbm %s7494_s15, 8192  ;;  %s5713_s12 = scalar_lea.hbm %s7612_s7, 16384 }
 0x40b   : > { %p5710_p9 = scmp.ne.s32.totalorder %s7494_s15, %s5709_s14  ;;  %p5714_p7 = scmp.lt.u32.totalorder %s7494_s15, %s7612_s7 }
 0x40c   : > { %p5715_p12 = scmp.lt.u32.totalorder %s5713_s12, %s5709_s14  ;;  %p5717_p2 = scmp.lt.u32.totalorder %s5709_s14, %s7494_s15 }
 0x40d   : > { %p5711_p13 = pnand %p5710_p9, %p6018_p5 }
 0x40e   : > { %p5716_p1 = por %p5715_p12, %p5714_p7 }
 0x40f   : > { %p5712_p11 = pneg %p5711_p13 }
 0x410   : > { %p5718_p4 = por %p5717_p2, %p5716_p1 }
 0x412   : > { %p5719_p0 = pnand %p5718_p4, %p5712_p11 }
 0x414   : > { %5722 = shalt.err (!%p5719_p0)
}
 0x415   : > { %s5821_s25 = smov 512   ;;  %s5822_s11 = smov 32   ;;  %v3826_v40 = vmul.f32 %v3698_v55, %v6357_v28  ;;  %v3834_v10 = vmul.f32 %v3706_v8, %v6357_v28  ;;  %4080 = vst [vmem:[%s6518_s23 + $0x3a8] sm:$0xff] %v3952_v11  ;;  %4088 = vst [vmem:[%s6518_s23 + $0x3e8] sm:$0xff] %v3960_v44  ;;  %v5549_v16 = vld [vmem:[%s6114_s22 + $0x3b8] sm:$0xff] }
 0x416   : > { %4965 = dma.vmem_to_hbm [thread:$0]  (%p6018_p5), %s7496_s3, 8192, %s7494_s15, %s4097_s30, %s5821_s25, %s5821_s25, %s5822_s11  }
 0x417   : > { %s7553_s10 = scalar_lea.hbm %s7611_s6, %s4609_s5  ;;  %v3954_v22 = vmul.f32 %v5549_v16, %v3826_v40  ;;  %v5550_v56 = vld [vmem:[%s6114_s22 + $0x3f8] sm:$0xff]  ;;  %s4092_s3 = scalar_lea.sflag [#allocation5], %s6108_s16 }
 0x418   : > { %v3962_v25 = vmul.f32 %v5550_v56, %v3834_v10  ;;  %s5723_s15 = scalar_lea.vmem %s7557_s17, 16384  ;;  %s5823_s0 = smov [#allocation12]  }
 0x419   : > { %4082 = vst [vmem:[%s6518_s23 + $0x3b8] sm:$0xff] %v3954_v22  ;;  %p5724_p8 = scmp.ne.s32.totalorder %s7557_s17, %s5723_s15  ;;  %s5727_s5 = sshll.u32 %s5823_s0, 4  ;;  %s5728_s5 = int_to_ptr.vmem [resolvable:$false] %s5727_s5 }
 0x41a   : > { %4090 = vst [vmem:[%s6518_s23 + $0x3f8] sm:$0xff] %v3962_v25  ;;  %s5729_s30 = scalar_lea.vmem %s5728_s5, 32768  ;;  %p5730_p3 = scmp.lt.s32.totalorder %s7557_s17, %s5728_s5 }
 0x41b   : > { %p5725_p6 = pnand %p5724_p8, %p6018_p5  ;;  %p5731_p9 = scmp.lt.s32.totalorder %s5729_s30, %s5723_s15 }
 0x41d   : > { %p5726_p10 = pneg %p5725_p6  ;;  %p5732_p13 = por %p5731_p9, %p5730_p3 }
 0x41f   : > { %p5733_p11 = pnand %p5732_p13, %p5726_p10 }
 0x421   : > { %5736 = shalt.err (!%p5733_p11)
}
 0x422   : > { %s5737_s22 = scalar_lea.hbm %s7553_s10, 16384  ;;  %s5741_s8 = scalar_lea.hbm %s7611_s6, 32768 }
 0x423   : > { %p5738_p7 = scmp.ne.s32.totalorder %s7553_s10, %s5737_s22  ;;  %p5742_p2 = scmp.lt.u32.totalorder %s7553_s10, %s7611_s6 }
 0x424   : > { %p5743_p4 = scmp.lt.u32.totalorder %s5741_s8, %s5737_s22  ;;  %p5745_p8 = scmp.lt.u32.totalorder %s5737_s22, %s7553_s10 }
 0x425   : > { %p5739_p12 = pnand %p5738_p7, %p6018_p5 }
 0x426   : > { %p5744_p0 = por %p5743_p4, %p5742_p2 }
 0x427   : > { %p5740_p1 = pneg %p5739_p12 }
 0x428   : > { %p5746_p6 = por %p5745_p8, %p5744_p0 }
 0x42a   : > { %p5747_p10 = pnand %p5746_p6, %p5740_p1 }
 0x42c   : > { %5750 = shalt.err (!%p5747_p10)
}
 0x42d   : > { %s5824_s19 = smov 1024   ;;  %s5825_s20 = smov 64  }
 0x42e   : > { %4964 = dma.vmem_to_hbm [thread:$0]  (%p6018_p5), %s7557_s17, 16384, %s7553_s10, %s4092_s3, %s5824_s19, %s5824_s19, %s5825_s20  }
 0x42f PF: > { %s4143_s25 = sand.u32 1, %s5793_s26   ;;  %p7717_p3 = scmp.ne.s32.totalorder %s7635_s9, 0 }
 0x430   : > { %p7718_p9 = scmp.ge.s32.totalorder %s5805_s29, 2  ;;  %s4144_s11 = scalar_lea.sflag [#allocation5], %s4143_s25 }
 0x432   : > { %p4986_p13 = pnand %p7718_p9, %p7717_p3 }
 0x434   : > { %5784 = dma.done.wait (!%p4986_p13), %s4144_s11, 16384  }
 0x435   : > { %5786 = vsyncadd (!%p4986_p13), %s4144_s11, 4294950912  ;;  %s4153_s1 = scalar_lea.sflag [#allocation14], %s4143_s25 }
 0x436   : > { %5788 = dma.done.wait (!%p4986_p13), %s4153_s1, 8192  }
 0x437   : > { %5790 = vsyncadd (!%p4986_p13), %s4153_s1, 4294959104  ;;  %p29_p5 = scmp.ge.s32.totalorder %s6004_s18, 4   ;;  %s7719_s26 = smov %s5797_s27 }
 0x438   : > { %s7720_s27 = smov %s5801_s28  ;;  %s7721_s28 = smov %s6014_s21 }
 0x439   : > { %s7722_s29 = smov %s6004_s18  ;;  %31 = sbr.rel (!%p29_p5) target bundleno = 16 (0x10), region = 131 }
 0x440   :  { %4158 = vsyncpa [#allocation4], 1 }
 0x441   :  { %4160 = vsyncpa [#allocation4 + $0x1], 1 }
 0x442   :  { %4161 = vsyncpa [#allocation7], 1 }
 0x443   :  { %4163 = vsyncpa [#allocation7 + $0x1], 1 }
 0x444   :  { %4164 = vsyncpa [#allocation10], 1 }
 0x445   :  { %4165 = vsyncpa [#allocation5], 1 }
 0x446   :  { %4167 = vsyncpa [#allocation5 + $0x1], 1 }
 0x447   :  { %4168 = vsyncpa [#allocation14], 1 }
 0x448   :  { %4170 = vsyncpa [#allocation14 + $0x1], 1 }

</bundles_post_ra>
